<compile_context>
chip_gen: v7x
topology: tpu7x:2x2x1
jax: 0.10.0
libtpu: 0.0.40
codegen_flags: <defaults>
</compile_context>

<pallas_src>
import jax
import jax.numpy as jnp
from jax import lax
from jax.experimental import pallas as pl
from jax.experimental.pallas import tpu as pltpu

_HP = lax.Precision.HIGHEST
_BF16 = jnp.bfloat16


def _decoder_kernel(
    teach_ref,        # SMEM (T-1,) int32  : 1 -> teacher forcing at step t   (scalar prefetch)
    fetch_ref,        # SMEM (T-1,) int32  : tgt_emb block index per step      (scalar prefetch)
    tgt_emb_ref,      # (1, Bt, W)  f32    teacher-forced word embedding for this step
    h0_ref,           # (Bt, H)     f32    initial hidden state (this batch block)
    enc_ref,          # (Bt, S, H)  f32    encoder outputs (this batch block)
    s_enc_ref,        # (Bt, S)     f32    hoisted encoder part of folded attention scores
    emb_ref,          # (Vp, W)     bf16   embedding table (vocab padded to lane multiple)
    bos_emb_ref,      # (1, W)      f32    embedding of initial word id (= 1)
    wa_h_ref,         # (1, H)      f32    folded attention, hidden-state part
    b_att_ref,        # (1, 1)      f32    folded attention bias
    wih_ref,          # (W+H, 3H)   bf16   fused GRU input weight [word ; context]
    whh_ref,          # (H, 3H)     bf16   GRU recurrent weight
    bih_ref,          # (1, 3H)     f32
    bhh_ref,          # (1, 3H)     f32
    wo_ref,           # (H, Vp)     bf16   output projection
    bo_ref,           # (1, Vp)     f32    output bias (-1e9 in padded columns)
    out_ref,          # (1, Bt, Vp) f32    logits for this step / batch block
    h_scr,            # VMEM (Bt, H) f32   recurrent hidden state
    prev_scr,         # VMEM (Bt, W) f32   previous predicted-word embedding
):
    del fetch_ref  # only used by the tgt_emb index_map
    t = pl.program_id(1)
    n_steps = pl.num_programs(1)
    Bt, S, H = enc_ref.shape
    Vp, W = emb_ref.shape

    @pl.when(t == 0)
    def _init():
        h_scr[...] = h0_ref[...]
        # PyTorch initializes decoder_current_input_word to id 1.
        prev_scr[...] = jnp.broadcast_to(bos_emb_ref[...], (Bt, W))

    h = h_scr[...]                                                # (Bt, H) f32

    # ---- decoder input word: ground truth (teacher forcing) or prev argmax embedding ----
    use_teacher = teach_ref[t] != 0
    cur_word = jnp.where(use_teacher, tgt_emb_ref[0], prev_scr[...])      # (Bt, W) f32

    # ---- attention (linear1..4 + to_weight folded on host; encoder part hoisted) ----
    s_h = jnp.sum(h * wa_h_ref[...], axis=1, keepdims=True)              # (Bt, 1)
    scores = s_enc_ref[...] + s_h + b_att_ref[...]                        # (Bt, S)
    m = jnp.max(scores, axis=1, keepdims=True)
    e = jnp.exp(scores - m)
    attn = e / jnp.sum(e, axis=1, keepdims=True)                          # softmax over seq
    context = jnp.sum(attn[:, :, None] * enc_ref[...], axis=1)            # (Bt, H) VPU sum

    # ---- single GRU step (PyTorch gate order r, z, n), bf16 MXU, f32 accumulation ----
    xc = jnp.concatenate([cur_word, context], axis=1).astype(_BF16)       # (Bt, W+H)
    gi = jnp.dot(xc, wih_ref[...],
                 preferred_element_type=jnp.float32) + bih_ref[...]       # (Bt, 3H)
    gh = jnp.dot(h.astype(_BF16), whh_ref[...],
                 preferred_element_type=jnp.float32) + bhh_ref[...]       # (Bt, 3H)
    r = jax.nn.sigmoid(gi[:, 0:H] + gh[:, 0:H])
    z = jax.nn.sigmoid(gi[:, H:2 * H] + gh[:, H:2 * H])
    n = jnp.tanh(gi[:, 2 * H:3 * H] + r * gh[:, 2 * H:3 * H])
    h_new = (1.0 - z) * n + z * h

    # ---- output projection (raw logits; PyTorch calls them "logProb") ----
    logits = jnp.dot(h_new.astype(_BF16), wo_ref[...],
                     preferred_element_type=jnp.float32) + bo_ref[...]    # (Bt, Vp)
    out_ref[0] = logits
    h_scr[...] = h_new

    # ---- argmax feedback: only when the NEXT step exists and is NOT teacher forced ----
    nxt = jnp.minimum(t + 1, n_steps - 1)
    need_prev = jnp.logical_and(t + 1 < n_steps, teach_ref[nxt] == 0)

    @pl.when(need_prev)
    def _next_word():
        col = lax.broadcasted_iota(jnp.int32, (Bt, Vp), 1)
        maxv = jnp.max(logits, axis=1, keepdims=True)
        idx = jnp.min(jnp.where(logits == maxv, col, Vp), axis=1, keepdims=True)
        onehot = jnp.where(col == idx, 1.0, 0.0).astype(_BF16)
        # TODO(synk): at production vocab sizes replace this one-hot x embedding matmul with
        # an index-row DMA gather (emb in pl.ANY) and V-tile emb/wo per grid axis; the argmax
        # index lives in vector registers and there is no clean vector->scalar path to drive
        # a dynamic gather from an in-kernel computed index.
        prev_scr[...] = jnp.dot(onehot, emb_ref[...],
                                preferred_element_type=jnp.float32)


def _pick_batch_block(B, batch_block):
    divisors = [d for d in range(1, B + 1) if B % d == 0 and (d % 8 == 0 or d == B)]
    fitting = [d for d in divisors if d <= batch_block] or [min(divisors)]
    Bt = max(fitting)
    # Prefer >= 2 batch blocks (v7x megacore) when the halved block is still MXU-friendly.
    half = [d for d in fitting if d <= B // 2 and d >= 8]
    if Bt == B and half:
        Bt = max(half)
    return Bt


def _vmem_limit_bytes():
    cap = 64 * 1024 * 1024          # conservative default: v7x per-TC VMEM
    try:
        info = pltpu.get_tpu_info()
        cap = int(getattr(info, "vmem_capacity_bytes", cap))
    except Exception:
        pass
    return max(32 * 1024 * 1024, int(cap * 0.82))   # ~55 MiB on v7x, ~105 MiB on v5e/v6e


def decoder_forward_pallas(params, enc_last_hidden, enc_output, targets, use_teacher,
                           batch_block=128):
    f32 = jnp.float32
    h0 = enc_last_hidden[0].astype(f32)                        # (B, H)
    B, S, H = enc_output.shape
    V, W = params['emb'].shape
    T = targets.shape[1]
    n_steps = T - 1
    Bt = _pick_batch_block(B, batch_block)

    # ---- host-side algebra: fold the purely-linear attention stack (exact: no nonlinearity) ----
    w_att = params['w1']
    for wk in ('w2', 'w3', 'w4', 'wv'):
        w_att = jnp.dot(w_att, params[wk], precision=_HP)      # (2H, 1)
    b_att = params['b1']
    for bk, wk in (('b2', 'w2'), ('b3', 'w3'), ('b4', 'w4')):
        b_att = jnp.dot(b_att, params[wk], precision=_HP) + params[bk]
    b_att = jnp.dot(b_att, params['wv'], precision=_HP)        # (1, 1)
    wa_enc = w_att[:H, 0]                                      # (H,)   encoder part
    wa_h = w_att[H:].T                                         # (1, H) hidden-state part

    # time-invariant encoder attention projection, hoisted out of the per-step loop
    s_enc = jnp.einsum('bsh,h->bs', enc_output, wa_enc, precision=_HP)   # (B, S)

    # ---- vocab padded to a lane multiple; padded bias never wins the argmax ----
    Vp = ((V + 127) // 128) * 128
    pad = Vp - V
    wo_p = jnp.pad(params['wo'], ((0, 0), (0, pad))).astype(_BF16)        # (H, Vp)
    bo_p = jnp.pad(params['bo'], ((0, 0), (0, pad)), constant_values=-1e9)  # (1, Vp) f32
    emb_p = jnp.pad(params['emb'], ((0, pad), (0, 0))).astype(_BF16)      # (Vp, W)

    # fused GRU input weight: [word ; context] -> gates
    wih = jnp.concatenate([params['wih_x'], params['wih_c']], axis=0).astype(_BF16)  # (W+H, 3H)
    whh = params['whh'].astype(_BF16)

    # teacher-forced inputs: embedding(targets[:, i]) for i in 0..T-2 -> (T-1, B, W)
    tgt_emb = jnp.transpose(params['emb'][targets[:, :n_steps]], (1, 0, 2))
    bos_emb = params['emb'][1:2]                               # (1, W)

    teach = use_teacher.astype(jnp.int32)
    steps = jnp.arange(n_steps, dtype=jnp.int32)
    # block to fetch per step: the last teacher-forced step <= t (repeats -> DMA skipped)
    fetch_idx = lax.cummax(jnp.where(teach != 0, steps, 0), axis=0).astype(jnp.int32)

    def run(single_buffer):
        ckw = dict(pipeline_mode=pl.Buffered(buffer_count=1)) if single_buffer else {}

        def cmap(rank):
            return lambda bb, t, tm, fi: (0,) * rank

        in_specs = [
            pl.BlockSpec((1, Bt, W), lambda bb, t, tm, fi: (fi[t], bb, 0)),  # tgt_emb (gated)
            pl.BlockSpec((Bt, H),    lambda bb, t, tm, fi: (bb, 0)),         # h0
            pl.BlockSpec((Bt, S, H), lambda bb, t, tm, fi: (bb, 0, 0)),      # encoder_output
            pl.BlockSpec((Bt, S),    lambda bb, t, tm, fi: (bb, 0)),         # hoisted s_enc
            pl.BlockSpec((Vp, W),       cmap(2), **ckw),                     # embedding table
            pl.BlockSpec((1, W),        cmap(2), **ckw),                     # BOS embedding row
            pl.BlockSpec((1, H),        cmap(2), **ckw),                     # folded attn (hidden)
            pl.BlockSpec((1, 1),        cmap(2), **ckw),                     # folded attn bias
            pl.BlockSpec((W + H, 3 * H), cmap(2), **ckw),                    # fused GRU W_ih
            pl.BlockSpec((H, 3 * H),    cmap(2), **ckw),                     # GRU W_hh
            pl.BlockSpec((1, 3 * H),    cmap(2), **ckw),                     # b_ih
            pl.BlockSpec((1, 3 * H),    cmap(2), **ckw),                     # b_hh
            pl.BlockSpec((H, Vp),       cmap(2), **ckw),                     # to_final_output W
            pl.BlockSpec((1, Vp),       cmap(2), **ckw),                     # to_final_output b
        ]
        out_specs = pl.BlockSpec((1, Bt, Vp), lambda bb, t, tm, fi: (t, bb, 0))

        return pl.pallas_call(
            _decoder_kernel,
            out_shape=jax.ShapeDtypeStruct((n_steps, B, Vp), jnp.float32),
            grid_spec=pltpu.PrefetchScalarGridSpec(
                num_scalar_prefetch=2,
                grid=(B // Bt, n_steps),      # (parallel batch blocks, sequential time)
                in_specs=in_specs,
                out_specs=out_specs,
                scratch_shapes=[pltpu.VMEM((Bt, H), jnp.float32),   # hidden state
                                pltpu.VMEM((Bt, W), jnp.float32)],  # prev-word embedding
            ),
            compiler_params=pltpu.CompilerParams(
                dimension_semantics=("parallel", "arbitrary"),
                vmem_limit_bytes=_vmem_limit_bytes(),
            ),
        )(teach, fetch_idx,
          tgt_emb, h0, enc_output.astype(f32), s_enc,
          emb_p, bos_emb, wa_h, b_att,
          wih, whh, params['bih'], params['bhh'], wo_p, bo_p)

    try:
        raw = run(True)
    except Exception:
        # pl.Buffered(1) single-buffering not supported by this JAX version: use defaults.
        raw = run(False)

    seq_logits = jnp.transpose(raw, (1, 0, 2))[:, :, :V]       # (B, T-1, V) like torch.cat(dim=1)
    seq_predictions = jnp.argmax(seq_logits, axis=2)           # .max(2)[1]
    return seq_logits, seq_predictions


def decoder_forward_ref(params, enc_last_hidden, enc_output, targets, use_teacher,
                        matmul_dtype=jnp.float32):
    """Pure-JAX reference mirroring the PyTorch forward (unfused attention linears).
    matmul_dtype=bfloat16 mirrors the kernel's MXU numerics; float32 is the exact module."""
    def mm(a, w):
        if matmul_dtype == jnp.float32:
            return jnp.dot(a, w, precision=_HP)
        return jnp.dot(a.astype(matmul_dtype), w.astype(matmul_dtype),
                       preferred_element_type=jnp.float32)

    h = enc_last_hidden[0]
    B, S, H = enc_output.shape
    T = targets.shape[1]
    word = jnp.ones((B,), jnp.int32)
    logits_all = []
    for i in range(T - 1):
        cur = jnp.where(use_teacher[i] == 1,
                        params['emb'][targets[:, i]],
                        params['emb'][word])
        hb = jnp.broadcast_to(h[:, None, :], (B, S, H))
        x = jnp.concatenate([enc_output, hb], axis=2).reshape(-1, 2 * H)
        x = jnp.dot(x, params['w1'], precision=_HP) + params['b1'][0]
        x = jnp.dot(x, params['w2'], precision=_HP) + params['b2'][0]
        x = jnp.dot(x, params['w3'], precision=_HP) + params['b3'][0]
        x = jnp.dot(x, params['w4'], precision=_HP) + params['b4'][0]
        aw = jnp.dot(x, params['wv'], precision=_HP).reshape(B, S)
        aw = jax.nn.softmax(aw, axis=1)
        context = jnp.einsum('bs,bsh->bh', aw, enc_output, precision=_HP)
        gi = mm(cur, params['wih_x']) + mm(context, params['wih_c']) + params['bih'][0]
        gh = mm(h, params['whh']) + params['bhh'][0]
        r = jax.nn.sigmoid(gi[:, :H] + gh[:, :H])
        z = jax.nn.sigmoid(gi[:, H:2 * H] + gh[:, H:2 * H])
        n = jnp.tanh(gi[:, 2 * H:] + r * gh[:, 2 * H:])
        h = (1.0 - z) * n + z * h
        logits = mm(h, params['wo']) + params['bo'][0]
        logits_all.append(logits)
        word = jnp.argmax(logits, axis=1).astype(jnp.int32)
    lp = jnp.stack(logits_all, axis=1)
    return lp, jnp.argmax(lp, axis=2)


if __name__ == "__main__":
    # Small synthetic shapes (original: hidden=512, word/embed dim=1024, vocab=output_size).
    B, S, H, W, V, T = 64, 8, 128, 128, 300, 8
    n_steps = T - 1

    key = jax.random.PRNGKey(0)
    ks = jax.random.split(key, 24)
    f = jnp.float32
    params = {
        'emb':   0.1 * jax.random.normal(ks[0], (V, W), f),
        'w1':    0.1 * jax.random.normal(ks[1], (2 * H, H), f),
        'b1':    0.05 * jax.random.normal(ks[2], (1, H), f),
        'w2':    0.1 * jax.random.normal(ks[3], (H, H), f),
        'b2':    0.05 * jax.random.normal(ks[4], (1, H), f),
        'w3':    0.1 * jax.random.normal(ks[5], (H, H), f),
        'b3':    0.05 * jax.random.normal(ks[6], (1, H), f),
        'w4':    0.1 * jax.random.normal(ks[7], (H, H), f),
        'b4':    0.05 * jax.random.normal(ks[8], (1, H), f),
        'wv':    0.1 * jax.random.normal(ks[9], (H, 1), f),
        'wih_x': 0.1 * jax.random.normal(ks[10], (W, 3 * H), f),
        'wih_c': 0.1 * jax.random.normal(ks[11], (H, 3 * H), f),
        'whh':   0.1 * jax.random.normal(ks[12], (H, 3 * H), f),
        'bih':   0.05 * jax.random.normal(ks[13], (1, 3 * H), f),
        'bhh':   0.05 * jax.random.normal(ks[14], (1, 3 * H), f),
        'wo':    0.1 * jax.random.normal(ks[15], (H, V), f),
        'bo':    0.05 * jax.random.normal(ks[16], (1, V), f),
    }

    enc_last_hidden = jax.random.normal(ks[17], (1, B, H), f)   # nn.GRU hidden layout
    enc_output = jax.random.normal(ks[18], (B, S, H), f)
    targets = jax.random.randint(ks[19], (B, T), 0, V)

    # ---- check 1: fully teacher-forced (training-style) ----
    tf_mask = jnp.ones((n_steps,), jnp.int32)
    lp, pred = jax.block_until_ready(
        decoder_forward_pallas(params, enc_last_hidden, enc_output, targets, tf_mask))
    assert lp.shape == (B, n_steps, V) and pred.shape == (B, n_steps)
    ref_lp, _ = decoder_forward_ref(params, enc_last_hidden, enc_output, targets, tf_mask,
                                    matmul_dtype=jnp.bfloat16)
    err_bf = float(jnp.max(jnp.abs(lp - ref_lp)))
    assert jnp.allclose(lp, ref_lp, atol=1e-2, rtol=1e-2), err_bf
    ref32_lp, _ = decoder_forward_ref(params, enc_last_hidden, enc_output, targets, tf_mask,
                                      matmul_dtype=jnp.float32)
    err_f32 = float(jnp.max(jnp.abs(lp - ref32_lp)))
    assert jnp.allclose(lp, ref32_lp, atol=0.15, rtol=0.1), err_f32

    # ---- check 2: pure greedy feedback (inference-style, like .infer()) ----
    fb_mask = jnp.zeros((n_steps,), jnp.int32)
    lp2, pred2 = jax.block_until_ready(
        decoder_forward_pallas(params, enc_last_hidden, enc_output, targets, fb_mask))
    ref2_lp, ref2_pred = decoder_forward_ref(params, enc_last_hidden, enc_output, targets,
                                             fb_mask, matmul_dtype=jnp.bfloat16)
    err_step0 = float(jnp.max(jnp.abs(lp2[:, 0] - ref2_lp[:, 0])))
    assert jnp.allclose(lp2[:, 0], ref2_lp[:, 0], atol=1e-2, rtol=1e-2), err_step0
    agree2 = float(jnp.mean((pred2 == ref2_pred).astype(jnp.float32)))
    assert agree2 > 0.7, agree2   # greedy feedback may diverge on rare bf16 rounding ties

    # ---- check 3: mixed mask like the module's per-step coin flip (tr_steps = 0) ----
    # TODO(synk): PyTorch draws this with Python `random` per step; reproduced as a
    # deterministic precomputed mask fed to the kernel via scalar prefetch.
    threshold = jax.nn.sigmoid(jnp.float32(0.0) / 20.0 + 0.85)
    u = jax.random.uniform(ks[20], (n_steps,), minval=0.05, maxval=0.995)
    mixed_mask = (u > threshold).astype(jnp.int32)
    lp3, pred3 = jax.block_until_ready(
        decoder_forward_pallas(params, enc_last_hidden, enc_output, targets, mixed_mask))
    ref3_lp, ref3_pred = decoder_forward_ref(params, enc_last_hidden, enc_output, targets,
                                             mixed_mask, matmul_dtype=jnp.bfloat16)
    assert lp3.shape == (B, n_steps, V) and bool(jnp.all(jnp.isfinite(lp3)))
    agree3 = float(jnp.mean((pred3 == ref3_pred).astype(jnp.float32)))
    assert agree3 > 0.7, agree3

    print("KERNEL_OK")
</pallas_src>

<mosaic_0001>
module attributes {stable_mosaic.version = 11 : i64} {
  func.func @_decoder_kernel(%arg0: i32, %arg1: i32, %arg2: memref<7xi32, #tpu.memory_space<smem>>, %arg3: memref<7xi32, #tpu.memory_space<smem>>, %arg4: memref<1x32x128xf32, #tpu.memory_space<vmem>>, %arg5: memref<32x128xf32, #tpu.memory_space<vmem>>, %arg6: memref<32x8x128xf32, #tpu.memory_space<vmem>>, %arg7: memref<32x8xf32, #tpu.memory_space<vmem>>, %arg8: memref<384x128xbf16, #tpu.memory_space<vmem>>, %arg9: memref<1x128xf32, #tpu.memory_space<vmem>>, %arg10: memref<1x128xf32, #tpu.memory_space<vmem>>, %arg11: memref<1x1xf32, #tpu.memory_space<vmem>>, %arg12: memref<256x384xbf16, #tpu.memory_space<vmem>>, %arg13: memref<128x384xbf16, #tpu.memory_space<vmem>>, %arg14: memref<1x384xf32, #tpu.memory_space<vmem>>, %arg15: memref<1x384xf32, #tpu.memory_space<vmem>>, %arg16: memref<128x384xbf16, #tpu.memory_space<vmem>>, %arg17: memref<1x384xf32, #tpu.memory_space<vmem>>, %arg18: memref<1x32x384xf32, #tpu.memory_space<vmem>>, %arg19: memref<32x128xf32, #tpu.memory_space<vmem>>, %arg20: memref<32x128xf32, #tpu.memory_space<vmem>>) attributes {dimension_semantics = [#tpu.dimension_semantics<parallel>, #tpu.dimension_semantics<arbitrary>], iteration_bounds = array<i64: 2, 7>, scalar_prefetch = 2 : i64, scratch_operands = 2 : i64, tpu.core_type = #tpu.core_type<tc>, window_params = [{transform_indices = @transform_0, window_bounds = array<i64: 1, 32, 128>}, {transform_indices = @transform_1, window_bounds = array<i64: 32, 128>}, {transform_indices = @transform_2, window_bounds = array<i64: 32, 8, 128>}, {transform_indices = @transform_3, window_bounds = array<i64: 32, 8>}, {pipeline_mode = #tpu.pipeline_mode<synchronous>, transform_indices = @transform_4, window_bounds = array<i64: 384, 128>}, {pipeline_mode = #tpu.pipeline_mode<synchronous>, transform_indices = @transform_5, window_bounds = array<i64: 1, 128>}, {pipeline_mode = #tpu.pipeline_mode<synchronous>, transform_indices = @transform_6, window_bounds = array<i64: 1, 128>}, {pipeline_mode = #tpu.pipeline_mode<synchronous>, transform_indices = @transform_7, window_bounds = array<i64: 1, 1>}, {pipeline_mode = #tpu.pipeline_mode<synchronous>, transform_indices = @transform_8, window_bounds = array<i64: 256, 384>}, {pipeline_mode = #tpu.pipeline_mode<synchronous>, transform_indices = @transform_9, window_bounds = array<i64: 128, 384>}, {pipeline_mode = #tpu.pipeline_mode<synchronous>, transform_indices = @transform_10, window_bounds = array<i64: 1, 384>}, {pipeline_mode = #tpu.pipeline_mode<synchronous>, transform_indices = @transform_11, window_bounds = array<i64: 1, 384>}, {pipeline_mode = #tpu.pipeline_mode<synchronous>, transform_indices = @transform_12, window_bounds = array<i64: 128, 384>}, {pipeline_mode = #tpu.pipeline_mode<synchronous>, transform_indices = @transform_13, window_bounds = array<i64: 1, 384>}, {transform_indices = @transform_14, window_bounds = array<i64: 1, 32, 384>}]} {
    %c0_i32 = arith.constant 0 : i32
    %0 = arith.cmpi eq, %arg1, %c0_i32 : i32
    %1 = arith.extui %0 : i1 to i32
    %c0_i32_0 = arith.constant 0 : i32
    %2 = arith.cmpi ne, %1, %c0_i32_0 : i32
    scf.if %2 {
      %c0_46 = arith.constant 0 : index
      %c0_47 = arith.constant 0 : index
      %95 = vector.load %arg5[%c0_46, %c0_47] : memref<32x128xf32, #tpu.memory_space<vmem>>, vector<32x128xf32>
      %c0_48 = arith.constant 0 : index
      %c0_49 = arith.constant 0 : index
      %96 = vector.load %arg19[%c0_48, %c0_49] : memref<32x128xf32, #tpu.memory_space<vmem>>, vector<32x128xf32>
      tpu.vector_store %arg19[%c0_48, %c0_49], %95 {strides = array<i32>} : memref<32x128xf32, #tpu.memory_space<vmem>>, vector<32x128xf32>,
      %c0_50 = arith.constant 0 : index
      %c0_51 = arith.constant 0 : index
      %97 = vector.load %arg9[%c0_50, %c0_51] : memref<1x128xf32, #tpu.memory_space<vmem>>, vector<1x128xf32>
      %98 = vector.shape_cast %97 : vector<1x128xf32> to vector<1x128xf32>
      %99 = vector.broadcast %98 : vector<1x128xf32> to vector<32x128xf32>
      %c0_52 = arith.constant 0 : index
      %c0_53 = arith.constant 0 : index
      %100 = vector.load %arg20[%c0_52, %c0_53] : memref<32x128xf32, #tpu.memory_space<vmem>>, vector<32x128xf32>
      tpu.vector_store %arg20[%c0_52, %c0_53], %99 {strides = array<i32>} : memref<32x128xf32, #tpu.memory_space<vmem>>, vector<32x128xf32>,
    } else {
    }
    %c0 = arith.constant 0 : index
    %c0_1 = arith.constant 0 : index
    %3 = vector.load %arg19[%c0, %c0_1] : memref<32x128xf32, #tpu.memory_space<vmem>>, vector<32x128xf32>
    %4 = arith.index_cast %arg1 : i32 to index
    %5 = memref.load %arg2[%4] : memref<7xi32, #tpu.memory_space<smem>>
    %c0_i32_2 = arith.constant 0 : i32
    %6 = arith.cmpi ne, %5, %c0_i32_2 : i32
    %c0_3 = arith.constant 0 : index
    %c0_4 = arith.constant 0 : index
    %c0_5 = arith.constant 0 : index
    %7 = vector.load %arg4[%c0_3, %c0_4, %c0_5] : memref<1x32x128xf32, #tpu.memory_space<vmem>>, vector<1x32x128xf32>
    %8 = vector.shape_cast %7 : vector<1x32x128xf32> to vector<32x128xf32>
    %c0_6 = arith.constant 0 : index
    %c0_7 = arith.constant 0 : index
    %9 = vector.load %arg20[%c0_6, %c0_7] : memref<32x128xf32, #tpu.memory_space<vmem>>, vector<32x128xf32>
    %10 = arith.select %6, %8, %9 : vector<32x128xf32>
    %c0_8 = arith.constant 0 : index
    %c0_9 = arith.constant 0 : index
    %11 = vector.load %arg10[%c0_8, %c0_9] : memref<1x128xf32, #tpu.memory_space<vmem>>, vector<1x128xf32>
    %12 = vector.broadcast %11 : vector<1x128xf32> to vector<32x128xf32>
    %13 = arith.mulf %3, %12 : vector<32x128xf32>
    %cst = arith.constant dense<0.000000e+00> : vector<32xf32>
    %14 = vector.multi_reduction <add>, %13, %cst [1] : vector<32x128xf32> to vector<32xf32>
    %15 = vector.shape_cast %14 : vector<32xf32> to vector<32x1xf32>
    %c0_10 = arith.constant 0 : index
    %c0_11 = arith.constant 0 : index
    %16 = vector.load %arg7[%c0_10, %c0_11] : memref<32x8xf32, #tpu.memory_space<vmem>>, vector<32x8xf32>
    %17 = vector.broadcast %15 : vector<32x1xf32> to vector<32x8xf32>
    %18 = arith.addf %16, %17 : vector<32x8xf32>
    %c0_12 = arith.constant 0 : index
    %c0_13 = arith.constant 0 : index
    %19 = vector.load %arg11[%c0_12, %c0_13] : memref<1x1xf32, #tpu.memory_space<vmem>>, vector<1x1xf32>
    %20 = vector.broadcast %19 : vector<1x1xf32> to vector<32x8xf32>
    %21 = arith.addf %18, %20 : vector<32x8xf32>
    %cst_14 = arith.constant dense<0xFF800000> : vector<32xf32>
    %22 = vector.multi_reduction <maximumf>, %21, %cst_14 [1] : vector<32x8xf32> to vector<32xf32>
    %23 = vector.shape_cast %22 : vector<32xf32> to vector<32x1xf32>
    %24 = vector.broadcast %23 : vector<32x1xf32> to vector<32x8xf32>
    %25 = arith.subf %21, %24 : vector<32x8xf32>
    %26 = math.exp %25 : vector<32x8xf32>
    %cst_15 = arith.constant dense<0.000000e+00> : vector<32xf32>
    %27 = vector.multi_reduction <add>, %26, %cst_15 [1] : vector<32x8xf32> to vector<32xf32>
    %28 = vector.shape_cast %27 : vector<32xf32> to vector<32x1xf32>
    %29 = vector.broadcast %28 : vector<32x1xf32> to vector<32x8xf32>
    %30 = arith.divf %26, %29 : vector<32x8xf32>
    %31 = vector.shape_cast %30 : vector<32x8xf32> to vector<32x8x1xf32>
    %c0_16 = arith.constant 0 : index
    %c0_17 = arith.constant 0 : index
    %c0_18 = arith.constant 0 : index
    %32 = vector.load %arg6[%c0_16, %c0_17, %c0_18] : memref<32x8x128xf32, #tpu.memory_space<vmem>>, vector<32x8x128xf32>
    %33 = vector.broadcast %31 : vector<32x8x1xf32> to vector<32x8x128xf32>
    %34 = arith.mulf %33, %32 : vector<32x8x128xf32>
    %cst_19 = arith.constant dense<0.000000e+00> : vector<32x128xf32>
    %35 = vector.multi_reduction <add>, %34, %cst_19 [1] : vector<32x8x128xf32> to vector<32x128xf32>
    %36 = tpu.concatenate %10, %35 in 1 : vector<32x128xf32>, vector<32x128xf32> -> vector<32x256xf32>
    %37 = arith.truncf %36 : vector<32x256xf32> to vector<32x256xbf16>
    %c0_20 = arith.constant 0 : index
    %c0_21 = arith.constant 0 : index
    %38 = vector.load %arg12[%c0_20, %c0_21] : memref<256x384xbf16, #tpu.memory_space<vmem>>, vector<256x384xbf16>
    %cst_22 = arith.constant dense<0.000000e+00> : vector<32x384xf32>
    %39 = tpu.matmul %37, %38, %cst_22 {dimension_numbers = #tpu.dot_dimension_numbers<[1], [0], [0], [1], [0, 0, 1, 1], [], []>} : vector<32x256xbf16>, vector<256x384xbf16>, vector<32x384xf32> -> vector<32x384xf32>
    %c0_23 = arith.constant 0 : index
    %c0_24 = arith.constant 0 : index
    %40 = vector.load %arg14[%c0_23, %c0_24] : memref<1x384xf32, #tpu.memory_space<vmem>>, vector<1x384xf32>
    %41 = vector.broadcast %40 : vector<1x384xf32> to vector<32x384xf32>
    %42 = arith.addf %39, %41 : vector<32x384xf32>
    %43 = arith.truncf %3 : vector<32x128xf32> to vector<32x128xbf16>
    %c0_25 = arith.constant 0 : index
    %c0_26 = arith.constant 0 : index
    %44 = vector.load %arg13[%c0_25, %c0_26] : memref<128x384xbf16, #tpu.memory_space<vmem>>, vector<128x384xbf16>
    %cst_27 = arith.constant dense<0.000000e+00> : vector<32x384xf32>
    %45 = tpu.matmul %43, %44, %cst_27 {dimension_numbers = #tpu.dot_dimension_numbers<[1], [0], [0], [1], [0, 0, 1, 1], [], []>} : vector<32x128xbf16>, vector<128x384xbf16>, vector<32x384xf32> -> vector<32x384xf32>
    %c0_28 = arith.constant 0 : index
    %c0_29 = arith.constant 0 : index
    %46 = vector.load %arg15[%c0_28, %c0_29] : memref<1x384xf32, #tpu.memory_space<vmem>>, vector<1x384xf32>
    %47 = vector.broadcast %46 : vector<1x384xf32> to vector<32x384xf32>
    %48 = arith.addf %45, %47 : vector<32x384xf32>
    %49 = vector.extract_strided_slice %42 {offsets = [0, 0], sizes = [32, 128], strides = [1, 1]} : vector<32x384xf32> to vector<32x128xf32>
    %50 = vector.extract_strided_slice %48 {offsets = [0, 0], sizes = [32, 128], strides = [1, 1]} : vector<32x384xf32> to vector<32x128xf32>
    %51 = arith.addf %49, %50 : vector<32x128xf32>
    %52 = arith.negf %51 : vector<32x128xf32>
    %53 = math.exp %52 : vector<32x128xf32>
    %cst_30 = arith.constant 1.000000e+00 : f32
    %54 = vector.broadcast %cst_30 : f32 to vector<32x128xf32>
    %55 = arith.addf %54, %53 : vector<32x128xf32>
    %56 = arith.divf %54, %55 : vector<32x128xf32>
    %57 = vector.extract_strided_slice %42 {offsets = [0, 128], sizes = [32, 128], strides = [1, 1]} : vector<32x384xf32> to vector<32x128xf32>
    %58 = vector.extract_strided_slice %48 {offsets = [0, 128], sizes = [32, 128], strides = [1, 1]} : vector<32x384xf32> to vector<32x128xf32>
    %59 = arith.addf %57, %58 : vector<32x128xf32>
    %60 = arith.negf %59 : vector<32x128xf32>
    %61 = math.exp %60 : vector<32x128xf32>
    %cst_31 = arith.constant 1.000000e+00 : f32
    %62 = vector.broadcast %cst_31 : f32 to vector<32x128xf32>
    %63 = arith.addf %62, %61 : vector<32x128xf32>
    %64 = arith.divf %62, %63 : vector<32x128xf32>
    %65 = vector.extract_strided_slice %42 {offsets = [0, 256], sizes = [32, 128], strides = [1, 1]} : vector<32x384xf32> to vector<32x128xf32>
    %66 = vector.extract_strided_slice %48 {offsets = [0, 256], sizes = [32, 128], strides = [1, 1]} : vector<32x384xf32> to vector<32x128xf32>
    %67 = arith.mulf %56, %66 : vector<32x128xf32>
    %68 = arith.addf %65, %67 : vector<32x128xf32>
    %69 = math.tanh %68 : vector<32x128xf32>
    %cst_32 = arith.constant 1.000000e+00 : f32
    %70 = vector.broadcast %cst_32 : f32 to vector<32x128xf32>
    %71 = arith.subf %70, %64 : vector<32x128xf32>
    %72 = arith.mulf %71, %69 : vector<32x128xf32>
    %73 = arith.mulf %64, %3 : vector<32x128xf32>
    %74 = arith.addf %72, %73 : vector<32x128xf32>
    %75 = arith.truncf %74 : vector<32x128xf32> to vector<32x128xbf16>
    %c0_33 = arith.constant 0 : index
    %c0_34 = arith.constant 0 : index
    %76 = vector.load %arg16[%c0_33, %c0_34] : memref<128x384xbf16, #tpu.memory_space<vmem>>, vector<128x384xbf16>
    %cst_35 = arith.constant dense<0.000000e+00> : vector<32x384xf32>
    %77 = tpu.matmul %75, %76, %cst_35 {dimension_numbers = #tpu.dot_dimension_numbers<[1], [0], [0], [1], [0, 0, 1, 1], [], []>} : vector<32x128xbf16>, vector<128x384xbf16>, vector<32x384xf32> -> vector<32x384xf32>
    %c0_36 = arith.constant 0 : index
    %c0_37 = arith.constant 0 : index
    %78 = vector.load %arg17[%c0_36, %c0_37] : memref<1x384xf32, #tpu.memory_space<vmem>>, vector<1x384xf32>
    %79 = vector.broadcast %78 : vector<1x384xf32> to vector<32x384xf32>
    %80 = arith.addf %77, %79 : vector<32x384xf32>
    %c0_38 = arith.constant 0 : index
    %c0_39 = arith.constant 0 : index
    %c0_40 = arith.constant 0 : index
    %81 = vector.load %arg18[%c0_38, %c0_39, %c0_40] : memref<1x32x384xf32, #tpu.memory_space<vmem>>, vector<1x32x384xf32>
    %82 = vector.shape_cast %81 : vector<1x32x384xf32> to vector<32x384xf32>
    %83 = vector.shape_cast %80 : vector<32x384xf32> to vector<1x32x384xf32>
    tpu.vector_store %arg18[%c0_38, %c0_39, %c0_40], %83 {strides = array<i32>} : memref<1x32x384xf32, #tpu.memory_space<vmem>>, vector<1x32x384xf32>,
    %c0_41 = arith.constant 0 : index
    %c0_42 = arith.constant 0 : index
    %84 = vector.load %arg19[%c0_41, %c0_42] : memref<32x128xf32, #tpu.memory_space<vmem>>, vector<32x128xf32>
    tpu.vector_store %arg19[%c0_41, %c0_42], %74 {strides = array<i32>} : memref<32x128xf32, #tpu.memory_space<vmem>>, vector<32x128xf32>,
    %c1_i32 = arith.constant 1 : i32
    %85 = arith.addi %arg1, %c1_i32 : i32
    %c6_i32 = arith.constant 6 : i32
    %86 = arith.minsi %85, %c6_i32 : i32
    %c1_i32_43 = arith.constant 1 : i32
    %87 = arith.addi %arg1, %c1_i32_43 : i32
    %c7_i32 = arith.constant 7 : i32
    %88 = arith.cmpi slt, %87, %c7_i32 : i32
    %89 = arith.index_cast %86 : i32 to index
    %90 = memref.load %arg2[%89] : memref<7xi32, #tpu.memory_space<smem>>
    %c0_i32_44 = arith.constant 0 : i32
    %91 = arith.cmpi eq, %90, %c0_i32_44 : i32
    %92 = arith.andi %88, %91 : i1
    %93 = arith.extui %92 : i1 to i32
    %c0_i32_45 = arith.constant 0 : i32
    %94 = arith.cmpi ne, %93, %c0_i32_45 : i32
    scf.if %94 {
      %95 = tpu.iota {dimensions = array<i32: 1>} : vector<32x384xi32>
      %cst_46 = arith.constant dense<0xFF800000> : vector<32xf32>
      %96 = vector.multi_reduction <maximumf>, %80, %cst_46 [1] : vector<32x384xf32> to vector<32xf32>
      %97 = vector.shape_cast %96 : vector<32xf32> to vector<32x1xf32>
      %98 = vector.broadcast %97 : vector<32x1xf32> to vector<32x384xf32>
      %99 = arith.cmpf oeq, %80, %98 : vector<32x384xf32>
      %c384_i32 = arith.constant 384 : i32
      %100 = vector.broadcast %c384_i32 : i32 to vector<32x384xi32>
      %101 = arith.select %99, %95, %100 : vector<32x384xi1>, vector<32x384xi32>
      %cst_47 = arith.constant dense<2147483647> : vector<32xi32>
      %102 = vector.multi_reduction <minsi>, %101, %cst_47 [1] : vector<32x384xi32> to vector<32xi32>
      %103 = vector.shape_cast %102 : vector<32xi32> to vector<32x1xi32>
      %104 = vector.broadcast %103 : vector<32x1xi32> to vector<32x384xi32>
      %105 = arith.cmpi eq, %95, %104 : vector<32x384xi32>
      %cst_48 = arith.constant 1.000000e+00 : f32
      %cst_49 = arith.constant 0.000000e+00 : f32
      %106 = vector.broadcast %cst_48 : f32 to vector<32x384xf32>
      %107 = vector.broadcast %cst_49 : f32 to vector<32x384xf32>
      %108 = arith.select %105, %106, %107 : vector<32x384xi1>, vector<32x384xf32>
      %109 = arith.truncf %108 : vector<32x384xf32> to vector<32x384xbf16>
      %c0_50 = arith.constant 0 : index
      %c0_51 = arith.constant 0 : index
      %110 = vector.load %arg8[%c0_50, %c0_51] : memref<384x128xbf16, #tpu.memory_space<vmem>>, vector<384x128xbf16>
      %cst_52 = arith.constant dense<0.000000e+00> : vector<32x128xf32>
      %111 = tpu.matmul %109, %110, %cst_52 {dimension_numbers = #tpu.dot_dimension_numbers<[1], [0], [0], [1], [0, 0, 1, 1], [], []>} : vector<32x384xbf16>, vector<384x128xbf16>, vector<32x128xf32> -> vector<32x128xf32>
      %c0_53 = arith.constant 0 : index
      %c0_54 = arith.constant 0 : index
      %112 = vector.load %arg20[%c0_53, %c0_54] : memref<32x128xf32, #tpu.memory_space<vmem>>, vector<32x128xf32>
      tpu.vector_store %arg20[%c0_53, %c0_54], %111 {strides = array<i32>} : memref<32x128xf32, #tpu.memory_space<vmem>>, vector<32x128xf32>,
    } else {
    }
    return
  }
  func.func @transform_0(%arg0: i32, %arg1: i32, %arg2: memref<7xi32, #tpu.memory_space<smem>>, %arg3: memref<7xi32, #tpu.memory_space<smem>>) -> (i32, i32, i32) {
    %0 = arith.index_cast %arg1 : i32 to index
    %1 = memref.load %arg3[%0] : memref<7xi32, #tpu.memory_space<smem>>
    %c0_i32 = arith.constant 0 : i32
    %c0_i32_0 = arith.constant 0 : i32
    return %1, %arg0, %c0_i32 : i32, i32, i32
  }
  func.func @transform_1(%arg0: i32, %arg1: i32, %arg2: memref<7xi32, #tpu.memory_space<smem>>, %arg3: memref<7xi32, #tpu.memory_space<smem>>) -> (i32, i32) {
    %c0_i32 = arith.constant 0 : i32
    %c0_i32_0 = arith.constant 0 : i32
    return %arg0, %c0_i32 : i32, i32
  }
  func.func @transform_2(%arg0: i32, %arg1: i32, %arg2: memref<7xi32, #tpu.memory_space<smem>>, %arg3: memref<7xi32, #tpu.memory_space<smem>>) -> (i32, i32, i32) {
    %c0_i32 = arith.constant 0 : i32
    %c0_i32_0 = arith.constant 0 : i32
    %c0_i32_1 = arith.constant 0 : i32
    return %arg0, %c0_i32, %c0_i32_0 : i32, i32, i32
  }
  func.func @transform_3(%arg0: i32, %arg1: i32, %arg2: memref<7xi32, #tpu.memory_space<smem>>, %arg3: memref<7xi32, #tpu.memory_space<smem>>) -> (i32, i32) {
    %c0_i32 = arith.constant 0 : i32
    %c0_i32_0 = arith.constant 0 : i32
    return %arg0, %c0_i32 : i32, i32
  }
  func.func @transform_4(%arg0: i32, %arg1: i32, %arg2: memref<7xi32, #tpu.memory_space<smem>>, %arg3: memref<7xi32, #tpu.memory_space<smem>>) -> (i32, i32) {
    %c0_i32 = arith.constant 0 : i32
    %c0_i32_0 = arith.constant 0 : i32
    %c0_i32_1 = arith.constant 0 : i32
    return %c0_i32, %c0_i32_0 : i32, i32
  }
  func.func @transform_5(%arg0: i32, %arg1: i32, %arg2: memref<7xi32, #tpu.memory_space<smem>>, %arg3: memref<7xi32, #tpu.memory_space<smem>>) -> (i32, i32) {
    %c0_i32 = arith.constant 0 : i32
    %c0_i32_0 = arith.constant 0 : i32
    %c0_i32_1 = arith.constant 0 : i32
    return %c0_i32, %c0_i32_0 : i32, i32
  }
  func.func @transform_6(%arg0: i32, %arg1: i32, %arg2: memref<7xi32, #tpu.memory_space<smem>>, %arg3: memref<7xi32, #tpu.memory_space<smem>>) -> (i32, i32) {
    %c0_i32 = arith.constant 0 : i32
    %c0_i32_0 = arith.constant 0 : i32
    %c0_i32_1 = arith.constant 0 : i32
    return %c0_i32, %c0_i32_0 : i32, i32
  }
  func.func @transform_7(%arg0: i32, %arg1: i32, %arg2: memref<7xi32, #tpu.memory_space<smem>>, %arg3: memref<7xi32, #tpu.memory_space<smem>>) -> (i32, i32) {
    %c0_i32 = arith.constant 0 : i32
    %c0_i32_0 = arith.constant 0 : i32
    %c0_i32_1 = arith.constant 0 : i32
    return %c0_i32, %c0_i32_0 : i32, i32
  }
  func.func @transform_8(%arg0: i32, %arg1: i32, %arg2: memref<7xi32, #tpu.memory_space<smem>>, %arg3: memref<7xi32, #tpu.memory_space<smem>>) -> (i32, i32) {
    %c0_i32 = arith.constant 0 : i32
    %c0_i32_0 = arith.constant 0 : i32
    %c0_i32_1 = arith.constant 0 : i32
    return %c0_i32, %c0_i32_0 : i32, i32
  }
  func.func @transform_9(%arg0: i32, %arg1: i32, %arg2: memref<7xi32, #tpu.memory_space<smem>>, %arg3: memref<7xi32, #tpu.memory_space<smem>>) -> (i32, i32) {
    %c0_i32 = arith.constant 0 : i32
    %c0_i32_0 = arith.constant 0 : i32
    %c0_i32_1 = arith.constant 0 : i32
    return %c0_i32, %c0_i32_0 : i32, i32
  }
  func.func @transform_10(%arg0: i32, %arg1: i32, %arg2: memref<7xi32, #tpu.memory_space<smem>>, %arg3: memref<7xi32, #tpu.memory_space<smem>>) -> (i32, i32) {
    %c0_i32 = arith.constant 0 : i32
    %c0_i32_0 = arith.constant 0 : i32
    %c0_i32_1 = arith.constant 0 : i32
    return %c0_i32, %c0_i32_0 : i32, i32
  }
  func.func @transform_11(%arg0: i32, %arg1: i32, %arg2: memref<7xi32, #tpu.memory_space<smem>>, %arg3: memref<7xi32, #tpu.memory_space<smem>>) -> (i32, i32) {
    %c0_i32 = arith.constant 0 : i32
    %c0_i32_0 = arith.constant 0 : i32
    %c0_i32_1 = arith.constant 0 : i32
    return %c0_i32, %c0_i32_0 : i32, i32
  }
  func.func @transform_12(%arg0: i32, %arg1: i32, %arg2: memref<7xi32, #tpu.memory_space<smem>>, %arg3: memref<7xi32, #tpu.memory_space<smem>>) -> (i32, i32) {
    %c0_i32 = arith.constant 0 : i32
    %c0_i32_0 = arith.constant 0 : i32
    %c0_i32_1 = arith.constant 0 : i32
    return %c0_i32, %c0_i32_0 : i32, i32
  }
  func.func @transform_13(%arg0: i32, %arg1: i32, %arg2: memref<7xi32, #tpu.memory_space<smem>>, %arg3: memref<7xi32, #tpu.memory_space<smem>>) -> (i32, i32) {
    %c0_i32 = arith.constant 0 : i32
    %c0_i32_0 = arith.constant 0 : i32
    %c0_i32_1 = arith.constant 0 : i32
    return %c0_i32, %c0_i32_0 : i32, i32
  }
  func.func @transform_14(%arg0: i32, %arg1: i32, %arg2: memref<7xi32, #tpu.memory_space<smem>>, %arg3: memref<7xi32, #tpu.memory_space<smem>>) -> (i32, i32, i32) {
    %c0_i32 = arith.constant 0 : i32
    %c0_i32_0 = arith.constant 0 : i32
    return %arg1, %arg0, %c0_i32 : i32, i32, i32
  }
}

module attributes {stable_mosaic.version = 11 : i64} {
  func.func @_decoder_kernel(%arg0: i32, %arg1: i32, %arg2: memref<7xi32, #tpu.memory_space<smem>>, %arg3: memref<7xi32, #tpu.memory_space<smem>>, %arg4: memref<1x32x128xf32, #tpu.memory_space<vmem>>, %arg5: memref<32x128xf32, #tpu.memory_space<vmem>>, %arg6: memref<32x8x128xf32, #tpu.memory_space<vmem>>, %arg7: memref<32x8xf32, #tpu.memory_space<vmem>>, %arg8: memref<384x128xbf16, #tpu.memory_space<vmem>>, %arg9: memref<1x128xf32, #tpu.memory_space<vmem>>, %arg10: memref<1x128xf32, #tpu.memory_space<vmem>>, %arg11: memref<1x1xf32, #tpu.memory_space<vmem>>, %arg12: memref<256x384xbf16, #tpu.memory_space<vmem>>, %arg13: memref<128x384xbf16, #tpu.memory_space<vmem>>, %arg14: memref<1x384xf32, #tpu.memory_space<vmem>>, %arg15: memref<1x384xf32, #tpu.memory_space<vmem>>, %arg16: memref<128x384xbf16, #tpu.memory_space<vmem>>, %arg17: memref<1x384xf32, #tpu.memory_space<vmem>>, %arg18: memref<1x32x384xf32, #tpu.memory_space<vmem>>, %arg19: memref<32x128xf32, #tpu.memory_space<vmem>>, %arg20: memref<32x128xf32, #tpu.memory_space<vmem>>) attributes {dimension_semantics = [#tpu.dimension_semantics<parallel>, #tpu.dimension_semantics<arbitrary>], iteration_bounds = array<i64: 2, 7>, scalar_prefetch = 2 : i64, scratch_operands = 2 : i64, tpu.core_type = #tpu.core_type<tc>, window_params = [{transform_indices = @transform_0, window_bounds = array<i64: 1, 32, 128>}, {transform_indices = @transform_1, window_bounds = array<i64: 32, 128>}, {transform_indices = @transform_2, window_bounds = array<i64: 32, 8, 128>}, {transform_indices = @transform_3, window_bounds = array<i64: 32, 8>}, {pipeline_mode = #tpu.pipeline_mode<synchronous>, transform_indices = @transform_4, window_bounds = array<i64: 384, 128>}, {pipeline_mode = #tpu.pipeline_mode<synchronous>, transform_indices = @transform_5, window_bounds = array<i64: 1, 128>}, {pipeline_mode = #tpu.pipeline_mode<synchronous>, transform_indices = @transform_6, window_bounds = array<i64: 1, 128>}, {pipeline_mode = #tpu.pipeline_mode<synchronous>, transform_indices = @transform_7, window_bounds = array<i64: 1, 1>}, {pipeline_mode = #tpu.pipeline_mode<synchronous>, transform_indices = @transform_8, window_bounds = array<i64: 256, 384>}, {pipeline_mode = #tpu.pipeline_mode<synchronous>, transform_indices = @transform_9, window_bounds = array<i64: 128, 384>}, {pipeline_mode = #tpu.pipeline_mode<synchronous>, transform_indices = @transform_10, window_bounds = array<i64: 1, 384>}, {pipeline_mode = #tpu.pipeline_mode<synchronous>, transform_indices = @transform_11, window_bounds = array<i64: 1, 384>}, {pipeline_mode = #tpu.pipeline_mode<synchronous>, transform_indices = @transform_12, window_bounds = array<i64: 128, 384>}, {pipeline_mode = #tpu.pipeline_mode<synchronous>, transform_indices = @transform_13, window_bounds = array<i64: 1, 384>}, {transform_indices = @transform_14, window_bounds = array<i64: 1, 32, 384>}]} {
    %c0_i32 = arith.constant 0 : i32
    %0 = arith.cmpi eq, %arg1, %c0_i32 : i32
    %1 = arith.extui %0 : i1 to i32
    %c0_i32_0 = arith.constant 0 : i32
    %2 = arith.cmpi ne, %1, %c0_i32_0 : i32
    scf.if %2 {
      %c0_46 = arith.constant 0 : index
      %c0_47 = arith.constant 0 : index
      %95 = vector.load %arg5[%c0_46, %c0_47] : memref<32x128xf32, #tpu.memory_space<vmem>>, vector<32x128xf32>
      %c0_48 = arith.constant 0 : index
      %c0_49 = arith.constant 0 : index
      %96 = vector.load %arg19[%c0_48, %c0_49] : memref<32x128xf32, #tpu.memory_space<vmem>>, vector<32x128xf32>
      tpu.vector_store %arg19[%c0_48, %c0_49], %95 {strides = array<i32>} : memref<32x128xf32, #tpu.memory_space<vmem>>, vector<32x128xf32>,
      %c0_50 = arith.constant 0 : index
      %c0_51 = arith.constant 0 : index
      %97 = vector.load %arg9[%c0_50, %c0_51] : memref<1x128xf32, #tpu.memory_space<vmem>>, vector<1x128xf32>
      %98 = vector.shape_cast %97 : vector<1x128xf32> to vector<1x128xf32>
      %99 = vector.broadcast %98 : vector<1x128xf32> to vector<32x128xf32>
      %c0_52 = arith.constant 0 : index
      %c0_53 = arith.constant 0 : index
      %100 = vector.load %arg20[%c0_52, %c0_53] : memref<32x128xf32, #tpu.memory_space<vmem>>, vector<32x128xf32>
      tpu.vector_store %arg20[%c0_52, %c0_53], %99 {strides = array<i32>} : memref<32x128xf32, #tpu.memory_space<vmem>>, vector<32x128xf32>,
    } else {
    }
    %c0 = arith.constant 0 : index
    %c0_1 = arith.constant 0 : index
    %3 = vector.load %arg19[%c0, %c0_1] : memref<32x128xf32, #tpu.memory_space<vmem>>, vector<32x128xf32>
    %4 = arith.index_cast %arg1 : i32 to index
    %5 = memref.load %arg2[%4] : memref<7xi32, #tpu.memory_space<smem>>
    %c0_i32_2 = arith.constant 0 : i32
    %6 = arith.cmpi ne, %5, %c0_i32_2 : i32
    %c0_3 = arith.constant 0 : index
    %c0_4 = arith.constant 0 : index
    %c0_5 = arith.constant 0 : index
    %7 = vector.load %arg4[%c0_3, %c0_4, %c0_5] : memref<1x32x128xf32, #tpu.memory_space<vmem>>, vector<1x32x128xf32>
    %8 = vector.shape_cast %7 : vector<1x32x128xf32> to vector<32x128xf32>
    %c0_6 = arith.constant 0 : index
    %c0_7 = arith.constant 0 : index
    %9 = vector.load %arg20[%c0_6, %c0_7] : memref<32x128xf32, #tpu.memory_space<vmem>>, vector<32x128xf32>
    %10 = arith.select %6, %8, %9 : vector<32x128xf32>
    %c0_8 = arith.constant 0 : index
    %c0_9 = arith.constant 0 : index
    %11 = vector.load %arg10[%c0_8, %c0_9] : memref<1x128xf32, #tpu.memory_space<vmem>>, vector<1x128xf32>
    %12 = vector.broadcast %11 : vector<1x128xf32> to vector<32x128xf32>
    %13 = arith.mulf %3, %12 : vector<32x128xf32>
    %cst = arith.constant dense<0.000000e+00> : vector<32xf32>
    %14 = vector.multi_reduction <add>, %13, %cst [1] : vector<32x128xf32> to vector<32xf32>
    %15 = vector.shape_cast %14 : vector<32xf32> to vector<32x1xf32>
    %c0_10 = arith.constant 0 : index
    %c0_11 = arith.constant 0 : index
    %16 = vector.load %arg7[%c0_10, %c0_11] : memref<32x8xf32, #tpu.memory_space<vmem>>, vector<32x8xf32>
    %17 = vector.broadcast %15 : vector<32x1xf32> to vector<32x8xf32>
    %18 = arith.addf %16, %17 : vector<32x8xf32>
    %c0_12 = arith.constant 0 : index
    %c0_13 = arith.constant 0 : index
    %19 = vector.load %arg11[%c0_12, %c0_13] : memref<1x1xf32, #tpu.memory_space<vmem>>, vector<1x1xf32>
    %20 = vector.broadcast %19 : vector<1x1xf32> to vector<32x8xf32>
    %21 = arith.addf %18, %20 : vector<32x8xf32>
    %cst_14 = arith.constant dense<0xFF800000> : vector<32xf32>
    %22 = vector.multi_reduction <maximumf>, %21, %cst_14 [1] : vector<32x8xf32> to vector<32xf32>
    %23 = vector.shape_cast %22 : vector<32xf32> to vector<32x1xf32>
    %24 = vector.broadcast %23 : vector<32x1xf32> to vector<32x8xf32>
    %25 = arith.subf %21, %24 : vector<32x8xf32>
    %26 = math.exp %25 : vector<32x8xf32>
    %cst_15 = arith.constant dense<0.000000e+00> : vector<32xf32>
    %27 = vector.multi_reduction <add>, %26, %cst_15 [1] : vector<32x8xf32> to vector<32xf32>
    %28 = vector.shape_cast %27 : vector<32xf32> to vector<32x1xf32>
    %29 = vector.broadcast %28 : vector<32x1xf32> to vector<32x8xf32>
    %30 = arith.divf %26, %29 : vector<32x8xf32>
    %31 = vector.shape_cast %30 : vector<32x8xf32> to vector<32x8x1xf32>
    %c0_16 = arith.constant 0 : index
    %c0_17 = arith.constant 0 : index
    %c0_18 = arith.constant 0 : index
    %32 = vector.load %arg6[%c0_16, %c0_17, %c0_18] : memref<32x8x128xf32, #tpu.memory_space<vmem>>, vector<32x8x128xf32>
    %33 = vector.broadcast %31 : vector<32x8x1xf32> to vector<32x8x128xf32>
    %34 = arith.mulf %33, %32 : vector<32x8x128xf32>
    %cst_19 = arith.constant dense<0.000000e+00> : vector<32x128xf32>
    %35 = vector.multi_reduction <add>, %34, %cst_19 [1] : vector<32x8x128xf32> to vector<32x128xf32>
    %36 = tpu.concatenate %10, %35 in 1 : vector<32x128xf32>, vector<32x128xf32> -> vector<32x256xf32>
    %37 = arith.truncf %36 : vector<32x256xf32> to vector<32x256xbf16>
    %c0_20 = arith.constant 0 : index
    %c0_21 = arith.constant 0 : index
    %38 = vector.load %arg12[%c0_20, %c0_21] : memref<256x384xbf16, #tpu.memory_space<vmem>>, vector<256x384xbf16>
    %cst_22 = arith.constant dense<0.000000e+00> : vector<32x384xf32>
    %39 = tpu.matmul %37, %38, %cst_22 {dimension_numbers = #tpu.dot_dimension_numbers<[1], [0], [0], [1], [0, 0, 1, 1], [], []>} : vector<32x256xbf16>, vector<256x384xbf16>, vector<32x384xf32> -> vector<32x384xf32>
    %c0_23 = arith.constant 0 : index
    %c0_24 = arith.constant 0 : index
    %40 = vector.load %arg14[%c0_23, %c0_24] : memref<1x384xf32, #tpu.memory_space<vmem>>, vector<1x384xf32>
    %41 = vector.broadcast %40 : vector<1x384xf32> to vector<32x384xf32>
    %42 = arith.addf %39, %41 : vector<32x384xf32>
    %43 = arith.truncf %3 : vector<32x128xf32> to vector<32x128xbf16>
    %c0_25 = arith.constant 0 : index
    %c0_26 = arith.constant 0 : index
    %44 = vector.load %arg13[%c0_25, %c0_26] : memref<128x384xbf16, #tpu.memory_space<vmem>>, vector<128x384xbf16>
    %cst_27 = arith.constant dense<0.000000e+00> : vector<32x384xf32>
    %45 = tpu.matmul %43, %44, %cst_27 {dimension_numbers = #tpu.dot_dimension_numbers<[1], [0], [0], [1], [0, 0, 1, 1], [], []>} : vector<32x128xbf16>, vector<128x384xbf16>, vector<32x384xf32> -> vector<32x384xf32>
    %c0_28 = arith.constant 0 : index
    %c0_29 = arith.constant 0 : index
    %46 = vector.load %arg15[%c0_28, %c0_29] : memref<1x384xf32, #tpu.memory_space<vmem>>, vector<1x384xf32>
    %47 = vector.broadcast %46 : vector<1x384xf32> to vector<32x384xf32>
    %48 = arith.addf %45, %47 : vector<32x384xf32>
    %49 = vector.extract_strided_slice %42 {offsets = [0, 0], sizes = [32, 128], strides = [1, 1]} : vector<32x384xf32> to vector<32x128xf32>
    %50 = vector.extract_strided_slice %48 {offsets = [0, 0], sizes = [32, 128], strides = [1, 1]} : vector<32x384xf32> to vector<32x128xf32>
    %51 = arith.addf %49, %50 : vector<32x128xf32>
    %52 = arith.negf %51 : vector<32x128xf32>
    %53 = math.exp %52 : vector<32x128xf32>
    %cst_30 = arith.constant 1.000000e+00 : f32
    %54 = vector.broadcast %cst_30 : f32 to vector<32x128xf32>
    %55 = arith.addf %54, %53 : vector<32x128xf32>
    %56 = arith.divf %54, %55 : vector<32x128xf32>
    %57 = vector.extract_strided_slice %42 {offsets = [0, 128], sizes = [32, 128], strides = [1, 1]} : vector<32x384xf32> to vector<32x128xf32>
    %58 = vector.extract_strided_slice %48 {offsets = [0, 128], sizes = [32, 128], strides = [1, 1]} : vector<32x384xf32> to vector<32x128xf32>
    %59 = arith.addf %57, %58 : vector<32x128xf32>
    %60 = arith.negf %59 : vector<32x128xf32>
    %61 = math.exp %60 : vector<32x128xf32>
    %cst_31 = arith.constant 1.000000e+00 : f32
    %62 = vector.broadcast %cst_31 : f32 to vector<32x128xf32>
    %63 = arith.addf %62, %61 : vector<32x128xf32>
    %64 = arith.divf %62, %63 : vector<32x128xf32>
    %65 = vector.extract_strided_slice %42 {offsets = [0, 256], sizes = [32, 128], strides = [1, 1]} : vector<32x384xf32> to vector<32x128xf32>
    %66 = vector.extract_strided_slice %48 {offsets = [0, 256], sizes = [32, 128], strides = [1, 1]} : vector<32x384xf32> to vector<32x128xf32>
    %67 = arith.mulf %56, %66 : vector<32x128xf32>
    %68 = arith.addf %65, %67 : vector<32x128xf32>
    %69 = math.tanh %68 : vector<32x128xf32>
    %cst_32 = arith.constant 1.000000e+00 : f32
    %70 = vector.broadcast %cst_32 : f32 to vector<32x128xf32>
    %71 = arith.subf %70, %64 : vector<32x128xf32>
    %72 = arith.mulf %71, %69 : vector<32x128xf32>
    %73 = arith.mulf %64, %3 : vector<32x128xf32>
    %74 = arith.addf %72, %73 : vector<32x128xf32>
    %75 = arith.truncf %74 : vector<32x128xf32> to vector<32x128xbf16>
    %c0_33 = arith.constant 0 : index
    %c0_34 = arith.constant 0 : index
    %76 = vector.load %arg16[%c0_33, %c0_34] : memref<128x384xbf16, #tpu.memory_space<vmem>>, vector<128x384xbf16>
    %cst_35 = arith.constant dense<0.000000e+00> : vector<32x384xf32>
    %77 = tpu.matmul %75, %76, %cst_35 {dimension_numbers = #tpu.dot_dimension_numbers<[1], [0], [0], [1], [0, 0, 1, 1], [], []>} : vector<32x128xbf16>, vector<128x384xbf16>, vector<32x384xf32> -> vector<32x384xf32>
    %c0_36 = arith.constant 0 : index
    %c0_37 = arith.constant 0 : index
    %78 = vector.load %arg17[%c0_36, %c0_37] : memref<1x384xf32, #tpu.memory_space<vmem>>, vector<1x384xf32>
    %79 = vector.broadcast %78 : vector<1x384xf32> to vector<32x384xf32>
    %80 = arith.addf %77, %79 : vector<32x384xf32>
    %c0_38 = arith.constant 0 : index
    %c0_39 = arith.constant 0 : index
    %c0_40 = arith.constant 0 : index
    %81 = vector.load %arg18[%c0_38, %c0_39, %c0_40] : memref<1x32x384xf32, #tpu.memory_space<vmem>>, vector<1x32x384xf32>
    %82 = vector.shape_cast %81 : vector<1x32x384xf32> to vector<32x384xf32>
    %83 = vector.shape_cast %80 : vector<32x384xf32> to vector<1x32x384xf32>
    tpu.vector_store %arg18[%c0_38, %c0_39, %c0_40], %83 {strides = array<i32>} : memref<1x32x384xf32, #tpu.memory_space<vmem>>, vector<1x32x384xf32>,
    %c0_41 = arith.constant 0 : index
    %c0_42 = arith.constant 0 : index
    %84 = vector.load %arg19[%c0_41, %c0_42] : memref<32x128xf32, #tpu.memory_space<vmem>>, vector<32x128xf32>
    tpu.vector_store %arg19[%c0_41, %c0_42], %74 {strides = array<i32>} : memref<32x128xf32, #tpu.memory_space<vmem>>, vector<32x128xf32>,
    %c1_i32 = arith.constant 1 : i32
    %85 = arith.addi %arg1, %c1_i32 : i32
    %c6_i32 = arith.constant 6 : i32
    %86 = arith.minsi %85, %c6_i32 : i32
    %c1_i32_43 = arith.constant 1 : i32
    %87 = arith.addi %arg1, %c1_i32_43 : i32
    %c7_i32 = arith.constant 7 : i32
    %88 = arith.cmpi slt, %87, %c7_i32 : i32
    %89 = arith.index_cast %86 : i32 to index
    %90 = memref.load %arg2[%89] : memref<7xi32, #tpu.memory_space<smem>>
    %c0_i32_44 = arith.constant 0 : i32
    %91 = arith.cmpi eq, %90, %c0_i32_44 : i32
    %92 = arith.andi %88, %91 : i1
    %93 = arith.extui %92 : i1 to i32
    %c0_i32_45 = arith.constant 0 : i32
    %94 = arith.cmpi ne, %93, %c0_i32_45 : i32
    scf.if %94 {
      %95 = tpu.iota {dimensions = array<i32: 1>} : vector<32x384xi32>
      %cst_46 = arith.constant dense<0xFF800000> : vector<32xf32>
      %96 = vector.multi_reduction <maximumf>, %80, %cst_46 [1] : vector<32x384xf32> to vector<32xf32>
      %97 = vector.shape_cast %96 : vector<32xf32> to vector<32x1xf32>
      %98 = vector.broadcast %97 : vector<32x1xf32> to vector<32x384xf32>
      %99 = arith.cmpf oeq, %80, %98 : vector<32x384xf32>
      %c384_i32 = arith.constant 384 : i32
      %100 = vector.broadcast %c384_i32 : i32 to vector<32x384xi32>
      %101 = arith.select %99, %95, %100 : vector<32x384xi1>, vector<32x384xi32>
      %cst_47 = arith.constant dense<2147483647> : vector<32xi32>
      %102 = vector.multi_reduction <minsi>, %101, %cst_47 [1] : vector<32x384xi32> to vector<32xi32>
      %103 = vector.shape_cast %102 : vector<32xi32> to vector<32x1xi32>
      %104 = vector.broadcast %103 : vector<32x1xi32> to vector<32x384xi32>
      %105 = arith.cmpi eq, %95, %104 : vector<32x384xi32>
      %cst_48 = arith.constant 1.000000e+00 : f32
      %cst_49 = arith.constant 0.000000e+00 : f32
      %106 = vector.broadcast %cst_48 : f32 to vector<32x384xf32>
      %107 = vector.broadcast %cst_49 : f32 to vector<32x384xf32>
      %108 = arith.select %105, %106, %107 : vector<32x384xi1>, vector<32x384xf32>
      %109 = arith.truncf %108 : vector<32x384xf32> to vector<32x384xbf16>
      %c0_50 = arith.constant 0 : index
      %c0_51 = arith.constant 0 : index
      %110 = vector.load %arg8[%c0_50, %c0_51] : memref<384x128xbf16, #tpu.memory_space<vmem>>, vector<384x128xbf16>
      %cst_52 = arith.constant dense<0.000000e+00> : vector<32x128xf32>
      %111 = tpu.matmul %109, %110, %cst_52 {dimension_numbers = #tpu.dot_dimension_numbers<[1], [0], [0], [1], [0, 0, 1, 1], [], []>} : vector<32x384xbf16>, vector<384x128xbf16>, vector<32x128xf32> -> vector<32x128xf32>
      %c0_53 = arith.constant 0 : index
      %c0_54 = arith.constant 0 : index
      %112 = vector.load %arg20[%c0_53, %c0_54] : memref<32x128xf32, #tpu.memory_space<vmem>>, vector<32x128xf32>
      tpu.vector_store %arg20[%c0_53, %c0_54], %111 {strides = array<i32>} : memref<32x128xf32, #tpu.memory_space<vmem>>, vector<32x128xf32>,
    } else {
    }
    return
  }
  func.func @transform_0(%arg0: i32, %arg1: i32, %arg2: memref<7xi32, #tpu.memory_space<smem>>, %arg3: memref<7xi32, #tpu.memory_space<smem>>) -> (i32, i32, i32) {
    %0 = arith.index_cast %arg1 : i32 to index
    %1 = memref.load %arg3[%0] : memref<7xi32, #tpu.memory_space<smem>>
    %c0_i32 = arith.constant 0 : i32
    %c0_i32_0 = arith.constant 0 : i32
    return %1, %arg0, %c0_i32 : i32, i32, i32
  }
  func.func @transform_1(%arg0: i32, %arg1: i32, %arg2: memref<7xi32, #tpu.memory_space<smem>>, %arg3: memref<7xi32, #tpu.memory_space<smem>>) -> (i32, i32) {
    %c0_i32 = arith.constant 0 : i32
    %c0_i32_0 = arith.constant 0 : i32
    return %arg0, %c0_i32 : i32, i32
  }
  func.func @transform_2(%arg0: i32, %arg1: i32, %arg2: memref<7xi32, #tpu.memory_space<smem>>, %arg3: memref<7xi32, #tpu.memory_space<smem>>) -> (i32, i32, i32) {
    %c0_i32 = arith.constant 0 : i32
    %c0_i32_0 = arith.constant 0 : i32
    %c0_i32_1 = arith.constant 0 : i32
    return %arg0, %c0_i32, %c0_i32_0 : i32, i32, i32
  }
  func.func @transform_3(%arg0: i32, %arg1: i32, %arg2: memref<7xi32, #tpu.memory_space<smem>>, %arg3: memref<7xi32, #tpu.memory_space<smem>>) -> (i32, i32) {
    %c0_i32 = arith.constant 0 : i32
    %c0_i32_0 = arith.constant 0 : i32
    return %arg0, %c0_i32 : i32, i32
  }
  func.func @transform_4(%arg0: i32, %arg1: i32, %arg2: memref<7xi32, #tpu.memory_space<smem>>, %arg3: memref<7xi32, #tpu.memory_space<smem>>) -> (i32, i32) {
    %c0_i32 = arith.constant 0 : i32
    %c0_i32_0 = arith.constant 0 : i32
    %c0_i32_1 = arith.constant 0 : i32
    return %c0_i32, %c0_i32_0 : i32, i32
  }
  func.func @transform_5(%arg0: i32, %arg1: i32, %arg2: memref<7xi32, #tpu.memory_space<smem>>, %arg3: memref<7xi32, #tpu.memory_space<smem>>) -> (i32, i32) {
    %c0_i32 = arith.constant 0 : i32
    %c0_i32_0 = arith.constant 0 : i32
    %c0_i32_1 = arith.constant 0 : i32
    return %c0_i32, %c0_i32_0 : i32, i32
  }
  func.func @transform_6(%arg0: i32, %arg1: i32, %arg2: memref<7xi32, #tpu.memory_space<smem>>, %arg3: memref<7xi32, #tpu.memory_space<smem>>) -> (i32, i32) {
    %c0_i32 = arith.constant 0 : i32
    %c0_i32_0 = arith.constant 0 : i32
    %c0_i32_1 = arith.constant 0 : i32
    return %c0_i32, %c0_i32_0 : i32, i32
  }
  func.func @transform_7(%arg0: i32, %arg1: i32, %arg2: memref<7xi32, #tpu.memory_space<smem>>, %arg3: memref<7xi32, #tpu.memory_space<smem>>) -> (i32, i32) {
    %c0_i32 = arith.constant 0 : i32
    %c0_i32_0 = arith.constant 0 : i32
    %c0_i32_1 = arith.constant 0 : i32
    return %c0_i32, %c0_i32_0 : i32, i32
  }
  func.func @transform_8(%arg0: i32, %arg1: i32, %arg2: memref<7xi32, #tpu.memory_space<smem>>, %arg3: memref<7xi32, #tpu.memory_space<smem>>) -> (i32, i32) {
    %c0_i32 = arith.constant 0 : i32
    %c0_i32_0 = arith.constant 0 : i32
    %c0_i32_1 = arith.constant 0 : i32
    return %c0_i32, %c0_i32_0 : i32, i32
  }
  func.func @transform_9(%arg0: i32, %arg1: i32, %arg2: memref<7xi32, #tpu.memory_space<smem>>, %arg3: memref<7xi32, #tpu.memory_space<smem>>) -> (i32, i32) {
    %c0_i32 = arith.constant 0 : i32
    %c0_i32_0 = arith.constant 0 : i32
    %c0_i32_1 = arith.constant 0 : i32
    return %c0_i32, %c0_i32_0 : i32, i32
  }
  func.func @transform_10(%arg0: i32, %arg1: i32, %arg2: memref<7xi32, #tpu.memory_space<smem>>, %arg3: memref<7xi32, #tpu.memory_space<smem>>) -> (i32, i32) {
    %c0_i32 = arith.constant 0 : i32
    %c0_i32_0 = arith.constant 0 : i32
    %c0_i32_1 = arith.constant 0 : i32
    return %c0_i32, %c0_i32_0 : i32, i32
  }
  func.func @transform_11(%arg0: i32, %arg1: i32, %arg2: memref<7xi32, #tpu.memory_space<smem>>, %arg3: memref<7xi32, #tpu.memory_space<smem>>) -> (i32, i32) {
    %c0_i32 = arith.constant 0 : i32
    %c0_i32_0 = arith.constant 0 : i32
    %c0_i32_1 = arith.constant 0 : i32
    return %c0_i32, %c0_i32_0 : i32, i32
  }
  func.func @transform_12(%arg0: i32, %arg1: i32, %arg2: memref<7xi32, #tpu.memory_space<smem>>, %arg3: memref<7xi32, #tpu.memory_space<smem>>) -> (i32, i32) {
    %c0_i32 = arith.constant 0 : i32
    %c0_i32_0 = arith.constant 0 : i32
    %c0_i32_1 = arith.constant 0 : i32
    return %c0_i32, %c0_i32_0 : i32, i32
  }
  func.func @transform_13(%arg0: i32, %arg1: i32, %arg2: memref<7xi32, #tpu.memory_space<smem>>, %arg3: memref<7xi32, #tpu.memory_space<smem>>) -> (i32, i32) {
    %c0_i32 = arith.constant 0 : i32
    %c0_i32_0 = arith.constant 0 : i32
    %c0_i32_1 = arith.constant 0 : i32
    return %c0_i32, %c0_i32_0 : i32, i32
  }
  func.func @transform_14(%arg0: i32, %arg1: i32, %arg2: memref<7xi32, #tpu.memory_space<smem>>, %arg3: memref<7xi32, #tpu.memory_space<smem>>) -> (i32, i32, i32) {
    %c0_i32 = arith.constant 0 : i32
    %c0_i32_0 = arith.constant 0 : i32
    return %arg1, %arg0, %c0_i32 : i32, i32, i32
  }
}

</mosaic_0001>

<bundles_post_ra>
// kernel: tpu_custom_call.1
= control target key start
LH: loop header
LB: loop body
LE: loop exit
PB: predicated region body
PF: predicated region fallthrough
CT: control target
= control target key end

     0   :  { %s5202_s0 = inlined_call_operand.vmem [shape: s32[7], index: 0, kind: input, shape index: {}]   ;;  %s5203_s2 = inlined_call_operand.hbm [shape: f32[7,64,128], index: 2, kind: input, shape index: {}]   ;;  %s5204_s3 = inlined_call_operand.vmem [shape: f32[64,128], index: 3, kind: input, shape index: {}]   ;;  %s5205_s4 = inlined_call_operand.hbm [shape: f32[64,8,128], index: 4, kind: input, shape index: {}]   ;;  %s5206_s5 = inlined_call_operand.vmem [shape: f32[64,8], index: 5, kind: input, shape index: {}]   ;;  %s5207_s6 = inlined_call_operand.hbm [shape: bf16[384,128], index: 6, kind: input, shape index: {}]   ;;  %s5208_s7 = inlined_call_operand.vmem [shape: f32[1,128], index: 7, kind: input, shape index: {}]   ;;  %s5209_s8 = inlined_call_operand.vmem [shape: f32[1,128], index: 8, kind: input, shape index: {}]   ;;  %s5210_s10 = inlined_call_operand.hbm [shape: bf16[256,384], index: 10, kind: input, shape index: {}]   ;;  %s5211_s11 = inlined_call_operand.hbm [shape: bf16[128,384], index: 11, kind: input, shape index: {}]   ;;  %s5212_s12 = inlined_call_operand.vmem [shape: f32[1,384], index: 12, kind: input, shape index: {}]   ;;  %s5213_s13 = inlined_call_operand.vmem [shape: f32[1,384], index: 13, kind: input, shape index: {}]   ;;  %s5214_s14 = inlined_call_operand.hbm [shape: bf16[128,384], index: 14, kind: input, shape index: {}]   ;;  %s5215_s15 = inlined_call_operand.vmem [shape: f32[1,384], index: 15, kind: input, shape index: {}]   ;;  %s5216_s16 = inlined_call_operand.hbm [shape: f32[7,64,384], index: 16, kind: output, shape index: {}]   ;;  %s5217_s1 = inlined_call_operand.vmem [shape: s32[7], index: 1, kind: input, shape index: {}]   ;;  %s5218_s9 = inlined_call_operand.<no memory space> [shape: f32[1,1], index: 9, kind: input, shape index: {}]  }
   0x1   :  { %5238 = sst [smem:[#allocation38_spill]] %s5202_s0  ;;  %s25_s26 = sshll.u32 %s5217_s1, 4  ;;  %v29_v0 = vstv %s5218_s9  ;;  %s26_s26 = int_to_ptr.vmem [resolvable:$true] %s25_s26 }
   0x2   :  { %5239 = sst [smem:[#allocation39_spill]] %s5203_s2  ;;  %s5252_s23 = sld [smem:[#allocation38_spill]]  ;;  %30 = vst [vmem:[#allocation7] sm:$0x1] %v29_v0 }
   0x3   :  { %5240 = sst [smem:[#allocation40_spill]] %s5204_s3 }
   0x4   :  { %5241 = sst [smem:[#allocation41_spill]] %s5206_s5 }
   0x5   :  { %5242 = sst [smem:[#allocation42_spill]] %s5207_s6 }
   0x6   :  { %5243 = sst [smem:[#allocation43_spill]] %s5208_s7 }
   0x7   :  { %5244 = sst [smem:[#allocation44_spill]] %s5209_s8 }
   0x8   :  { %5245 = sst [smem:[#allocation45_spill]] %s5210_s10 }
   0x9   :  { %5246 = sst [smem:[#allocation46_spill]] %s5211_s11 }
   0xa   :  { %5247 = sst [smem:[#allocation47_spill]] %s5212_s12  ;;  %s21_s12 = sshll.u32 %s5252_s23, 4  ;;  %s22_s12 = int_to_ptr.vmem [resolvable:$true] %s21_s12 }
   0xb   :  { %5248 = sst [smem:[#allocation48_spill]] %s5213_s13  ;;  %s3847_s28 = scalar_lea.vmem %s22_s12, 16 }
   0xc   :  { %5249 = sst [smem:[#allocation49_spill]] %s5214_s14  ;;  %p3848_p0 = scmp.ne.s32.totalorder %s22_s12, %s3847_s28 }
   0xd   :  { %5250 = sst [smem:[#allocation50_spill]] %s5215_s15  ;;  %p3852_p1 = scmp.lt.s32.totalorder %s22_s12, %s22_s12 }
   0xe   :  { %5251 = sst [smem:[#allocation51_spill]] %s5216_s16  ;;  %p3853_p2 = scmp.lt.s32.totalorder %s3847_s28, %s3847_s28 }
  0x10   :  { %p3854_p3 = por %p3853_p2, %p3852_p1 }
  0x12   :  { %p3855_p4 = pnand %p3854_p3, %p3848_p0 }
  0x14   :  { %3858 = shalt.err (!%p3855_p4)  }
  0x15   :  { %s4209_s29 = smov [#allocation5]   ;;  %s3859_s30 = scalar_lea.vmem %s26_s26, 16 }
  0x16   :  { %24 = dma.vmem_to_smem %s22_s12, 16, %s4209_s29, [#allocation4] }
  0x17   :  { %p3860_p5 = scmp.ne.s32.totalorder %s26_s26, %s3859_s30  ;;  %p3864_p6 = scmp.lt.s32.totalorder %s26_s26, %s26_s26 }
  0x18   :  { %p3865_p7 = scmp.lt.s32.totalorder %s3859_s30, %s3859_s30 }
  0x1a   :  { %p3866_p8 = por %p3865_p7, %p3864_p6 }
  0x1c   :  { %p3867_p9 = pnand %p3866_p8, %p3860_p5 }
  0x1e   :  { %3870 = shalt.err (!%p3867_p9)  }
  0x1f   :  { %s4210_s1 = smov [#allocation6]  }
  0x20   :  { %28 = dma.vmem_to_smem %s26_s26, 16, %s4210_s1, [#allocation4] }
  0x21   :  { %4127 = dma.done.wait [#allocation4], 32 }
  0x22   :  { %4128 = vsyncadd [#allocation4], 4294967264 }
  0x23   :  { %32 = sfence }
  0x24   :  { %33 = vsyncpa [#allocation9], 0 }
  0x25   :  { %35 = vsyncpa [#allocation9 + $0x1], 0 }
  0x26   :  { %36 = vsyncpa [#allocation12], 0 }
  0x27   :  { %38 = vsyncpa [#allocation12 + $0x1], 0 }
  0x28   :  { %39 = vsyncpa [#allocation15], 0 }
  0x29   :  { %40 = vsyncpa [#allocation18], 0 }
  0x2a   :  { %41 = vsyncpa [#allocation10], 0 }
  0x2b   :  { %43 = vsyncpa [#allocation10 + $0x1], 0  ;;  %s4322_s9 = smov 0   ;;  %s4324_s12 = smov 0  }
  0x2c   :  { %s4326_s13 = smov 0   ;;  %s4328_s0 = smov 0  }
  0x2d   :  { %s4330_s17 = smov 0   ;;  %s4332_s18 = smov 0  }
  0x2e   :  { %s4334_s19 = smov 0   ;;  %s4336_s20 = smov 0  }
  0x2f   :  { %s4338_s21 = smov 0   ;;  %s4340_s22 = smov 0  }
  0x30   :  { %s4342_s23 = smov 0   ;;  %s4344_s24 = smov 0  }
  0x31   :  { %s4346_s25 = smov 0   ;;  %s4348_s26 = smov 0  }
  0x32 LB: > { %5253 = sst [smem:[#allocation29_spill]] %s4155_s9  ;;  %s4391_s27 = sadd.s32 4294967295, %s4207_s26   ;;  %s4207_s26 = sphi %s4348_s26, %s49_s26   ;;  %s4203_s25 = sphi %s4346_s25, %s5332_s25   ;;  %s4199_s24 = sphi %s4344_s24, %s5331_s24   ;;  %s4195_s23 = sphi %s4342_s23, %s5330_s23   ;;  %s4191_s22 = sphi %s4340_s22, %s5329_s22   ;;  %s4187_s21 = sphi %s4338_s21, %s5328_s21   ;;  %s4183_s20 = sphi %s4336_s20, %s5327_s20   ;;  %s4179_s19 = sphi %s4334_s19, %s5326_s19   ;;  %s4175_s18 = sphi %s4332_s18, %s5325_s18   ;;  %s4171_s17 = sphi %s4330_s17, %s5324_s17   ;;  %s4167_s0 = sphi %s4328_s0, %s5323_s0   ;;  %s4163_s13 = sphi %s4326_s13, %s5322_s13   ;;  %s4159_s12 = sphi %s4324_s12, %s5321_s12   ;;  %s4155_s9 = sphi %s4322_s9, %s5318_s9  }
  0x33   : > { %5254 = sst [smem:[#allocation30_spill]] %s4159_s12  ;;  %s3097_s28 = sadd.s32 4294967294, %s4207_s26  }
  0x34   : > { %5255 = sst [smem:[#allocation31_spill]] %s4191_s22  ;;  %p5225_p10 = scmp.eq.s32.totalorder %s4391_s27, 0 }
  0x35   : > { %5256 = sst [smem:[#allocation32_spill]] %s4195_s23  ;;  %p137_p11 = scmp.ne.s32.totalorder %s4171_s17, %s4167_s0 }
  0x36   : > { %p398_p12 = scmp.ne.s32.totalorder %s4163_s13, %s4159_s12  ;;  %p399_p0 = scmp.eq.s32.totalorder %s4391_s27, 13 }
  0x37   : > { %p4401_p13 = por %p137_p11, %p5225_p10  ;;  %p404_p1 = scmp.ne.s32.totalorder %s4159_s12, %s4155_s9 }
  0x38   : > { %p405_p2 = scmp.eq.s32.totalorder %s3097_s28, 13  ;;  %p4408_p3 = por %p399_p0, %p398_p12 }
  0x39   : > { %s5257_s30 = scalar_select %p4401_p13, 1, 0 }
  0x3a   : > { %s5259_s1 = scalar_select %p4408_p3, 1, 0 }
  0x3b   : > { %5258 = sst [smem:[#allocation33_spill]] %s5257_s30  ;;  %p3098_p4 = scmp.ge.s32.totalorder %s4207_s26, 1 }
  0x3c   : > { %5260 = sst [smem:[#allocation34_spill]] %s5259_s1  ;;  %p4413_p5 = por %p405_p2, %p404_p1 }
  0x3d   : > { %p412_p6 = scmp.lt.s32.totalorder %s4207_s26, 15  ;;  %s4211_s29 = smov [#allocation13]  }
  0x3e   : > { %s5261_s16 = scalar_select %p4413_p5, 1, 0 }
  0x3f   : > { %p4418_p7 = pnand %p3098_p4, %p412_p6  ;;  %s424_s15 = sshll.u32 %s4211_s29, 4  ;;  %s425_s15 = int_to_ptr.vmem [resolvable:$true] %s424_s15 }
  0x40   : > { %5262 = sst [smem:[#allocation35_spill]] %s5261_s16  ;;  %s4212_s9 = smov [#allocation14]  }
  0x41   : > { %s5263_s0 = scalar_select %p4418_p7, 1, 0 }
  0x42   : > { %p3469_p8 = pneg %p4418_p7  ;;  %s446_s1 = sshll.u32 %s4212_s9, 4  ;;  %s4430_s1 = int_to_ptr.vmem [resolvable:$true] %s446_s1 }
  0x43   : > { %5264 = sst [smem:[#allocation36_spill]] %s5263_s0  ;;  %s5266_s6 = sld [smem:[#allocation42_spill]] }
  0x44   : > { %p4426_p9 = pnand %p3469_p8, %p5225_p10 }
  0x46   : > { %p4440_p12 = pneg %p4426_p9 }
  0x49   : > { %s3871_s7 = scalar_lea.hbm %s5266_s6, 3072 }
  0x4a   : > { %p3872_p11 = scmp.ne.s32.totalorder %s5266_s6, %s3871_s7  ;;  %p3878_p2 = scmp.lt.u32.totalorder %s3871_s7, %s5266_s6 }
  0x4c   : > { %p3874_p0 = pnand %p4440_p12, %p3872_p11 }
  0x4e   : > { %p3875_p1 = pneg %p3874_p0 }
  0x50   : > { %p3880_p4 = pnand %p3878_p2, %p3875_p1 }
  0x52   : > { %3883 = shalt.err (!%p3880_p4)
}
  0x53   : > { %s3884_s8 = scalar_lea.vmem %s425_s15, 3072  ;;  %p3892_p5 = scmp.lt.s32.totalorder %s425_s15, %s425_s15 }
  0x54   : > { %p3885_p6 = scmp.ne.s32.totalorder %s425_s15, %s3884_s8  ;;  %p3893_p3 = scmp.lt.s32.totalorder %s3884_s8, %s3884_s8 }
  0x56   : > { %p3887_p8 = pnand %p3885_p6, %p4440_p12  ;;  %p3894_p13 = por %p3893_p3, %p3892_p5 }
  0x58   : > { %p3888_p10 = pneg %p3887_p8 }
  0x5a   : > { %p3895_p7 = pnand %p3894_p13, %p3888_p10 }
  0x5c   : > { %3898 = shalt.err (!%p3895_p7)
}
  0x5d   : > { %s4213_s5 = smov 64   ;;  %s4214_s16 = smov 4  }
  0x5e   : > { %3472 = dma.hbm_to_vmem [thread:$0]  (!%p4426_p9), %s5266_s6, 3072, %s425_s15, [#allocation12], %s4213_s5, %s4213_s5, %s4214_s16  }
  0x5f   : > { %s5268_s10 = sld [smem:[#allocation45_spill]] }
  0x65   : > { %s3899_s23 = scalar_lea.hbm %s5268_s10, 6144 }
  0x66   : > { %p3900_p11 = scmp.ne.s32.totalorder %s5268_s10, %s3899_s23  ;;  %p3906_p3 = scmp.lt.u32.totalorder %s3899_s23, %s5268_s10 }
  0x68   : > { %p3902_p10 = pnand %p3900_p11, %p4440_p12 }
  0x6a   : > { %p3903_p13 = pneg %p3902_p10 }
  0x6c   : > { %p3908_p5 = pnand %p3906_p3, %p3903_p13 }
  0x6e   : > { %3911 = shalt.err (!%p3908_p5)
}
  0x6f   : > { %s3912_s15 = scalar_lea.vmem %s4430_s1, 6144  ;;  %p3920_p2 = scmp.lt.s32.totalorder %s4430_s1, %s4430_s1 }
  0x70   : > { %p3913_p7 = scmp.ne.s32.totalorder %s4430_s1, %s3912_s15  ;;  %p3921_p4 = scmp.lt.s32.totalorder %s3912_s15, %s3912_s15 }
  0x72   : > { %p3915_p0 = pnand %p3913_p7, %p4440_p12  ;;  %p3922_p6 = por %p3921_p4, %p3920_p2 }
  0x74   : > { %p3916_p1 = pneg %p3915_p0 }
  0x76   : > { %p3923_p8 = pnand %p3922_p6, %p3916_p1 }
  0x78   : > { %3926 = shalt.err (!%p3923_p8)
}
  0x79   : > { %s4215_s12 = smov 192   ;;  %s4216_s23 = smov 12  }
  0x7a   : > { %3475 = dma.hbm_to_vmem [thread:$0]  (!%p4426_p9), %s5268_s10, 6144, %s4430_s1, [#allocation15], %s4215_s12, %s4215_s12, %s4216_s23  }
  0x7b   : > { %s4217_s5 = smov [#allocation16]   ;;  %s4218_s3 = smov [#allocation17]  }
  0x7c   : > { %s459_s16 = sshll.u32 %s4217_s5, 4  ;;  %s478_s7 = sshll.u32 %s4218_s3, 4  ;;  %s460_s16 = int_to_ptr.vmem [resolvable:$true] %s459_s16  ;;  %s4482_s7 = int_to_ptr.vmem [resolvable:$true] %s478_s7 }
  0x7d   : > { %s5269_s11 = sld [smem:[#allocation46_spill]] }
  0x83   : > { %s3927_s8 = scalar_lea.hbm %s5269_s11, 3072 }
  0x84   : > { %p3928_p11 = scmp.ne.s32.totalorder %s5269_s11, %s3927_s8  ;;  %p3934_p3 = scmp.lt.u32.totalorder %s3927_s8, %s5269_s11 }
  0x86   : > { %p3930_p10 = pnand %p3928_p11, %p4440_p12 }
  0x88   : > { %p3931_p13 = pneg %p3930_p10 }
  0x8a   : > { %p3936_p5 = pnand %p3934_p3, %p3931_p13 }
  0x8c   : > { %3939 = shalt.err (!%p3936_p5)
}
  0x8d   : > { %s3940_s0 = scalar_lea.vmem %s460_s16, 3072  ;;  %p3948_p2 = scmp.lt.s32.totalorder %s460_s16, %s460_s16 }
  0x8e   : > { %p3941_p7 = scmp.ne.s32.totalorder %s460_s16, %s3940_s0  ;;  %p3949_p4 = scmp.lt.s32.totalorder %s3940_s0, %s3940_s0 }
  0x90   : > { %p3943_p0 = pnand %p3941_p7, %p4440_p12  ;;  %p3950_p6 = por %p3949_p4, %p3948_p2 }
  0x92   : > { %p3944_p1 = pneg %p3943_p0 }
  0x94   : > { %p3951_p8 = pnand %p3950_p6, %p3944_p1 }
  0x96   : > { %3954 = shalt.err (!%p3951_p8)
}
  0x97   : > { %3478 = dma.hbm_to_vmem [thread:$0]  (!%p4426_p9), %s5269_s11, 3072, %s460_s16, [#allocation15], %s4215_s12, %s4215_s12, %s4216_s23  }
  0x98   : > { %s5270_s14 = sld [smem:[#allocation49_spill]] }
  0x9e   : > { %s3955_s9 = scalar_lea.hbm %s5270_s14, 3072 }
  0x9f   : > { %p3956_p11 = scmp.ne.s32.totalorder %s5270_s14, %s3955_s9  ;;  %p3962_p3 = scmp.lt.u32.totalorder %s3955_s9, %s5270_s14 }
  0xa1   : > { %p3958_p10 = pnand %p3956_p11, %p4440_p12 }
  0xa3   : > { %p3959_p13 = pneg %p3958_p10 }
  0xa5   : > { %p3964_p5 = pnand %p3962_p3, %p3959_p13 }
  0xa7   : > { %3967 = shalt.err (!%p3964_p5)
}
  0xa8   : > { %s3968_s16 = scalar_lea.vmem %s4482_s7, 3072  ;;  %p3976_p2 = scmp.lt.s32.totalorder %s4482_s7, %s4482_s7 }
  0xa9   : > { %p3969_p7 = scmp.ne.s32.totalorder %s4482_s7, %s3968_s16  ;;  %p3977_p4 = scmp.lt.s32.totalorder %s3968_s16, %s3968_s16 }
  0xab   : > { %p3971_p0 = pnand %p3969_p7, %p4440_p12  ;;  %p3978_p6 = por %p3977_p4, %p3976_p2 }
  0xad   : > { %p3972_p1 = pneg %p3971_p0 }
  0xaf   : > { %p3979_p8 = pnand %p3978_p6, %p3972_p1 }
  0xb1   : > { %3982 = shalt.err (!%p3979_p8)
}
  0xb2   : > { %3481 = dma.hbm_to_vmem [thread:$0]  (!%p4426_p9), %s5270_s14, 3072, %s4482_s7, [#allocation18], %s4215_s12, %s4215_s12, %s4216_s23  }
  0xb3   : > { %s58_s28 = sadd.s32 1, %s4199_s24  ;;  %s61_s29 = sadd.s32 1, %s4203_s25 }
  0xb4   : > { %p59_p12 = scmp.ge.s32.totalorder %s58_s28, 7  ;;  %s65_s5 = sld [smem:[#allocation6 + %s4199_s24]] }
  0xb5   : > { %s72_s3 = sadd.s32 1, %s4187_s21  ;;  %p79_p11 = scmp.ne.s32.totalorder %s4187_s21, %s4183_s20 }
  0xb6   : > { %s5334_s28 = smov (%p59_p12, %s58_s28), 0  ;;  %s5336_s29 = smov (!%p59_p12, %s61_s29), %s4203_s25 }
  0xb7   : > { %s66_s22 = sld [smem:[#allocation6 + %s5334_s28]]  ;;  %p80_p10 = scmp.eq.s32.totalorder %s4207_s26, 0 }
  0xb8   : > { %p63_p13 = scmp.ge.s32.totalorder %s5336_s29, 2  ;;  %p85_p9 = scmp.ne.s32.totalorder %s4183_s20, %s4179_s19 }
  0xb9   : > { %p4546_p3 = por %p80_p10, %p79_p11  ;;  %s383_s23 = ssub.s32 %s4199_s24, %s5334_s28 }
  0xba   : > { %s5338_s29 = smov (%p63_p13, %s5336_s29), 0  ;;  %p5273_p5 = scmp.eq.s32.totalorder %s4391_s27, 0 }
  0xbb   : > { %5272 = sst [smem:[#allocation37_spill]] %s5338_s29  ;;  %p5236_p0 = scmp.lt.s32.totalorder %s4207_s26, 14 }
  0xbc   : > { %p4556_p7 = por %p5273_p5, %p85_p9  ;;  %s68_s19 = ssub.s32 %s4203_s25, %s5338_s29 }
  0xbd   : > { %s5234_s9 = sand.u32 1, %s4187_s21   ;;  %s67_s8 = ssub.s32 %s65_s5, %s66_s22 }
  0xbe   : > { %s5274_s7 = scalar_select %p4556_p7, 1, 0 }
  0xbf   : > { %p122_p1 = scmp.eq.s32.totalorder %s68_s19, 0  ;;  %s69_s15 = sor.u32 %s68_s19, %s67_s8 }
  0xc0   : > { %s385_s30 = sor.u32 %s383_s23, %s68_s19  ;;  %p70_p2 = scmp.eq.s32.totalorder %s69_s15, 0 }
  0xc1   : > { %p386_p4 = scmp.eq.s32.totalorder %s385_s30, 0  ;;  %s3104_s1 = sshll.u32 %s5234_s9, 5 }
  0xc2   : > { %s4567_s16 = scalar_select %p70_p2, %s4187_s21, %s72_s3  }
  0xc3   : > { %s5275_s0 = sadd.s32 1, %s4163_s13  ;;  %s3105_s5 = sshll.u32 %s4203_s25, 2 }
  0xc4   : > { %s4572_s6 = scalar_select %p386_p4, %s4163_s13, %s5275_s0  }
  0xc5   : > { %s3453_s22 = scalar_select %p4546_p3, [#allocation6], [#allocation20] }
  0xc6   : > { %s3454_s23 = scalar_select %p4546_p3, %s4199_s24, 0 }
  0xc7   : > { %s5340_s22 = smov (!%p5236_p0, %s3453_s22), [#allocation21]  ;;  %s499_s8 = scalar_lea.vmem [#allocation8], %s3104_s1 }
  0xc8   : > { %s5342_s23 = smov (!%p5236_p0, %s3454_s23), 0  ;;  %s509_s15 = sshll.u32 %s499_s8, 4  ;;  %s4592_s15 = int_to_ptr.vmem [resolvable:$true] %s509_s15 }
  0xc9   : > { %p4588_p6 = pnand %p5236_p0, %p4546_p3  ;;  %s500_s30 = sld [smem:[%s5340_s22 + %s5342_s23]] }
  0xca   : > { %s124_s9 = sadd.s32 1, %s4175_s18  ;;  %p131_p8 = scmp.ne.s32.totalorder %s4175_s18, %s4171_s17 }
  0xcb   : > { %s4600_s10 = scalar_select %p122_p1, %s4175_s18, %s124_s9  }
  0xcc   : > { %p4604_p12 = por %p131_p8, %p80_p10  ;;  %s530_s14 = sand.u32 1, %s4175_s18  }
  0xcd   : > { %s5278_s2 = sld [smem:[#allocation39_spill]]  ;;  %s4614_s19 = sshll.u32 %s530_s14, 8 }
  0xce   : > { %s5279_s9 = sand.u32 1, %s4187_s21   ;;  %p3985_p10 = pneg %p4588_p6 }
  0xcf   : > { %s3106_s1 = sshll.u32 %s500_s30, 3  ;;  %s4618_s30 = scalar_lea.sflag [#allocation9], %s5279_s9 }
  0xd0   : > { %s506_s8 = sadd.s32 %s3106_s1, %s3105_s5 }
  0xd1   : > { %s3107_s11 = sshll.u32 %s506_s8, 7 }
  0xd3   : > { %s4612_s29 = scalar_lea.hbm %s5278_s2, %s3107_s11  ;;  %s3988_s1 = scalar_lea.hbm %s5278_s2, 7168 }
  0xd4   : > { %s3983_s0 = scalar_lea.hbm %s4612_s29, 512  ;;  %p3989_p3 = scmp.lt.u32.totalorder %s4612_s29, %s5278_s2 }
  0xd5   : > { %p3984_p11 = scmp.ne.s32.totalorder %s4612_s29, %s3983_s0  ;;  %p3990_p5 = scmp.lt.u32.totalorder %s3988_s1, %s3983_s0 }
  0xd6   : > { %p3992_p2 = scmp.lt.u32.totalorder %s3983_s0, %s4612_s29 }
  0xd7   : > { %p3986_p13 = pnand %p3985_p10, %p3984_p11  ;;  %p3991_p1 = por %p3990_p5, %p3989_p3 }
  0xd9   : > { %p3987_p9 = pneg %p3986_p13  ;;  %p3993_p4 = por %p3992_p2, %p3991_p1 }
  0xdb   : > { %p3994_p8 = pnand %p3993_p4, %p3987_p9 }
  0xdd   : > { %3997 = shalt.err (!%p3994_p8)
}
  0xde   : > { %s3998_s14 = scalar_lea.vmem %s4592_s15, 512  ;;  %s4219_s23 = smov [#allocation8]  }
  0xdf   : > { %p3999_p11 = scmp.ne.s32.totalorder %s4592_s15, %s3998_s14  ;;  %s4003_s9 = sshll.u32 %s4219_s23, 4  ;;  %s4004_s9 = int_to_ptr.vmem [resolvable:$false] %s4003_s9 }
  0xe0   : > { %s4005_s5 = scalar_lea.vmem %s4004_s9, 1024  ;;  %p4006_p7 = scmp.lt.s32.totalorder %s4592_s15, %s4004_s9 }
  0xe1   : > { %p4001_p13 = pnand %p3999_p11, %p3985_p10  ;;  %p4007_p3 = scmp.lt.s32.totalorder %s4005_s5, %s3998_s14 }
  0xe3   : > { %p4002_p0 = pneg %p4001_p13  ;;  %p4008_p5 = por %p4007_p3, %p4006_p7 }
  0xe5   : > { %p4009_p1 = pnand %p4008_p5, %p4002_p0 }
  0xe7   : > { %4012 = shalt.err (!%p4009_p1)
}
  0xe8   : > { %s4220_s0 = smov 128   ;;  %s4221_s11 = smov 8  }
  0xe9   : > { %3487 = dma.hbm_to_vmem [thread:$0]  (!%p4588_p6), %s4612_s29, 512, %s4592_s15, %s4618_s30, %s4220_s0, %s4220_s0, %s4221_s11  }
  0xea   : > { %s3271_s1 = sshll.u32 %s4203_s25, 12  ;;  %s532_s23 = scalar_lea.vmem [#allocation11], %s4614_s19 }
  0xeb   : > { %s4653_s14 = scalar_lea.hbm %s5205_s4, %s3271_s1  ;;  %s539_s9 = sshll.u32 %s532_s23, 4  ;;  %s4656_s9 = int_to_ptr.vmem [resolvable:$true] %s539_s9 }
  0xec   : > { %p5280_p7 = scmp.lt.s32.totalorder %s4207_s26, 14  ;;  %s5282_s29 = sand.u32 1, %s4207_s26  }
  0xed   : > { %s4668_s15 = scalar_lea.sflag [#allocation12], %s5282_s29  ;;  %s4013_s30 = scalar_lea.hbm %s4653_s14, 4096 }
  0xee   : > { %p4662_p0 = pnand %p5280_p7, %p4604_p12  ;;  %p4014_p6 = scmp.ne.s32.totalorder %s4653_s14, %s4013_s30 }
  0xef   : > { %s4018_s5 = scalar_lea.hbm %s5205_s4, 8192  ;;  %p4019_p12 = scmp.lt.u32.totalorder %s4653_s14, %s5205_s4 }
  0xf0   : > { %p4015_p10 = pneg %p4662_p0  ;;  %p4020_p4 = scmp.lt.u32.totalorder %s4018_s5, %s4013_s30 }
  0xf1   : > { %p4022_p11 = scmp.lt.u32.totalorder %s4013_s30, %s4653_s14 }
  0xf2   : > { %p4016_p9 = pnand %p4015_p10, %p4014_p6  ;;  %p4021_p8 = por %p4020_p4, %p4019_p12 }
  0xf4   : > { %p4017_p2 = pneg %p4016_p9  ;;  %p4023_p13 = por %p4022_p11, %p4021_p8 }
  0xf6   : > { %p4024_p3 = pnand %p4023_p13, %p4017_p2 }
  0xf8   : > { %4027 = shalt.err (!%p4024_p3)
}
  0xf9   : > { %s4028_s22 = scalar_lea.vmem %s4656_s9, 4096  ;;  %s4222_s23 = smov [#allocation11]  }
  0xfa   : > { %p4029_p5 = scmp.ne.s32.totalorder %s4656_s9, %s4028_s22  ;;  %s4033_s29 = sshll.u32 %s4222_s23, 4  ;;  %s4034_s29 = int_to_ptr.vmem [resolvable:$false] %s4033_s29 }
  0xfb   : > { %s4035_s19 = scalar_lea.vmem %s4034_s29, 8192  ;;  %p4036_p6 = scmp.lt.s32.totalorder %s4656_s9, %s4034_s29 }
  0xfc   : > { %p4031_p1 = pnand %p4029_p5, %p4015_p10  ;;  %p4037_p9 = scmp.lt.s32.totalorder %s4035_s19, %s4028_s22 }
  0xfe   : > { %p4032_p7 = pneg %p4031_p1  ;;  %p4038_p12 = por %p4037_p9, %p4036_p6 }
 0x100   : > { %p4039_p4 = pnand %p4038_p12, %p4032_p7 }
 0x102   : > { %4042 = shalt.err (!%p4039_p4)
}
 0x103   : > { %3490 = dma.hbm_to_vmem [thread:$0]  (!%p4662_p0), %s4653_s14, 4096, %s4656_s9, %s4668_s15, %s4220_s0, %s4220_s0, %s4221_s11  }
 0x104   : > { %s5283_s30 = sld [smem:[#allocation36_spill]] }
 0x10a   : > { %p5284_p10 = scmp.ne.s32.totalorder %s5283_s30, 0 }
 0x10b   : > { %s562_s12 = sand.u32 (!%p5284_p10), 1, %s4183_s20   ;;  %p5285_p2 = scmp.ne.s32.totalorder (!%p5284_p10), %s5274_s7, 0 }
 0x10c   : > { %560 = sbr.rel (%p5284_p10) target bundleno = 2188 (0x88c), region = 76  ;;  %s3112_s5 = sshll.u32 (!%p5284_p10), %s562_s12, 5 }
 0x10d   : > { %s563_s1 = scalar_lea.sflag (!%p5284_p10), [#allocation9], %s562_s12  ;;  %s4702_s8 = scalar_lea.vmem (!%p5284_p10), [#allocation8], %s3112_s5 }
 0x113   : > { %4130 = dma.done.wait (%p5285_p2), %s563_s1, 512  }
 0x114   : > { %4132 = vsyncadd (%p5285_p2), %s563_s1, 4294966784  ;;  %s5286_s3 = sld [smem:[#allocation33_spill]]  ;;  %s571_s22 = sand.u32 1, %s4391_s27  }
 0x115   : > { %s573_s0 = sand.u32 1, %s4171_s17   ;;  %s572_s14 = scalar_lea.sflag [#allocation12], %s571_s22 }
 0x116   : > { %s3113_s11 = sshll.u32 %s573_s0, 8 }
 0x117   : > { %s4710_s9 = scalar_lea.vmem [#allocation11], %s3113_s11 }
 0x11a   : > { %p5287_p0 = scmp.ne.s32.totalorder %s5286_s3, 0 }
 0x11c   : > { %4134 = dma.done.wait (%p5287_p0), %s572_s14, 4096  }
 0x11d   : > { %4136 = vsyncadd (%p5287_p0), %s572_s14, 4294963200  ;;  %p5288_p8 = scmp.eq.s32.totalorder %s4391_s27, 0 }
 0x11f   : > { %4138 = dma.done.wait (%p5288_p8), [#allocation12], 3072   ;;  %p5289_p11 = pmov %p5288_p8 }
 0x120   : > { %p5290_p13 = pmov %p5288_p8 }
 0x121   : > { %4140 = vsyncadd (%p5289_p11), [#allocation12], 4294964224 }
 0x122   : > { %4142 = dma.done.wait (%p5290_p13), [#allocation15], 9216   ;;  %p5291_p3 = pmov %p5288_p8 }
 0x124   : > { %4144 = vsyncadd (%p5291_p3), [#allocation15], 4294958080  ;;  %p5292_p5 = pmov %p5291_p3 }
 0x125   : > { %p5293_p1 = pmov %p5291_p3 }
 0x126   : > { %4146 = dma.done.wait (%p5292_p5), [#allocation18], 3072  }
 0x127   : > { %4148 = vsyncadd (%p5293_p1), [#allocation18], 4294964224  ;;  %s5294_s7 = sld [smem:[#allocation30_spill]]  ;;  %s5295_s15 = sld [smem:[#allocation32_spill]] }
 0x128   : > { %s5296_s1 = sld [smem:[#allocation40_spill]]  ;;  %s5297_s11 = sld [smem:[#allocation41_spill]] }
 0x129   : > { %s5298_s2 = sld [smem:[#allocation31_spill]] }
 0x12d   : > { %s648_s23 = sand.u32 1, %s5294_s7   ;;  %s3118_s29 = sshll.u32 %s5295_s15, 2 }
 0x12e   : > { %s3442_s19 = smul.u32 96, %s648_s23  ;;  %p654_p7 = scmp.lt.s32.totalorder %s3118_s29, 7 }
 0x12f   : > { %p3122_p6 = scmp.ne.s32.totalorder %s5298_s2, 0 }
 0x130   : > { %s5344_s29 = smov (!%p654_p7, %s3118_s29), 7  ;;  %s4740_s27 = scalar_lea.vmem [#allocation19], %s3442_s19 }
 0x131   : > { %s3119_s30 = sshll.u32 %s5344_s29, 3  ;;  %671 = sbr.rel (%p3122_p6) target bundleno = 316 (0x13c), region = 104 }
 0x132   : > { %s657_s3 = scalar_lea.vmem %s5296_s1, %s3119_s30  ;;  %s4738_s14 = scalar_lea.vmem %s5297_s11, %s3119_s30 }
 0x133   : > { %v672_v1 = vld [vmem:[%s657_s3] sm:$0xff] (!%p3122_p6)  ;;  %v673_v2 = vld [vmem:[%s657_s3 + $0x8] sm:$0xff] (!%p3122_p6)  ;;  %v674_v3 = vld [vmem:[%s657_s3 + $0x10] sm:$0xff] (!%p3122_p6)  ;;  %s5299_s29 = sld [smem:[#allocation43_spill]] (!%p3122_p6) }
 0x134   : > { %676 = vst [vmem:[#allocation2] sm:$0xff] (!%p3122_p6), %v672_v1  ;;  %677 = vst [vmem:[#allocation2 + $0x8] sm:$0xff] (!%p3122_p6), %v673_v2  ;;  %v675_v4 = vld [vmem:[%s657_s3 + $0x18] sm:$0xff] (!%p3122_p6) }
 0x135   : > { %678 = vst [vmem:[#allocation2 + $0x10] sm:$0xff] (!%p3122_p6), %v674_v3  ;;  %679 = vst [vmem:[#allocation2 + $0x18] sm:$0xff] (!%p3122_p6), %v675_v4 }
 0x139   : > { %v3123_v5 = vld [vmem:[%s5299_s29] ss:$0 sm:$0xff] }
 0x13a   : > { %687 = vst [vmem:[#allocation3] sm:$0xff] %v3123_v5  ;;  %688 = vst [vmem:[#allocation3 + $0x8] sm:$0xff] %v3123_v5 }
 0x13b   : > { %689 = vst [vmem:[#allocation3 + $0x10] sm:$0xff] %v3123_v5  ;;  %690 = vst [vmem:[#allocation3 + $0x18] sm:$0xff] %v3123_v5 }
 0x13c PF: > { %v3125_v6 = vld [vmem:[#allocation7] ss:$0 sm:$0xff]  ;;  %s5300_s30 = sld [smem:[#allocation44_spill]]  ;;  %v4223_v9 = vmov 0   ;;  %v732_v21 = vld [vmem:[%s4738_s14 + $0x8] sm:$0xff]  ;;  %vm753_vm0 = vcmask 64512   ;;  %v798_v63 = vlaneseq }
 0x13d   : > { %3633 = vset.pattern.permute.xlu1 %v4223_v9  ;;  %3634 = vset.pattern.permute.xlu0 %v4223_v9  ;;  %v731_v17 = vld [vmem:[%s4738_s14] sm:$0xff]  ;;  %v734_v28 = vld [vmem:[%s4738_s14 + $0x18] sm:$0xff]  ;;  %v733_v30 = vld [vmem:[%s4738_s14 + $0x10] sm:$0xff]  ;;  %s5301_s12 = sld [smem:[#allocation31_spill]]  ;;  %vm1310_vm1 = vcmask 1041409   ;;  %vm1312_vm2 = vcmask 1042434  }
 0x13e   : > { %746 = vperm.xlu1 %3633, %v3125_v6   ;;  %v3635_v58 = vld [vmem:[#allocation14 + $0x4] ss:$12 sps:$4 sm:$0xff]   ;;  %v3637_v59 = vld [vmem:[#allocation14] ss:$12 sps:$4 sm:$0xff]   ;;  %v3638_v60 = vld [vmem:[#allocation14 + $0x1c] ss:$12 sps:$4 sm:$0xff]  }
 0x13f   : > { %v691_v7 = vld [vmem:[#allocation2] sm:$0xff]  ;;  %v692_v11 = vld [vmem:[#allocation2 + $0x8] sm:$0xff]  ;;  %1690 = vmatprep.subr.bf16.mxu0 %v3635_v58  ;;  %v4770_v3 = vshrl.u32 %v798_v63, 7  ;;  %vm1314_vm4 = vcmask 1043459   ;;  %vm1316_vm5 = vcmask 1044484   ;;  %vm1318_vm6 = vcmask 1045509  }
 0x140   : > { %v694_v12 = vld [vmem:[#allocation2 + $0x18] sm:$0xff]  ;;  %v693_v15 = vld [vmem:[#allocation2 + $0x10] sm:$0xff]  ;;  %1691 = vmatpush1.bf16.msra.mxu0 %v3637_v59  ;;  %vm1320_vm7 = vcmask 1046534   ;;  %vm1322_vm8 = vcmask 1047559   ;;  %s5304_s3 = sld [smem:[#allocation48_spill]]  ;;  %s5305_s11 = sld [smem:[#allocation47_spill]] }
 0x141   : > { %v3640_v61 = vld [vmem:[#allocation14 + $0x18] ss:$12 sps:$4 sm:$0xff]   ;;  %1692 = vmatprep.subr.bf16.mxu0 %v3638_v60  ;;  %v3641_v1 = vld [vmem:[#allocation14 + $0x34] ss:$12 sps:$4 sm:$0xff]   ;;  %v3643_v2 = vld [vmem:[#allocation14 + $0x30] ss:$12 sps:$4 sm:$0xff]  }
 0x142   : > { %v3124_v8 = vld [vmem:[%s5300_s30] ss:$0 sm:$0xff]  ;;  %v3644_v4 = vld [vmem:[#allocation14 + $0x4c] ss:$12 sps:$4 sm:$0xff]   ;;  %v3646_v5 = vld [vmem:[#allocation14 + $0x48] ss:$12 sps:$4 sm:$0xff]  }
 0x143   : > { %v719_v10 = vmul.f32 %v3124_v8, %v691_v7  ;;  %v720_v13 = vmul.f32 %v3124_v8, %v692_v11  ;;  %v722_v14 = vmul.f32 %v3124_v8, %v694_v12  ;;  %v721_v16 = vmul.f32 %v3124_v8, %v693_v15  ;;  %v3647_v11 = vld [vmem:[#allocation14 + $0x64] ss:$12 sps:$4 sm:$0xff]   ;;  %v3649_v12 = vld [vmem:[#allocation14 + $0x60] ss:$12 sps:$4 sm:$0xff]   ;;  %s4868_s5 = sld [smem:[#allocation5 + %s5301_s12]]  ;;  %s2454_s14 = sadd.s32 1, %s5301_s12 }
 0x144   : > { %1693 = vmatpush1.bf16.msra.mxu0 %v3640_v61  ;;  %v4773_v6 = vsub.s32 1, %v4770_v3  ;;  %v4776_v7 = vsub.s32 0, %v4770_v3  ;;  %v3673_v58 = vld [vmem:[#allocation14 + $0x120] ss:$12 sps:$4 sm:$0xff]   ;;  %p2455_p12 = scmp.lt.s32.totalorder %s2454_s14, 6  ;;  %p2457_p4 = scmp.lt.s32.totalorder %s2454_s14, 7 }
 0x145   : > { %723 = vadd.xlane.f32.xlu0 %v719_v10  ;;  %1694 = vmatprep.subr.bf16.mxu0 %v3641_v1  ;;  %v3676_v1 = vld [vmem:[#allocation14 + $0x138] ss:$12 sps:$4 sm:$0xff]   ;;  %s5307_s30 = sld [smem:[#allocation50_spill]] }
 0x146   : > { %s2456_s7 = scalar_select %p2455_p12, %s2454_s14, 6 }
 0x148   : > { %1695 = vmatpush1.bf16.msra.mxu0 %v3643_v2  ;;  %s2458_s15 = sld [smem:[#allocation5 + %s2456_s7]] }
 0x149   : > { %725 = vadd.xlane.f32.xlu0 %v720_v13  ;;  %1696 = vmatprep.subr.bf16.mxu0 %v3644_v4  ;;  %v3678_v4 = vld [vmem:[#allocation14 + $0x8] ss:$12 sps:$4 sm:$0xff]   ;;  %p696_p9 = scmp.ne.s32.totalorder %s4868_s5, 0 }
 0x14b   : > { %s4879_s1 = scalar_select %p696_p9, 1, 0 }
 0x14c   : > { %1697 = vmatpush1.bf16.msra.mxu0 %v3646_v5  ;;  %v3679_v5 = vld [vmem:[#allocation14 + $0x154] ss:$12 sps:$4 sm:$0xff]  }
 0x14d   : > { %729 = vadd.xlane.f32.xlu0 %v722_v14  ;;  %1698 = vmatprep.subr.bf16.mxu0 %v3647_v11  ;;  %v3683_v11 = vld [vmem:[#allocation14 + $0x20] ss:$12 sps:$4 sm:$0xff]  }
 0x14e   : > { %p2459_p10 = scmp.eq.s32.totalorder %s2458_s15, 0 }
 0x150   : > { %1699 = vmatpush1.bf16.msra.mxu0 %v3649_v12  ;;  %p5034_p2 = pnand %p2459_p10, %p2457_p4 }
 0x162   : > { %727 = vadd.xlane.f32.xlu1 %v721_v16 }
 0x1bd   : > { %v747_v20 = vpop.permute.xlu1 %746 }
 0x1d2   : > { %v724_v18 = vpop.xlane.xlu0 %723 }
 0x1d3   : > { %v735_v19 = vadd.f32 %v731_v17, %v724_v18  ;;  %v4785_v17 = vsub.s32 2, %v4770_v3  ;;  %v3650_v18 = vld [vmem:[#allocation14 + $0x7c] ss:$12 sps:$4 sm:$0xff]  }
 0x1d4   : > { %1700 = vmatprep.subr.bf16.mxu0 %v3650_v18  ;;  %v3688_v18 = vld [vmem:[#allocation14 + $0x38] ss:$12 sps:$4 sm:$0xff]  }
 0x1d5   : > { %v749_v22 = vadd.f32 %v747_v20, %v735_v19  ;;  %v3652_v19 = vld [vmem:[#allocation14 + $0x78] ss:$12 sps:$4 sm:$0xff]  }
 0x1d6   : > { %v726_v23 = vpop.xlane.xlu0 %725  ;;  %1701 = vmatpush1.bf16.msra.mxu0 %v3652_v19 }
 0x1d7   : > { %v736_v24 = vadd.f32 %v732_v21, %v726_v23  ;;  %v754_v25 = vsel %vm753_vm0, %v749_v22, -inf  ;;  %v3653_v23 = vld [vmem:[#allocation14 + $0x94] ss:$12 sps:$4 sm:$0xff]  }
 0x1d8   : > { %755 = vmax.xlane.f32.xlu0 %v754_v25  ;;  %1702 = vmatprep.subr.bf16.mxu0 %v3653_v23 }
 0x1d9   : > { %v750_v26 = vadd.f32 %v747_v20, %v736_v24  ;;  %v3655_v24 = vld [vmem:[#allocation14 + $0x90] ss:$12 sps:$4 sm:$0xff]  }
 0x1da   : > { %v730_v29 = vpop.xlane.xlu0 %729  ;;  %1703 = vmatpush1.bf16.msra.mxu0 %v3655_v24  ;;  %v3693_v24 = vld [vmem:[#allocation14 + $0x50] ss:$12 sps:$4 sm:$0xff]  }
 0x1db   : > { %v757_v27 = vsel %vm753_vm0, %v750_v26, -inf  ;;  %v738_v32 = vadd.f32 %v734_v28, %v730_v29  ;;  %v3656_v28 = vld [vmem:[#allocation14 + $0xac] ss:$12 sps:$4 sm:$0xff]   ;;  %v3658_v29 = vld [vmem:[#allocation14 + $0xa8] ss:$12 sps:$4 sm:$0xff]  }
 0x1dc   : > { %758 = vmax.xlane.f32.xlu0 %v757_v27  ;;  %v4795_v27 = vsub.s32 4, %v4770_v3  ;;  %1704 = vmatprep.subr.bf16.mxu0 %v3656_v28  ;;  %v3698_v28 = vld [vmem:[#allocation14 + $0x68] ss:$12 sps:$4 sm:$0xff]  }
 0x1dd   : > { %v752_v36 = vadd.f32 %v747_v20, %v738_v32  ;;  %v4801_v32 = vsub.s32 5, %v4770_v3 }
 0x1de   : > { %1705 = vmatpush1.bf16.msra.mxu0 %v3658_v29 }
 0x1df   : > { %v763_v37 = vsel %vm753_vm0, %v752_v36, -inf }
 0x1ef   : > { %v728_v31 = vpop.xlane.xlu1 %727 }
 0x1f0   : > { %v737_v33 = vadd.f32 %v733_v30, %v728_v31 }
 0x1f2   : > { %v751_v34 = vadd.f32 %v747_v20, %v737_v33 }
 0x1f4   : > { %v760_v35 = vsel %vm753_vm0, %v751_v34, -inf }
 0x1f5   : > { %761 = vmax.xlane.f32.xlu0 %v760_v35  ;;  %v3659_v35 = vld [vmem:[#allocation14 + $0xc4] ss:$12 sps:$4 sm:$0xff]  }
 0x1f6   : > { %1706 = vmatprep.subr.bf16.mxu0 %v3659_v35  ;;  %v3708_v35 = vld [vmem:[#allocation14 + $0x98] ss:$12 sps:$4 sm:$0xff]  }
 0x1f9   : > { %764 = vmax.xlane.f32.xlu0 %v763_v37  ;;  %v4807_v37 = vsub.s32 6, %v4770_v3 }
 0x265   : > { %v756_v38 = vpop.xlane.xlu0 %755 }
 0x266   : > { %v766_v39 = vsub.f32 %v749_v22, %v756_v38  ;;  %v4790_v22 = vsub.s32 3, %v4770_v3 }
 0x268   : > { %v770_v40 = vmul.f32 1.442695, %v766_v39 }
 0x269   : > { %v759_v41 = vpop.xlane.xlu0 %758 }
 0x26a   : > { %3763 = vpow2.f32 %v770_v40  ;;  %v767_v42 = vsub.f32 %v750_v26, %v759_v41  ;;  %v3662_v40 = vld [vmem:[#allocation14 + $0xdc] ss:$12 sps:$4 sm:$0xff]  }
 0x26c   : > { %v772_v43 = vmul.f32 1.442695, %v767_v42  ;;  %v3664_v42 = vld [vmem:[#allocation14 + $0xd8] ss:$12 sps:$4 sm:$0xff]  }
 0x26e   : > { %3765 = vpow2.f32 %v772_v43  ;;  %v4813_v43 = vsub.s32 7, %v4770_v3 }
 0x274   : > { %v3764_v44 = vpop.eup %3763 }
 0x275   : > { %v778_v45 = vsel %vm753_vm0, %v3764_v44, 0.0 }
 0x276   : > { %779 = vadd.xlane.f32.xlu0 %v778_v45 }
 0x278   : > { %v3766_v46 = vpop.eup %3765 }
 0x279   : > { %v781_v47 = vsel %vm753_vm0, %v3766_v46, 0.0 }
 0x27a   : > { %782 = vadd.xlane.f32.xlu0 %v781_v47 }
 0x282   : > { %v762_v48 = vpop.xlane.xlu0 %761 }
 0x283   : > { %v768_v49 = vsub.f32 %v751_v34, %v762_v48  ;;  %v3667_v48 = vld [vmem:[#allocation14 + $0xf0] ss:$12 sps:$4 sm:$0xff]  }
 0x285   : > { %v774_v50 = vmul.f32 1.442695, %v768_v49 }
 0x286   : > { %v765_v51 = vpop.xlane.xlu0 %764 }
 0x287   : > { %3767 = vpow2.f32 %v774_v50  ;;  %v769_v52 = vsub.f32 %v752_v36, %v765_v51  ;;  %v3661_v36 = vld [vmem:[#allocation14 + $0xc0] ss:$12 sps:$4 sm:$0xff]   ;;  %v3670_v51 = vld [vmem:[#allocation14 + $0x108] ss:$12 sps:$4 sm:$0xff]  }
 0x288   : > { %1707 = vmatpush1.bf16.msra.mxu0 %v3661_v36  ;;  %v3668_v50 = vld [vmem:[#allocation14 + $0x10c] ss:$12 sps:$4 sm:$0xff]  }
 0x289   : > { %v776_v53 = vmul.f32 1.442695, %v769_v52  ;;  %1708 = vmatprep.subr.bf16.mxu0 %v3662_v40  ;;  %v1022_v40 = vld [vmem:[%s4710_s9] sm:$0xff] }
 0x28b   : > { %3769 = vpow2.f32 %v776_v53 }
 0x28c   : > { %1709 = vmatpush1.bf16.msra.mxu0 %v3664_v42  ;;  %v1023_v42 = vld [vmem:[%s4710_s9 + $0x8] sm:$0xff] }
 0x291   : > { %v4761_v54 = vpop.eup %3767 }
 0x292   : > { %v784_v55 = vsel %vm753_vm0, %v4761_v54, 0.0 }
 0x293   : > { %785 = vadd.xlane.f32.xlu0 %v784_v55  ;;  %v3671_v55 = vld [vmem:[#allocation14 + $0x124] ss:$12 sps:$4 sm:$0xff]  }
 0x295   : > { %v4765_v56 = vpop.eup %3769 }
 0x296   : > { %v787_v57 = vsel %vm753_vm0, %v4765_v56, 0.0 }
 0x297   : > { %788 = vadd.xlane.f32.xlu0 %v787_v57 }
 0x303   : > { %v780_v62 = vpop.xlane.xlu0 %779 }
 0x304   : > { %3771 = vrcp.f32 %v780_v62  ;;  %v3674_v62 = vld [vmem:[#allocation14 + $0x13c] ss:$12 sps:$4 sm:$0xff]  }
 0x307   : > { %v783_v0 = vpop.xlane.xlu0 %782 }
 0x308   : > { %3773 = vrcp.f32 %v783_v0 }
 0x30e   : > { %v3772_v8 = vpop.eup %3771 }
 0x30f   : > { %v4778_v10 = vmul.f32 %v3772_v8, %v3764_v44  ;;  %v3681_v8 = vld [vmem:[#allocation14 + $0x150] ss:$12 sps:$4 sm:$0xff]  }
 0x311   : > { %v808_v13 = vrot.slane %v4778_v10, %v4773_v6  ;;  %v801_v14 = vrot.slane %v4778_v10, %v4776_v7  ;;  %v815_v31 = vrot.slane %v4778_v10, %v4785_v17  ;;  %v822_v34 = vrot.slane %v4778_v10, %v4790_v22 }
 0x312   : > { %v3774_v15 = vpop.eup %3773  ;;  %v829_v39 = vrot.slane %v4778_v10, %v4795_v27  ;;  %v836_v45 = vrot.slane %v4778_v10, %v4801_v32  ;;  %v843_v49 = vrot.slane %v4778_v10, %v4807_v37  ;;  %v850_v53 = vrot.slane %v4778_v10, %v4813_v43 }
 0x313   : > { %v793_v16 = vmul.f32 %v3774_v15, %v3766_v46  ;;  %810 = vbcast.lane.b32.xlu0 %v808_v13, 256  ;;  %803 = vbcast.lane.b32.xlu1 %v801_v14, 256  ;;  %v3665_v46 = vld [vmem:[#allocation14 + $0xf4] ss:$12 sps:$4 sm:$0xff]   ;;  %v3684_v13 = vld [vmem:[#allocation14 + $0x16c] ss:$12 sps:$4 sm:$0xff]  }
 0x314   : > { %1710 = vmatprep.subr.bf16.mxu0 %v3665_v46  ;;  %v3686_v14 = vld [vmem:[#allocation14 + $0x168] ss:$12 sps:$4 sm:$0xff]   ;;  %v3687_v15 = vld [vmem:[#allocation14 + $0xf8] ss:$12 sps:$4 sm:$0xff]  }
 0x315   : > { %v871_v20 = vrot.slane %v793_v16, %v4785_v17  ;;  %v857_v21 = vrot.slane %v793_v16, %v4776_v7  ;;  %v878_v25 = vrot.slane %v793_v16, %v4790_v22  ;;  %v864_v26 = vrot.slane %v793_v16, %v4773_v6  ;;  %1711 = vmatpush1.bf16.msra.mxu0 %v3667_v48  ;;  %v1032_v46 = vld [vmem:[%s4710_s9 + $0x50] sm:$0xff] }
 0x316   : > { %v885_v30 = vrot.slane %v793_v16, %v4795_v27  ;;  %v892_v33 = vrot.slane %v793_v16, %v4801_v32  ;;  %v899_v38 = vrot.slane %v793_v16, %v4807_v37  ;;  %v906_v44 = vrot.slane %v793_v16, %v4813_v43  ;;  %1712 = vmatprep.subr.bf16.mxu0 %v3668_v50 }
 0x317   : > { %873 = vbcast.lane.b32.xlu0 %v871_v20, 256  ;;  %859 = vbcast.lane.b32.xlu1 %v857_v21, 256  ;;  %v3691_v20 = vld [vmem:[#allocation16 + $0x4] ss:$12 sps:$4 sm:$0xff]  }
 0x318   : > { %v3692_v21 = vld [vmem:[#allocation14 + $0x110] ss:$12 sps:$4 sm:$0xff]  }
 0x319   : > { %1713 = vmatpush1.bf16.msra.mxu0 %v3670_v51 }
 0x31a   : > { %1714 = vmatprep.subr.bf16.mxu0 %v3671_v55 }
 0x31b   : > { %880 = vbcast.lane.b32.xlu0 %v878_v25, 256  ;;  %866 = vbcast.lane.b32.xlu1 %v864_v26, 256 }
 0x31d   : > { %1715 = vmatpush1.bf16.msra.mxu0 %v3673_v58  ;;  %v1031_v58 = vld [vmem:[%s4710_s9 + $0x48] sm:$0xff] }
 0x31e   : > { %1716 = vmatprep.subr.bf16.mxu0 %v3674_v62 }
 0x31f   : > { %887 = vbcast.lane.b32.xlu0 %v885_v30, 256  ;;  %817 = vbcast.lane.b32.xlu1 %v815_v31, 256  ;;  %v3702_v30 = vld [vmem:[#allocation14 + $0x140] ss:$12 sps:$4 sm:$0xff]  }
 0x320   : > { %v786_v41 = vpop.xlane.xlu0 %785  ;;  %v3703_v31 = vld [vmem:[#allocation14 + $0x80] ss:$12 sps:$4 sm:$0xff]  }
 0x321   : > { %3775 = vrcp.f32 %v786_v41  ;;  %1717 = vmatpush1.bf16.msra.mxu0 %v3676_v1 }
 0x322   : > { %1718 = vmatprep.subr.bf16.mxu0 %v3679_v5  ;;  %v1034_v5 = vld [vmem:[%s4710_s9 + $0x60] sm:$0xff] }
 0x323   : > { %894 = vbcast.lane.b32.xlu0 %v892_v33, 256  ;;  %824 = vbcast.lane.b32.xlu1 %v822_v34, 256  ;;  %v3707_v34 = vld [vmem:[#allocation14 + $0x158] ss:$12 sps:$4 sm:$0xff]  }
 0x324   : > { %v789_v47 = vpop.xlane.xlu0 %788 }
 0x325   : > { %3777 = vrcp.f32 %v789_v47  ;;  %1719 = vmatpush1.bf16.msra.mxu0 %v3681_v8 }
 0x326   : > { %1720 = vmatprep.subr.bf16.mxu0 %v3684_v13 }
 0x327   : > { %901 = vbcast.lane.b32.xlu0 %v899_v38, 256  ;;  %831 = vbcast.lane.b32.xlu1 %v829_v39, 256  ;;  %v3712_v38 = vld [vmem:[#allocation14 + $0x170] ss:$12 sps:$4 sm:$0xff]   ;;  %v4860_v39 = vld [vmem:[#allocation16 + $0x8] ss:$12 sps:$4 sm:$0xff]  }
 0x329   : > { %1721 = vmatpush1.bf16.msra.mxu0 %v3686_v14 }
 0x32a   : > { %1971 = vmatprep.subr.bf16.mxu0 %v3691_v20  ;;  %v1035_v20 = vld [vmem:[%s4710_s9 + $0x68] sm:$0xff] }
 0x32b   : > { %908 = vbcast.lane.b32.xlu0 %v906_v44, 256  ;;  %838 = vbcast.lane.b32.xlu1 %v836_v45, 256  ;;  %v3776_v52 = vpop.eup %3775  ;;  %v1030_v45 = vld [vmem:[%s4710_s9 + $0x40] sm:$0xff] }
 0x32c   : > { %v4823_v57 = vmul.f32 %v3776_v52, %v4761_v54  ;;  %v3677_v54 = vld [vmem:[#allocation14 + $0xc8] ss:$12 sps:$4 sm:$0xff]  }
 0x32d   : > { %3272 = vmatprep.subr.bf16.mxu1 %v3677_v54 }
 0x32e   : > { %v920_v59 = vrot.slane %v4823_v57, %v4773_v6  ;;  %v913_v60 = vrot.slane %v4823_v57, %v4776_v7  ;;  %3273 = vmatpush3.bf16.msra.mxu1 %v3678_v4  ;;  %v927_v12 = vrot.slane %v4823_v57, %v4785_v17  ;;  %v934_v19 = vrot.slane %v4823_v57, %v4790_v22  ;;  %v1024_v4 = vld [vmem:[%s4710_s9 + $0x10] sm:$0xff] }
 0x32f   : > { %845 = vbcast.lane.b32.xlu1 %v843_v49, 256  ;;  %v3778_v61 = vpop.eup %3777  ;;  %v941_v25 = vrot.slane %v4823_v57, %v4795_v27  ;;  %v948_v29 = vrot.slane %v4823_v57, %v4801_v32  ;;  %v955_v33 = vrot.slane %v4823_v57, %v4807_v37  ;;  %v962_v36 = vrot.slane %v4823_v57, %v4813_v43 }
 0x330   : > { %v4830_v0 = vmul.f32 %v3778_v61, %v4765_v56  ;;  %922 = vbcast.lane.b32.xlu0 %v920_v59, 256  ;;  %v3682_v56 = vld [vmem:[#allocation14 + $0xe0] ss:$12 sps:$4 sm:$0xff]   ;;  %v1033_v59 = vld [vmem:[%s4710_s9 + $0x58] sm:$0xff] }
 0x331   : > { %3274 = vmatprep.subr.bf16.mxu1 %v3682_v56 }
 0x332   : > { %v976_v2 = vrot.slane %v4830_v0, %v4773_v6  ;;  %v969_v3 = vrot.slane %v4830_v0, %v4776_v7  ;;  %v983_v10 = vrot.slane %v4830_v0, %v4785_v17  ;;  %3275 = vmatpush3.bf16.msra.mxu1 %v3683_v11  ;;  %v990_v16 = vrot.slane %v4830_v0, %v4790_v22  ;;  %v3697_v22 = vld [vmem:[#allocation14 + $0x128] ss:$12 sps:$4 sm:$0xff]  }
 0x333   : > { %852 = vbcast.lane.b32.xlu1 %v850_v53, 256  ;;  %3276 = vmatprep.subr.bf16.mxu1 %v3687_v15  ;;  %v997_v23 = vrot.slane %v4830_v0, %v4795_v27  ;;  %v1004_v26 = vrot.slane %v4830_v0, %v4801_v32  ;;  %v1011_v27 = vrot.slane %v4830_v0, %v4807_v37  ;;  %v3713_v37 = vld [vmem:[#allocation14 + $0xb0] ss:$12 sps:$4 sm:$0xff]  }
 0x334   : > { %978 = vbcast.lane.b32.xlu0 %v976_v2, 256  ;;  %v1018_v32 = vrot.slane %v4830_v0, %v4813_v43 }
 0x336   : > { %3277 = vmatpush3.bf16.msra.mxu1 %v3688_v18 }
 0x337   : > { %915 = vbcast.lane.b32.xlu1 %v913_v60, 256  ;;  %3278 = vmatprep.subr.bf16.mxu1 %v3692_v21 }
 0x338   : > { %985 = vbcast.lane.b32.xlu0 %v983_v10, 256 }
 0x33a   : > { %3279 = vmatpush3.bf16.msra.mxu1 %v3693_v24 }
 0x33b   : > { %971 = vbcast.lane.b32.xlu1 %v969_v3, 256  ;;  %3280 = vmatprep.subr.bf16.mxu1 %v3697_v22 }
 0x33c   : > { %992 = vbcast.lane.b32.xlu0 %v990_v16, 256 }
 0x33e   : > { %3281 = vmatpush3.bf16.msra.mxu1 %v3698_v28 }
 0x33f   : > { %929 = vbcast.lane.b32.xlu1 %v927_v12, 256  ;;  %3282 = vmatprep.subr.bf16.mxu1 %v3702_v30 }
 0x340   : > { %999 = vbcast.lane.b32.xlu0 %v997_v23, 256 }
 0x342   : > { %3283 = vmatpush3.bf16.msra.mxu1 %v3703_v31 }
 0x343   : > { %936 = vbcast.lane.b32.xlu1 %v934_v19, 256  ;;  %3284 = vmatprep.subr.bf16.mxu1 %v3707_v34  ;;  %v1025_v19 = vld [vmem:[%s4710_s9 + $0x18] sm:$0xff] }
 0x344   : > { %1006 = vbcast.lane.b32.xlu0 %v1004_v26, 256 }
 0x346   : > { %3285 = vmatpush3.bf16.msra.mxu1 %v3708_v35  ;;  %v1026_v35 = vld [vmem:[%s4710_s9 + $0x20] sm:$0xff] }
 0x347   : > { %943 = vbcast.lane.b32.xlu1 %v941_v25, 256  ;;  %3286 = vmatprep.subr.bf16.mxu1 %v3712_v38 }
 0x348   : > { %1013 = vbcast.lane.b32.xlu0 %v1011_v27, 256 }
 0x34a   : > { %3287 = vmatpush3.bf16.msra.mxu1 %v3713_v37 }
 0x34b   : > { %950 = vbcast.lane.b32.xlu1 %v948_v29, 256  ;;  %3358 = vmatprep.subr.bf16.mxu1 %v4860_v39 }
 0x34c   : > { %1020 = vbcast.lane.b32.xlu0 %v1018_v32, 256 }
 0x34f   : > { %957 = vbcast.lane.b32.xlu1 %v955_v33, 256 }
 0x353   : > { %964 = vbcast.lane.b32.xlu1 %v962_v36, 256  ;;  %v1036_v36 = vld [vmem:[%s4710_s9 + $0x70] sm:$0xff] }
 0x385   : > { %v804_v41 = vpop.permute.xlu1 %803  ;;  %v811_v43 = vpop.permute.xlu0 %810 }
 0x386   : > { %v1054_v44 = vmul.f32 %v1022_v40, %v804_v41  ;;  %v1055_v47 = vmul.f32 %v1023_v42, %v811_v43  ;;  %v706_v40 = vstv %s4879_s1 }
 0x387   : > { %vm4889_vm3 = vcmp.eq.s32.totalorder %v706_v40, 1 }
 0x388   : > { %v1086_v50 = vrot.slane %v1054_v44, 4  ;;  %v1092_v53 = vrot.slane %v1055_v47, 4 }
 0x389   : > { %v860_v48 = vpop.permute.xlu1 %859  ;;  %v874_v49 = vpop.permute.xlu0 %873 }
 0x38a   : > { %v1062_v51 = vmul.f32 %v1030_v45, %v860_v48  ;;  %v1064_v52 = vmul.f32 %v1032_v46, %v874_v49  ;;  %v1087_v62 = vadd.f32 %v1086_v50, %v1054_v44  ;;  %v1093_v2 = vadd.f32 %v1092_v53, %v1055_v47 }
 0x38c   : > { %v1134_v55 = vrot.slane %v1062_v51, 4  ;;  %v1146_v57 = vrot.slane %v1064_v52, 4  ;;  %v1088_v13 = vrot.slane %v1087_v62, 2  ;;  %v1094_v21 = vrot.slane %v1093_v2, 2 }
 0x38d   : > { %v867_v60 = vpop.permute.xlu1 %866  ;;  %v881_v61 = vpop.permute.xlu0 %880 }
 0x38e   : > { %v1135_v0 = vadd.f32 %v1134_v55, %v1062_v51  ;;  %v1063_v1 = vmul.f32 %v1031_v58, %v867_v60  ;;  %v1065_v54 = vmul.f32 %v1033_v59, %v881_v61  ;;  %v1147_v3 = vadd.f32 %v1146_v57, %v1064_v52  ;;  %v4885_v59 = vld [vmem:[%s4702_s8] sm:$0xff]  ;;  %v3722_v61 = vld [vmem:[#allocation16 + $0xa8] ss:$12 sps:$4 sm:$0xff]  }
 0x38f   : > { %v1089_v31 = vadd.f32 %v1088_v13, %v1087_v62  ;;  %v1095_v38 = vadd.f32 %v1094_v21, %v1093_v2  ;;  %v4887_v60 = vld [vmem:[#allocation3] sm:$0xff] }
 0x390   : > { %v1136_v8 = vrot.slane %v1135_v0, 2  ;;  %v1140_v56 = vrot.slane %v1063_v1, 4  ;;  %v1152_v10 = vrot.slane %v1065_v54, 4  ;;  %v1148_v23 = vrot.slane %v1147_v3, 2 }
 0x391   : > { %v818_v11 = vpop.permute.xlu1 %817  ;;  %v888_v12 = vpop.permute.xlu0 %887  ;;  %v1090_v51 = vrot.slane %v1089_v31, 1  ;;  %v1096_v62 = vrot.slane %v1095_v38, 1 }
 0x392   : > { %v1141_v14 = vadd.f32 %v1140_v56, %v1063_v1  ;;  %v1153_v15 = vadd.f32 %v1152_v10, %v1065_v54  ;;  %v1056_v16 = vmul.f32 %v1024_v4, %v818_v11  ;;  %v1066_v18 = vmul.f32 %v1034_v5, %v888_v12  ;;  %v1027_v54 = vld [vmem:[%s4710_s9 + $0x28] sm:$0xff]  ;;  %v1037_v56 = vld [vmem:[%s4710_s9 + $0x78] sm:$0xff] }
 0x393   : > { %v1137_v24 = vadd.f32 %v1136_v8, %v1135_v0  ;;  %v1149_v42 = vadd.f32 %v1148_v23, %v1147_v3  ;;  %v1091_v11 = vadd.f32 %v1090_v51, %v1089_v31  ;;  %v1028_v23 = vld [vmem:[%s4710_s9 + $0x30] sm:$0xff]  ;;  %v1039_v51 = vld [vmem:[%s4710_s9 + $0x88] sm:$0xff] }
 0x394   : > { %v1142_v25 = vrot.slane %v1141_v14, 2  ;;  %v1098_v22 = vrot.slane %v1056_v16, 4  ;;  %v1158_v26 = vrot.slane %v1066_v18, 4  ;;  %v1154_v34 = vrot.slane %v1153_v15, 2 }
 0x395   : > { %v825_v28 = vpop.permute.xlu1 %824  ;;  %v895_v29 = vpop.permute.xlu0 %894  ;;  %v1138_v41 = vrot.slane %v1137_v24, 1  ;;  %v1150_v0 = vrot.slane %v1149_v42, 1 }
 0x396   : > { %v1057_v30 = vmul.f32 %v1025_v19, %v825_v28  ;;  %v1067_v27 = vmul.f32 %v1035_v20, %v895_v29  ;;  %v1143_v33 = vadd.f32 %v1142_v25, %v1141_v14  ;;  %v1099_v32 = vadd.f32 %v1098_v22, %v1056_v16  ;;  %v4896_v14 = vld [vmem:[%s4702_s8 + $0x8] sm:$0xff] }
 0x397   : > { %v1159_v44 = vadd.f32 %v1158_v26, %v1066_v18  ;;  %v1155_v52 = vadd.f32 %v1154_v34, %v1153_v15  ;;  %v1139_v3 = vadd.f32 %v1138_v41, %v1137_v24  ;;  %v4898_v15 = vld [vmem:[#allocation3 + $0x8] sm:$0xff]  ;;  %v708_v16 = vsel %vm4889_vm3, %v4885_v59, %v4887_v60 }
 0x398   : > { %v1104_v37 = vrot.slane %v1057_v30, 4  ;;  %v1144_v43 = vrot.slane %v1143_v33, 1  ;;  %v1100_v47 = vrot.slane %v1099_v32, 2  ;;  %v1164_v48 = vrot.slane %v1067_v27, 4 }
 0x399   : > { %v832_v45 = vpop.permute.xlu1 %831  ;;  %v902_v46 = vpop.permute.xlu0 %901  ;;  %v1160_v1 = vrot.slane %v1159_v44, 2  ;;  %v1156_v12 = vrot.slane %v1155_v52, 1  ;;  %v1097_v24 = vadd.f32 %v1096_v62, %v1095_v38  ;;  %v1151_v25 = vadd.f32 %v1150_v0, %v1149_v42 }
 0x39a   : > { %v1058_v49 = vmul.f32 %v1026_v35, %v832_v45  ;;  %v1068_v50 = vmul.f32 %v1036_v36, %v902_v46  ;;  %v1105_v53 = vadd.f32 %v1104_v37, %v1057_v30  ;;  %v1145_v55 = vadd.f32 %v1144_v43, %v1143_v33  ;;  %v1029_v36 = vld [vmem:[%s4710_s9 + $0x38] sm:$0xff] }
 0x39b   : > { %v1101_v4 = vadd.f32 %v1100_v47, %v1099_v32  ;;  %v1165_v5 = vadd.f32 %v1164_v48, %v1067_v27  ;;  %v1161_v22 = vadd.f32 %v1160_v1, %v1159_v44  ;;  %v709_v31 = vsel %vm4889_vm3, %v4896_v14, %v4898_v15 }
 0x39c   : > { %v1110_v57 = vrot.slane %v1058_v49, 4  ;;  %v1170_v58 = vrot.slane %v1068_v50, 4  ;;  %v1106_v13 = vrot.slane %v1105_v53, 2  ;;  %v1324_v18 = vsel %vm1310_vm1, %v1145_v55, %v1139_v3 }
 0x39d   : > { %v839_v2 = vpop.permute.xlu1 %838  ;;  %v909_v10 = vpop.permute.xlu0 %908  ;;  %v1102_v29 = vrot.slane %v1101_v4, 1  ;;  %v1166_v30 = vrot.slane %v1165_v5, 2  ;;  %v1325_v33 = vsel %vm1312_vm2, %v1151_v25, %v1324_v18  ;;  %v1157_v38 = vadd.f32 %v1156_v12, %v1155_v52  ;;  %v1047_v18 = vld [vmem:[%s4710_s9 + $0xc8] sm:$0xff] }
 0x39e   : > { %v1111_v8 = vadd.f32 %v1110_v57, %v1058_v49  ;;  %v1171_v20 = vadd.f32 %v1170_v58, %v1068_v50  ;;  %v1059_v21 = vmul.f32 %v1027_v54, %v839_v2  ;;  %v1069_v26 = vmul.f32 %v1037_v56, %v909_v10  ;;  %v1038_v58 = vld [vmem:[%s4710_s9 + $0x80] sm:$0xff] }
 0x39f   : > { %v1107_v34 = vadd.f32 %v1106_v13, %v1105_v53  ;;  %v1311_v42 = vsel %vm1310_vm1, %v1097_v24, %v1091_v11  ;;  %v1162_v43 = vrot.slane %v1161_v22, 1  ;;  %v4914_v47 = vsel %vm1314_vm4, %v1157_v38, %v1325_v33  ;;  %v1046_v24 = vld [vmem:[%s4710_s9 + $0xc0] sm:$0xff] }
 0x3a0   : > { %v1112_v19 = vrot.slane %v1111_v8, 2  ;;  %v1116_v27 = vrot.slane %v1059_v21, 4  ;;  %v1176_v32 = vrot.slane %v1069_v26, 4  ;;  %v1172_v40 = vrot.slane %v1171_v20, 2 }
 0x3a1   : > { %v846_v28 = vpop.permute.xlu1 %845  ;;  %v1167_v48 = vadd.f32 %v1166_v30, %v1165_v5  ;;  %v1103_v53 = vadd.f32 %v1102_v29, %v1101_v4  ;;  %v1108_v55 = vrot.slane %v1107_v34, 1  ;;  %v1163_v3 = vadd.f32 %v1162_v43, %v1161_v22 }
 0x3a2   : > { %v1060_v35 = vmul.f32 %v1028_v23, %v846_v28  ;;  %v1113_v37 = vadd.f32 %v1112_v19, %v1111_v8  ;;  %v1117_v41 = vadd.f32 %v1116_v27, %v1059_v21  ;;  %v1177_v44 = vadd.f32 %v1176_v32, %v1069_v26  ;;  %v923_v2 = vpop.permute.xlu0 %922 }
 0x3a3   : > { %v1173_v0 = vadd.f32 %v1172_v40, %v1171_v20  ;;  %v1071_v5 = vmul.f32 %v1039_v51, %v923_v2  ;;  %v1168_v11 = vrot.slane %v1167_v48, 1  ;;  %v1313_v19 = vsel %vm1312_vm2, %v1103_v53, %v1311_v42  ;;  %v1040_v53 = vld [vmem:[%s4710_s9 + $0x90] sm:$0xff]  ;;  %v1049_v2 = vld [vmem:[%s4710_s9 + $0xd8] sm:$0xff] }
 0x3a4   : > { %v1122_v45 = vrot.slane %v1060_v35, 4  ;;  %v1118_v49 = vrot.slane %v1117_v41, 2  ;;  %v1178_v52 = vrot.slane %v1177_v44, 2  ;;  %v1114_v62 = vrot.slane %v1113_v37, 1 }
 0x3a5   : > { %v853_v46 = vpop.permute.xlu1 %852  ;;  %v1109_v20 = vadd.f32 %v1108_v55, %v1107_v34  ;;  %v1188_v23 = vrot.slane %v1071_v5, 4  ;;  %v1174_v22 = vrot.slane %v1173_v0, 1  ;;  %v1169_v42 = vadd.f32 %v1168_v11, %v1167_v48 }
 0x3a6   : > { %v1061_v50 = vmul.f32 %v1029_v36, %v853_v46  ;;  %v1123_v57 = vadd.f32 %v1122_v45, %v1060_v35  ;;  %v1119_v1 = vadd.f32 %v1118_v49, %v1117_v41  ;;  %v1179_v8 = vadd.f32 %v1178_v52, %v1177_v44  ;;  %v979_v29 = vpop.permute.xlu0 %978  ;;  %v1048_v44 = vld [vmem:[%s4710_s9 + $0xd0] sm:$0xff] }
 0x3a7   : > { %v1115_v25 = vadd.f32 %v1114_v62, %v1113_v37  ;;  %v1189_v33 = vadd.f32 %v1188_v23, %v1071_v5  ;;  %v1079_v32 = vmul.f32 %v1047_v18, %v979_v29  ;;  %v1315_v34 = vsel %vm1314_vm4, %v1109_v20, %v1313_v19 }
 0x3a8   : > { %v1128_v54 = vrot.slane %v1061_v50, 4  ;;  %v1124_v56 = vrot.slane %v1123_v57, 2  ;;  %v1120_v4 = vrot.slane %v1119_v1, 1  ;;  %v1180_v30 = vrot.slane %v1179_v8, 1 }
 0x3a9   : > { %v916_v10 = vpop.permute.xlu1 %915  ;;  %v1236_v37 = vrot.slane %v1079_v32, 4  ;;  %v1190_v46 = vrot.slane %v1189_v33, 2  ;;  %v1175_v55 = vadd.f32 %v1174_v22, %v1173_v0  ;;  %v1317_v62 = vsel %vm1316_vm5, %v1115_v25, %v1315_v34 }
 0x3aa   : > { %v1129_v12 = vadd.f32 %v1128_v54, %v1061_v50  ;;  %v1070_v13 = vmul.f32 %v1038_v58, %v916_v10  ;;  %v1125_v21 = vadd.f32 %v1124_v56, %v1123_v57  ;;  %v1121_v36 = vadd.f32 %v1120_v4, %v1119_v1  ;;  %v986_v51 = vpop.permute.xlu0 %985  ;;  %v1041_v10 = vld [vmem:[%s4710_s9 + $0x98] sm:$0xff] }
 0x3ab   : > { %v1181_v52 = vadd.f32 %v1180_v30, %v1179_v8  ;;  %v1237_v57 = vadd.f32 %v1236_v37, %v1079_v32  ;;  %v1080_v48 = vmul.f32 %v1048_v44, %v986_v51  ;;  %v1327_v4 = vsel %vm1316_vm5, %v1163_v3, %v4914_v47  ;;  %v1050_v30 = vld [vmem:[%s4710_s9 + $0xe0] sm:$0xff]  ;;  %v1043_v37 = vld [vmem:[%s4710_s9 + $0xa8] sm:$0xff] }
 0x3ac   : > { %v1130_v26 = vrot.slane %v1129_v12, 2  ;;  %v1182_v28 = vrot.slane %v1070_v13, 4  ;;  %v1126_v27 = vrot.slane %v1125_v21, 1  ;;  %v1319_v56 = vsel %vm1318_vm6, %v1121_v36, %v1317_v62  ;;  %v3696_v36 = vld [vmem:[#allocation16 + $0x1c] ss:$12 sps:$4 sm:$0xff]  }
 0x3ad   : > { %v972_v35 = vpop.permute.xlu1 %971  ;;  %v1191_v0 = vadd.f32 %v1190_v46, %v1189_v33  ;;  %v1328_v18 = vsel %vm1318_vm6, %v1169_v42, %v1327_v4  ;;  %v1238_v19 = vrot.slane %v1237_v57, 2  ;;  %v1349_v47 = vpack.c.bf16 %v709_v31, %v708_v16  ;;  %v3721_v16 = vld [vmem:[#allocation16 + $0x20] ss:$12 sps:$4 sm:$0xff]   ;;  %v3694_v44 = vld [vmem:[#allocation16 + $0x18] ss:$12 sps:$4 sm:$0xff]  }
 0x3ae   : > { %v1131_v38 = vadd.f32 %v1130_v26, %v1129_v12  ;;  %v1183_v40 = vadd.f32 %v1182_v28, %v1070_v13  ;;  %v1078_v41 = vmul.f32 %v1046_v24, %v972_v35  ;;  %v1127_v43 = vadd.f32 %v1126_v27, %v1125_v21  ;;  %v993_v12 = vpop.permute.xlu0 %992  ;;  %v3689_v27 = vld [vmem:[#allocation16] ss:$12 sps:$4 sm:$0xff]   ;;  %v3725_v62 = vld [vmem:[#allocation16 + $0x38] ss:$12 sps:$4 sm:$0xff]  }
 0x3af   : > { %v1081_v20 = vmul.f32 %v1049_v2, %v993_v12  ;;  %v1329_v23 = vsel %vm1320_vm7, %v1175_v55, %v1328_v18  ;;  %v1242_v24 = vrot.slane %v1080_v48, 4  ;;  %v1192_v33 = vrot.slane %v1191_v0, 1  ;;  %v1042_v35 = vld [vmem:[%s4710_s9 + $0xa0] sm:$0xff] }
 0x3b0   : > { %v1132_v45 = vrot.slane %v1131_v38, 1  ;;  %v1184_v49 = vrot.slane %v1183_v40, 2  ;;  %v1230_v50 = vrot.slane %v1078_v41, 4  ;;  %v1321_v11 = vsel %vm1320_vm7, %v1127_v43, %v1319_v56  ;;  %v1052_v56 = vld [vmem:[%s4710_s9 + $0xf0] sm:$0xff] }
 0x3b1   : > { %v930_v58 = vpop.permute.xlu1 %929  ;;  %v1330_v22 = vsel %vm1322_vm8, %v1181_v52, %v1329_v23  ;;  %v1248_v28 = vrot.slane %v1081_v20, 4  ;;  %v1239_v14 = vadd.f32 %v1238_v19, %v1237_v57 }
 0x3b2   : > { %v1133_v1 = vadd.f32 %v1132_v45, %v1131_v38  ;;  %v1231_v54 = vadd.f32 %v1230_v50, %v1078_v41  ;;  %v1072_v5 = vmul.f32 %v1040_v53, %v930_v58  ;;  %v1185_v8 = vadd.f32 %v1184_v49, %v1183_v40  ;;  %v1000_v60 = vpop.permute.xlu0 %999  ;;  %v1051_v41 = vld [vmem:[%s4710_s9 + $0xe8] sm:$0xff]  ;;  %v3701_v53 = vld [vmem:[#allocation16 + $0x34] ss:$12 sps:$4 sm:$0xff]  }
 0x3b3   : > { %v1243_v38 = vadd.f32 %v1242_v24, %v1080_v48  ;;  %v1082_v40 = vmul.f32 %v1050_v30, %v1000_v60  ;;  %v1249_v42 = vadd.f32 %v1248_v28, %v1081_v20  ;;  %v1193_v45 = vadd.f32 %v1192_v33, %v1191_v0  ;;  %v1044_v0 = vld [vmem:[%s4710_s9 + $0xb0] sm:$0xff]  ;;  %v3706_v20 = vld [vmem:[#allocation16 + $0x4c] ss:$12 sps:$4 sm:$0xff]  }
 0x3b4   : > { %v1323_v13 = vsel %vm1322_vm8, %v1133_v1, %v1321_v11  ;;  %v1232_v3 = vrot.slane %v1231_v54, 2  ;;  %v1194_v26 = vrot.slane %v1072_v5, 4  ;;  %v1186_v32 = vrot.slane %v1185_v8, 1  ;;  %v1053_v30 = vld [vmem:[%s4710_s9 + $0xf8] sm:$0xff] }
 0x3b5   : > { %v937_v21 = vpop.permute.xlu1 %936  ;;  %v1350_v29 = vpack.c.bf16 %v1330_v22, %v1323_v13  ;;  %v1254_v50 = vrot.slane %v1082_v40, 4  ;;  %v1240_v55 = vrot.slane %v1239_v14, 1  ;;  %v1045_v60 = vld [vmem:[%s4710_s9 + $0xb8] sm:$0xff] }
 0x3b6   : > { %v1073_v25 = vmul.f32 %v1041_v10, %v937_v21  ;;  %v1233_v31 = vadd.f32 %v1232_v3, %v1231_v54  ;;  %v1195_v34 = vadd.f32 %v1194_v26, %v1072_v5  ;;  %v1187_v46 = vadd.f32 %v1186_v32, %v1185_v8  ;;  %v1007_v51 = vpop.permute.xlu0 %1006  ;;  %v3699_v8 = vld [vmem:[#allocation16 + $0x30] ss:$12 sps:$4 sm:$0xff]  }
 0x3b7   : > { %1722 = vmatprep.mubr.bf16.mxu0 %v1350_v29  ;;  %1775 = vmatprep.mubr.bf16.mxu1 %v1350_v29  ;;  %v1083_v57 = vmul.f32 %v1051_v41, %v1007_v51  ;;  %v1244_v54 = vrot.slane %v1243_v38, 2  ;;  %v1255_v48 = vadd.f32 %v1254_v50, %v1082_v40  ;;  %v1250_v10 = vrot.slane %v1249_v42, 2  ;;  %v3711_v41 = vld [vmem:[#allocation16 + $0x64] ss:$12 sps:$4 sm:$0xff]  }
 0x3b8   : > { %v1200_v59 = vrot.slane %v1073_v25, 4  ;;  %1723 = vmatmul.mubr.bf16.vlgmr.msra.gmra.mrb[0].mxu0 %v1349_v47  ;;  %1776 = vmatmul.mubr.bf16.vlgmr.msra.gmra.mrb[0].mxu1 %v1349_v47  ;;  %v1234_v1 = vrot.slane %v1233_v31, 1  ;;  %v1196_v5 = vrot.slane %v1195_v34, 2  ;;  %v4955_v21 = vadd.f32 %v1240_v55, %v1239_v14 }
 0x3b9   : > { %v944_v15 = vpop.permute.xlu1 %943  ;;  %1972 = vmatpush1.bf16.msra.mxu0 %v3689_v27  ;;  %3359 = vmatpush3.bf16.msra.mxu1 %v4860_v39  ;;  %v1260_v4 = vrot.slane %v1083_v57, 4  ;;  %v4953_v39 = vsel %vm1310_vm1, %v1193_v45, %v1187_v46  ;;  %v1256_v13 = vrot.slane %v1255_v48, 2  ;;  %v1245_v26 = vadd.f32 %v1244_v54, %v1243_v38  ;;  %v3716_v54 = vld [vmem:[#allocation16 + $0x7c] ss:$12 sps:$4 sm:$0xff]  }
 0x3ba   : > { %v1074_v43 = vmul.f32 %v1042_v35, %v944_v15  ;;  %v1201_v49 = vadd.f32 %v1200_v59, %v1073_v25  ;;  %1973 = vmatprep.subr.bf16.mxu0 %v3696_v36  ;;  %3360 = vmatprep.subr.bf16.mxu1 %v3721_v16  ;;  %v1014_v19 = vpop.permute.xlu0 %1013  ;;  %v3726_v25 = vld [vmem:[#allocation16 + $0x50] ss:$12 sps:$4 sm:$0xff]   ;;  %v4957_v22 = vadd.f32 %v1234_v1, %v1233_v31  ;;  %v3704_v35 = vld [vmem:[#allocation16 + $0x48] ss:$12 sps:$4 sm:$0xff]  }
 0x3bb   : > { %v1261_v47 = vadd.f32 %v1260_v4, %v1083_v57  ;;  %v1084_v3 = vmul.f32 %v1052_v56, %v1014_v19  ;;  %v1197_v27 = vadd.f32 %v1196_v5, %v1195_v34  ;;  %v1251_v33 = vadd.f32 %v1250_v10, %v1249_v42  ;;  %v3727_v34 = vld [vmem:[#allocation16 + $0x68] ss:$12 sps:$4 sm:$0xff]   ;;  %v3728_v10 = vld [vmem:[#allocation16 + $0x80] ss:$12 sps:$4 sm:$0xff]  }
 0x3bc   : > { %v1206_v52 = vrot.slane %v1074_v43, 4  ;;  %v1202_v12 = vrot.slane %v1201_v49, 2  ;;  %v1257_v14 = vadd.f32 %v1256_v13, %v1255_v48  ;;  %v1246_v42 = vrot.slane %v1245_v26, 1 }
 0x3bd   : > { %v951_v58 = vpop.permute.xlu1 %950  ;;  %1974 = vmatpush1.bf16.msra.mxu0 %v3694_v44  ;;  %3361 = vmatpush3.bf16.msra.mxu1 %v3721_v16  ;;  %v1262_v32 = vrot.slane %v1261_v47, 2  ;;  %v1266_v59 = vrot.slane %v1084_v3, 4  ;;  %v1198_v51 = vrot.slane %v1197_v27, 1 }
 0x3be   : > { %v1075_v2 = vmul.f32 %v1043_v37, %v951_v58  ;;  %v1207_v11 = vadd.f32 %v1206_v52, %v1074_v43  ;;  %1975 = vmatprep.subr.bf16.mxu0 %v3701_v53  ;;  %3362 = vmatprep.subr.bf16.mxu1 %v3725_v62  ;;  %v1203_v36 = vadd.f32 %v1202_v12, %v1201_v49  ;;  %v1021_v40 = vpop.permute.xlu0 %1020  ;;  %v1252_v49 = vrot.slane %v1251_v33, 1  ;;  %v3709_v52 = vld [vmem:[#allocation16 + $0x60] ss:$12 sps:$4 sm:$0xff]  }
 0x3bf   : > { %v1263_v38 = vadd.f32 %v1262_v32, %v1261_v47  ;;  %v1267_v43 = vadd.f32 %v1266_v59, %v1084_v3  ;;  %v1085_v37 = vmul.f32 %v1053_v30, %v1021_v40  ;;  %v1258_v58 = vrot.slane %v1257_v14, 1  ;;  %v3729_v32 = vld [vmem:[#allocation16 + $0x98] ss:$12 sps:$4 sm:$0xff]  }
 0x3c0   : > { %v1212_v18 = vrot.slane %v1075_v2, 4  ;;  %v1208_v23 = vrot.slane %v1207_v11, 2  ;;  %v1204_v57 = vrot.slane %v1203_v36, 1  ;;  %v1199_v12 = vadd.f32 %v1198_v51, %v1197_v27  ;;  %v699_v27 = vld [vmem:[%s4702_s8 + $0x10] sm:$0xff] }
 0x3c1   : > { %v958_v24 = vpop.permute.xlu1 %957  ;;  %1976 = vmatpush1.bf16.msra.mxu0 %v3699_v8  ;;  %3363 = vmatpush3.bf16.msra.mxu1 %v3725_v62  ;;  %v1268_v53 = vrot.slane %v1267_v43, 2  ;;  %v1272_v55 = vrot.slane %v1085_v37, 4  ;;  %v1253_v13 = vadd.f32 %v1252_v49, %v1251_v33  ;;  %v1259_v47 = vadd.f32 %v1258_v58, %v1257_v14  ;;  %v703_v33 = vld [vmem:[#allocation3 + $0x10] sm:$0xff]  ;;  %v700_v14 = vld [vmem:[%s4702_s8 + $0x18] sm:$0xff] }
 0x3c2   : > { %v1213_v28 = vadd.f32 %v1212_v18, %v1075_v2  ;;  %v1076_v29 = vmul.f32 %v1044_v0, %v958_v24  ;;  %1977 = vmatprep.subr.bf16.mxu0 %v3706_v20  ;;  %v1209_v31 = vadd.f32 %v1208_v23, %v1207_v11  ;;  %3364 = vmatprep.subr.bf16.mxu1 %v3726_v25  ;;  %v1264_v2 = vrot.slane %v1263_v38, 1  ;;  %v3714_v20 = vld [vmem:[#allocation16 + $0x78] ss:$12 sps:$4 sm:$0xff]  }
 0x3c3   : > { %v1269_v56 = vadd.f32 %v1268_v53, %v1267_v43  ;;  %v1273_v5 = vadd.f32 %v1272_v55, %v1085_v37  ;;  %v1247_v11 = vadd.f32 %v1246_v42, %v1245_v26  ;;  %v1205_v23 = vadd.f32 %v1204_v57, %v1203_v36 }
 0x3c4   : > { %v1214_v15 = vrot.slane %v1213_v28, 2  ;;  %v1218_v16 = vrot.slane %v1076_v29, 4  ;;  %v1210_v48 = vrot.slane %v1209_v31, 1  ;;  %v1338_v26 = vsel %vm1310_vm1, %v4955_v21, %v4957_v22 }
 0x3c5   : > { %v965_v44 = vpop.permute.xlu1 %964  ;;  %1978 = vmatpush1.bf16.msra.mxu0 %v3704_v35  ;;  %3365 = vmatpush3.bf16.msra.mxu1 %v3726_v25  ;;  %v1270_v18 = vrot.slane %v1269_v56, 1  ;;  %v1274_v19 = vrot.slane %v1273_v5, 2  ;;  %v3720_v25 = vld [vmem:[#allocation16 + $0x94] ss:$12 sps:$4 sm:$0xff]   ;;  %v1339_v59 = vsel %vm1312_vm2, %v1247_v11, %v1338_v26  ;;  %v710_v37 = vsel %vm4889_vm3, %v699_v27, %v703_v33  ;;  %v3736_v11 = vld [vmem:[#allocation17 + $0x1c] ss:$12 sps:$4 sm:$0xff]  }
 0x3c6   : > { %v1215_v45 = vadd.f32 %v1214_v15, %v1213_v28  ;;  %v1219_v46 = vadd.f32 %v1218_v16, %v1076_v29  ;;  %v1077_v50 = vmul.f32 %v1045_v60, %v965_v44  ;;  %1979 = vmatprep.subr.bf16.mxu0 %v3711_v41  ;;  %3366 = vmatprep.subr.bf16.mxu1 %v3727_v34  ;;  %v704_v15 = vld [vmem:[#allocation3 + $0x18] sm:$0xff]  ;;  %v3760_v27 = vld [vmem:[#allocation17 + $0x80] ss:$12 sps:$4 sm:$0xff]  }
 0x3c7   : > { %v1211_v28 = vadd.f32 %v1210_v48, %v1209_v31  ;;  %v1265_v29 = vadd.f32 %v1264_v2, %v1263_v38  ;;  %v1275_v30 = vadd.f32 %v1274_v19, %v1273_v5  ;;  %v1271_v35 = vadd.f32 %v1270_v18, %v1269_v56  ;;  %v3718_v41 = vld [vmem:[#allocation16 + $0x90] ss:$12 sps:$4 sm:$0xff]   ;;  %v3724_v44 = vld [vmem:[#allocation16 + $0xac] ss:$12 sps:$4 sm:$0xff]   ;;  %v3741_v19 = vld [vmem:[#allocation17 + $0x48] ss:$12 sps:$4 sm:$0xff]  }
 0x3c8   : > { %v1220_v62 = vrot.slane %v1219_v46, 2  ;;  %v1224_v1 = vrot.slane %v1077_v50, 4  ;;  %v1216_v4 = vrot.slane %v1215_v45, 1  ;;  %v1332_v16 = vsel %vm1312_vm2, %v1199_v12, %v4953_v39  ;;  %v4990_v48 = vld [vmem:[#allocation2 + $0x18] sm:$0xff]  ;;  %v4992_v2 = vld [vmem:[#allocation2 + $0x10] sm:$0xff] }
 0x3c9   : > { %1980 = vmatpush1.bf16.msra.mxu0 %v3709_v52  ;;  %3367 = vmatpush3.bf16.msra.mxu1 %v3727_v34  ;;  %v1340_v40 = vsel %vm1314_vm4, %v1253_v13, %v1339_v59  ;;  %v1276_v22 = vrot.slane %v1275_v30, 1  ;;  %v1333_v31 = vsel %vm1314_vm4, %v1205_v23, %v1332_v16  ;;  %v1793_v56 = vpack.c.bf16 %v4990_v48, %v4992_v2  ;;  %v3733_v5 = vld [vmem:[#allocation17 + $0x4] ss:$12 sps:$4 sm:$0xff]   ;;  %v3743_v13 = vld [vmem:[#allocation17 + $0x4c] ss:$12 sps:$4 sm:$0xff]  }
 0x3ca   : > { %v1221_v0 = vadd.f32 %v1220_v62, %v1219_v46  ;;  %v1225_v8 = vadd.f32 %v1224_v1, %v1077_v50  ;;  %1981 = vmatprep.subr.bf16.mxu0 %v3716_v54  ;;  %3368 = vmatprep.subr.bf16.mxu1 %v3728_v10  ;;  %v1217_v60 = vadd.f32 %v1216_v4, %v1215_v45  ;;  %v3730_v46 = vld [vmem:[#allocation16 + $0xb0] ss:$12 sps:$4 sm:$0xff]   ;;  %v4985_v1 = vld [vmem:[#allocation2 + $0x8] sm:$0xff]  ;;  %v3755_v26 = vld [vmem:[#allocation17 + $0x94] ss:$12 sps:$4 sm:$0xff]  }
 0x3cb   : > { %v1341_v38 = vsel %vm1316_vm5, %v1259_v47, %v1340_v40  ;;  %v1334_v34 = vsel %vm1316_vm5, %v1211_v28, %v1333_v31  ;;  %v1277_v39 = vadd.f32 %v1276_v22, %v1275_v30  ;;  %v711_v45 = vsel %vm4889_vm3, %v700_v14, %v704_v15  ;;  %v4983_v62 = vld [vmem:[#allocation2] sm:$0xff]  ;;  %v3756_v28 = vld [vmem:[#allocation17 + $0x68] ss:$12 sps:$4 sm:$0xff]   ;;  %v3759_v30 = vld [vmem:[#allocation17 + $0xac] ss:$12 sps:$4 sm:$0xff]  }
 0x3cc   : > { %v1222_v3 = vrot.slane %v1221_v0, 1  ;;  %v1226_v24 = vrot.slane %v1225_v8, 2  ;;  %v1342_v42 = vsel %vm1318_vm6, %v1265_v29, %v1341_v38  ;;  %v1335_v51 = vsel %vm1318_vm6, %v1217_v60, %v1334_v34  ;;  %v3734_v4 = vld [vmem:[#allocation17 + $0x18] ss:$12 sps:$4 sm:$0xff]   ;;  %v3737_v12 = vld [vmem:[#allocation17 + $0x30] ss:$12 sps:$4 sm:$0xff]  }
 0x3cd   : > { %1982 = vmatpush1.bf16.msra.mxu0 %v3714_v20  ;;  %3369 = vmatpush3.bf16.msra.mxu1 %v3728_v10  ;;  %v1343_v49 = vsel %vm1320_vm7, %v1271_v35, %v1342_v42  ;;  %v1351_v57 = vpack.c.bf16 %v711_v45, %v710_v37  ;;  %v1792_v54 = vpack.c.bf16 %v4985_v1, %v4983_v62  ;;  %v3731_v10 = vld [vmem:[#allocation17] ss:$12 sps:$4 sm:$0xff]   ;;  %v3747_v20 = vld [vmem:[#allocation17 + $0x64] ss:$12 sps:$4 sm:$0xff]   ;;  %v3757_v33 = vld [vmem:[#allocation17 + $0xa8] ss:$12 sps:$4 sm:$0xff]  }
 0x3ce   : > { %v1227_v36 = vadd.f32 %v1226_v24, %v1225_v8  ;;  %v1223_v21 = vadd.f32 %v1222_v3, %v1221_v0  ;;  %1983 = vmatprep.subr.bf16.mxu0 %v3720_v25  ;;  %3370 = vmatprep.subr.bf16.mxu1 %v3729_v32  ;;  %v1344_v55 = vsel %vm1322_vm8, %v1277_v39, %v1343_v49  ;;  %v3739_v0 = vld [vmem:[#allocation17 + $0x34] ss:$12 sps:$4 sm:$0xff]   ;;  %v3748_v23 = vld [vmem:[#allocation17 + $0x38] ss:$12 sps:$4 sm:$0xff]   ;;  %v3751_v3 = vld [vmem:[#allocation17 + $0x7c] ss:$12 sps:$4 sm:$0xff]  }
 0x3cf   : > { %v3740_v8 = vld [vmem:[#allocation17 + $0x8] ss:$12 sps:$4 sm:$0xff]   ;;  %v3744_v18 = vld [vmem:[#allocation17 + $0x20] ss:$12 sps:$4 sm:$0xff]   ;;  %v3752_v24 = vld [vmem:[#allocation17 + $0x50] ss:$12 sps:$4 sm:$0xff]  }
 0x3d0   : > { %v1228_v43 = vrot.slane %v1227_v36, 1  ;;  %v1336_v53 = vsel %vm1320_vm7, %v1223_v21, %v1335_v51  ;;  %v3745_v47 = vld [vmem:[#allocation17 + $0x60] ss:$12 sps:$4 sm:$0xff]   ;;  %v3749_v25 = vld [vmem:[#allocation17 + $0x78] ss:$12 sps:$4 sm:$0xff]  }
 0x3d1   : > { %1984 = vmatpush1.bf16.msra.mxu0 %v3718_v41  ;;  %3371 = vmatpush3.bf16.msra.mxu1 %v3729_v32  ;;  %v3753_v29 = vld [vmem:[#allocation17 + $0x90] ss:$12 sps:$4 sm:$0xff]   ;;  %v3761_v32 = vld [vmem:[#allocation17 + $0x98] ss:$12 sps:$4 sm:$0xff]  }
 0x3d2   : > { %v1229_v50 = vadd.f32 %v1228_v43, %v1227_v36  ;;  %1985 = vmatprep.subr.bf16.mxu0 %v3724_v44  ;;  %3372 = vmatprep.subr.bf16.mxu1 %v3730_v46  ;;  %v3762_v59 = vld [vmem:[#allocation17 + $0xb0] ss:$12 sps:$4 sm:$0xff]  }
 0x3d3   : > { %v1826_v40 = vld [vmem:[%s5304_s3] sm:$0x7] }
 0x3d4   : > { %v1337_v52 = vsel %vm1322_vm8, %v1229_v50, %v1336_v53  ;;  %v1417_v21 = vld [vmem:[%s5305_s11] sm:$0x7]  ;;  %v1831_v31 = vrot.slane %v1826_v40, %v4776_v7  ;;  %v1835_v39 = vrot.slane %v1826_v40, %v4773_v6 }
 0x3d5   : > { %v1352_v58 = vpack.c.bf16 %v1344_v55, %v1337_v52  ;;  %1986 = vmatpush1.bf16.msra.mxu0 %v3722_v61  ;;  %3373 = vmatpush3.bf16.msra.mxu1 %v3730_v46  ;;  %v1422_v41 = vrot.slane %v1417_v21, %v4776_v7  ;;  %v1426_v34 = vrot.slane %v1417_v21, %v4773_v6 }
 0x3d6   : > { %2336 = vmatprep.subr.bf16.mxu1 %v3733_v5  ;;  %3378 = vmatprep.subr.bf16.mxu0 %v3740_v8 }
 0x3d7   : > { %1732 = vmatprep.mubr.bf16.mxu0 %v1352_v58  ;;  %1783 = vmatprep.mubr.bf16.mxu1 %v1352_v58  ;;  %v3418_v45 = vadd.f32 %v1831_v31, %v1422_v41  ;;  %v3420_v50 = vadd.f32 %v1835_v39, %v1426_v34 }
 0x3d8   : > { %1733 = vmatmul.mubr.bf16.gmra.mrb[4].mxu0 %v1351_v57  ;;  %1784 = vmatmul.mubr.bf16.gmra.mrb[4].mxu1 %v1351_v57 }
 0x3d9   : > { %2003 = vmatprep.mubr.bf16.mxu0 %v4223_v9  ;;  %3374 = vmatprep.mubr.bf16.mxu1 %v1792_v54 }
 0x3e0   : > { %2004 = vmatmul.mubr.bf16.vlgmr.msra.gmra.mrb[0].mxu0 %v1792_v54  ;;  %3375 = vmatmul.mubr.bf16.vlgmr.msra.gmra.mrb[8].mxu1 %v1793_v56 }
 0x3e1   : > { %2013 = vmatprep.mubr.bf16.mxu0 %v4223_v9  ;;  %2368 = vmatprep.mubr.bf16.mxu1 %v4223_v9 }
 0x3e2   : > { %2337 = vmatpush1.bf16.msra.mxu1 %v3731_v10  ;;  %3379 = vmatpush3.bf16.msra.mxu0 %v3740_v8 }
 0x3e3   : > { %2338 = vmatprep.subr.bf16.mxu1 %v3736_v11  ;;  %3380 = vmatprep.subr.bf16.mxu0 %v3744_v18 }
 0x3e6   : > { %2339 = vmatpush1.bf16.msra.mxu1 %v3734_v4  ;;  %3381 = vmatpush3.bf16.msra.mxu0 %v3744_v18 }
 0x3e7   : > { %2340 = vmatprep.subr.bf16.mxu1 %v3739_v0  ;;  %3382 = vmatprep.subr.bf16.mxu0 %v3748_v23 }
 0x3e8   : > { %2014 = vmatmul.mubr.bf16.gmra.mrb[4].mxu0 %v1793_v56 }
 0x3ea   : > { %2341 = vmatpush1.bf16.msra.mxu1 %v3737_v12  ;;  %3383 = vmatpush3.bf16.msra.mxu0 %v3748_v23 }
 0x3eb   : > { %2342 = vmatprep.subr.bf16.mxu1 %v3743_v13  ;;  %3384 = vmatprep.subr.bf16.mxu0 %v3752_v24 }
 0x3ee   : > { %2343 = vmatpush1.bf16.msra.mxu1 %v3741_v19  ;;  %3385 = vmatpush3.bf16.msra.mxu0 %v3752_v24 }
 0x3ef   : > { %2344 = vmatprep.subr.bf16.mxu1 %v3747_v20  ;;  %3386 = vmatprep.subr.bf16.mxu0 %v3756_v28 }
 0x3f2   : > { %2345 = vmatpush1.bf16.msra.mxu1 %v3745_v47  ;;  %3387 = vmatpush3.bf16.msra.mxu0 %v3756_v28 }
 0x3f3   : > { %2346 = vmatprep.subr.bf16.mxu1 %v3751_v3  ;;  %3388 = vmatprep.subr.bf16.mxu0 %v3760_v27 }
 0x3f6   : > { %2347 = vmatpush1.bf16.msra.mxu1 %v3749_v25  ;;  %3389 = vmatpush3.bf16.msra.mxu0 %v3760_v27 }
 0x3f7   : > { %2348 = vmatprep.subr.bf16.mxu1 %v3755_v26  ;;  %3390 = vmatprep.subr.bf16.mxu0 %v3761_v32 }
 0x3fa   : > { %2349 = vmatpush1.bf16.msra.mxu1 %v3753_v29  ;;  %3391 = vmatpush3.bf16.msra.mxu0 %v3761_v32 }
 0x3fb   : > { %2350 = vmatprep.subr.bf16.mxu1 %v3759_v30  ;;  %3392 = vmatprep.subr.bf16.mxu0 %v3762_v59 }
 0x3fe   : > { %2351 = vmatpush1.bf16.msra.mxu1 %v3757_v33  ;;  %3393 = vmatpush3.bf16.msra.mxu0 %v3762_v59  ;;  %v1839_v33 = vrot.slane %v1826_v40, %v4785_v17 }
 0x48b   : > { %v3288_v60 = vpop.f32.mrb[0].mxu1 }
 0x48c   : > { %v3289_v35 = vpop.f32.mrb[1].mxu1 }
 0x48d   : > { %v4998_v36 = vadd.f32 %v3289_v35, %v3288_v60  ;;  %v3291_v14 = vpop.f32.mrb[2].mxu1 }
 0x48e   : > { %v3292_v15 = vpop.f32.mrb[3].mxu1 }
 0x48f   : > { %v5000_v16 = vadd.f32 %v3292_v15, %v3291_v14  ;;  %v1430_v15 = vrot.slane %v1417_v21, %v4785_v17 }
 0x491   : > { %v1778_v34 = vadd.f32 %v4998_v36, %v1430_v15 }
 0x4ab   : > { %v3294_v22 = vpop.f32.mrb[4].mxu1 }
 0x4ac   : > { %v3295_v38 = vpop.f32.mrb[5].mxu1 }
 0x4ad   : > { %v5010_v43 = vadd.f32 %v3295_v38, %v3294_v22  ;;  %v3297_v37 = vpop.f32.mrb[6].mxu1 }
 0x4ae   : > { %v3298_v44 = vpop.f32.mrb[7].mxu1 }
 0x4af   : > { %v5014_v42 = vadd.f32 %v3298_v44, %v3297_v37  ;;  %v1786_v36 = vadd.f32 %v5010_v43, %v1430_v15 }
 0x4b3   : > { %v2005_v46 = vpop.f32.mrb[0].mxu0  ;;  %v5016_v51 = vpop.f32.mrb[8].mxu1 }
 0x4b4   : > { %v3419_v49 = vadd.f32 %v3418_v45, %v2005_v46  ;;  %v2007_v53 = vpop.f32.mrb[1].mxu0  ;;  %v2058_v55 = vpop.f32.mrb[9].mxu1  ;;  %v1781_v46 = vadd.f32 %v5000_v16, %v1430_v15 }
 0x4b5   : > { %v2009_v52 = vpop.f32.mrb[2].mxu0  ;;  %v5018_v57 = vpop.f32.mrb[10].mxu1  ;;  %v3421_v5 = vadd.f32 %v3420_v50, %v2007_v53  ;;  %v2059_v41 = vadd.f32 %v2058_v55, %v1839_v33 }
 0x4b6   : > { %v3198_v58 = vmul.f32 -1.442695, %v3419_v49  ;;  %v3423_v61 = vadd.f32 %v3418_v45, %v2009_v52  ;;  %v2011_v54 = vpop.f32.mrb[3].mxu0  ;;  %v2061_v56 = vpop.f32.mrb[11].mxu1 }
 0x4b7   : > { %v3425_v11 = vadd.f32 %v3420_v50, %v2011_v54  ;;  %v3202_v4 = vmul.f32 -1.442695, %v3421_v5  ;;  %v2062_v39 = vadd.f32 %v2061_v56, %v1839_v33  ;;  %v2070_v56 = vadd.f32 %v5018_v57, %v1839_v33 }
 0x4b8   : > { %3779 = vpow2.f32 %v3198_v58  ;;  %v3199_v10 = vmul.f32 -1.442695, %v3423_v61  ;;  %v2067_v58 = vadd.f32 %v5016_v51, %v1839_v33 }
 0x4b9   : > { %v3203_v13 = vmul.f32 -1.442695, %v3425_v11 }
 0x4ba   : > { %3781 = vpow2.f32 %v3199_v10  ;;  %v1789_v10 = vadd.f32 %v5014_v42, %v1430_v15 }
 0x4bb   : > { %v2015_v0 = vpop.f32.mrb[4].mxu0  ;;  %3783 = vpow2.f32 %v3202_v4 }
 0x4bc   : > { %v3427_v8 = vadd.f32 %v3418_v45, %v2015_v0  ;;  %v2017_v12 = vpop.f32.mrb[5].mxu0 }
 0x4bd   : > { %v2019_v18 = vpop.f32.mrb[6].mxu0  ;;  %v3429_v20 = vadd.f32 %v3420_v50, %v2017_v12 }
 0x4be   : > { %v3200_v19 = vmul.f32 -1.442695, %v3427_v8  ;;  %v3431_v23 = vadd.f32 %v3418_v45, %v2019_v18  ;;  %v2021_v47 = vpop.f32.mrb[7].mxu0 }
 0x4bf   : > { %v3433_v24 = vadd.f32 %v3420_v50, %v2021_v47  ;;  %v3204_v26 = vmul.f32 -1.442695, %v3429_v20 }
 0x4c0   : > { %3785 = vpow2.f32 %v3200_v19  ;;  %v3201_v3 = vmul.f32 -1.442695, %v3431_v23 }
 0x4c1   : > { %3787 = vpow2.f32 %v3203_v13  ;;  %v3205_v27 = vmul.f32 -1.442695, %v3433_v24 }
 0x4c2   : > { %v3780_v25 = vpop.eup %3779  ;;  %3789 = vpow2.f32 %v3201_v3 }
 0x4c3   : > { %v2089_v28 = vadd.f32 1.0, %v3780_v25 }
 0x4c4   : > { %v3782_v29 = vpop.eup %3781 }
 0x4c5   : > { %3791 = vrcp.f32 %v2089_v28  ;;  %v2090_v30 = vadd.f32 1.0, %v3782_v29  ;;  %v3784_v32 = vpop.eup %3783 }
 0x4c6   : > { %3793 = vpow2.f32 %v3204_v26  ;;  %v2117_v22 = vadd.f32 1.0, %v3784_v32 }
 0x4c7   : > { %3795 = vrcp.f32 %v2090_v30 }
 0x4c8   : > { %3797 = vpow2.f32 %v3205_v27 }
 0x4ca   : > { %v3786_v59 = vpop.eup %3785 }
 0x4cb   : > { %v3788_v60 = vpop.eup %3787  ;;  %v2091_v35 = vadd.f32 1.0, %v3786_v59 }
 0x4cc   : > { %v3790_v14 = vpop.eup %3789  ;;  %v2118_v38 = vadd.f32 1.0, %v3788_v60 }
 0x4cd   : > { %3799 = vrcp.f32 %v2091_v35  ;;  %v2092_v31 = vadd.f32 1.0, %v3790_v14 }
 0x4cf   : > { %v3792_v37 = vpop.eup %3791  ;;  %3801 = vrcp.f32 %v2092_v31 }
 0x4d0   : > { %v3794_v44 = vpop.eup %3793  ;;  %3803 = vrcp.f32 %v2117_v22  ;;  %v2129_v40 = vmul.f32 %v3792_v37, %v2059_v41 }
 0x4d1   : > { %v3796_v45 = vpop.eup %3795  ;;  %3805 = vrcp.f32 %v2118_v38  ;;  %v2119_v53 = vadd.f32 1.0, %v3794_v44 }
 0x4d2   : > { %v2133_v50 = vadd.f32 %v2129_v40, %v1778_v34  ;;  %v2130_v49 = vmul.f32 %v3796_v45, %v2062_v39  ;;  %v3798_v21 = vpop.eup %3797 }
 0x4d3   : > { %v2120_v52 = vadd.f32 1.0, %v3798_v21 }
 0x4d4   : > { %3807 = vtanh.f32 %v2133_v50  ;;  %v2134_v55 = vadd.f32 %v2130_v49, %v1781_v46 }
 0x4d6   : > { %3809 = vtanh.f32 %v2134_v55 }
 0x4d7   : > { %v3800_v61 = vpop.eup %3799  ;;  %3811 = vrcp.f32 %v2119_v53 }
 0x4d8   : > { %v2131_v54 = vmul.f32 %v3800_v61, %v2067_v58  ;;  %3813 = vrcp.f32 %v2120_v52 }
 0x4d9   : > { %v3802_v5 = vpop.eup %3801 }
 0x4da   : > { %v3804_v16 = vpop.eup %3803  ;;  %v2135_v11 = vadd.f32 %v2131_v54, %v1786_v36  ;;  %v2132_v4 = vmul.f32 %v3802_v5, %v2070_v56 }
 0x4db   : > { %v3806_v0 = vpop.eup %3805  ;;  %v2141_v12 = vsub.f32 1.0, %v3804_v16  ;;  %v2149_v43 = vmul.f32 %v4983_v62, %v3804_v16 }
 0x4dc   : > { %3815 = vtanh.f32 %v2135_v11  ;;  %v2136_v8 = vadd.f32 %v2132_v4, %v1789_v10  ;;  %v2142_v13 = vsub.f32 1.0, %v3806_v0  ;;  %v2150_v57 = vmul.f32 %v4985_v1, %v3806_v0 }
 0x4dd   : > { %v5067_v4 = vand.u32 (!%p5034_p2), 127, %v798_v63 }
 0x4de   : > { %v3808_v51 = vpop.eup %3807  ;;  %3817 = vtanh.f32 %v2136_v8 }
 0x4df   : > { %v2145_v18 = vmul.f32 %v3808_v51, %v2141_v12  ;;  %v5070_v0 = vadd.s32 (!%p5034_p2), 128, %v5067_v4  ;;  %v5073_v12 = vadd.s32 (!%p5034_p2), 256, %v5067_v4 }
 0x4e0   : > { %v3810_v19 = vpop.eup %3809 }
 0x4e1   : > { %v2146_v20 = vmul.f32 %v3810_v19, %v2142_v13  ;;  %v2153_v23 = vadd.f32 %v2149_v43, %v2145_v18  ;;  %v3812_v47 = vpop.eup %3811 }
 0x4e2   : > { %v3814_v42 = vpop.eup %3813  ;;  %v2143_v25 = vsub.f32 1.0, %v3812_v47  ;;  %v2151_v62 = vmul.f32 %v4992_v2, %v3812_v47 }
 0x4e3   : > { %v2154_v3 = vadd.f32 %v2150_v57, %v2146_v20  ;;  %2450 = vst [vmem:[#allocation2] sm:$0xff] %v2153_v23  ;;  %v2144_v28 = vsub.f32 1.0, %v3814_v42  ;;  %v2152_v27 = vmul.f32 %v4990_v48, %v3814_v42 }
 0x4e5   : > { %v2157_v24 = vpack.c.bf16 %v2154_v3, %v2153_v23  ;;  %2451 = vst [vmem:[#allocation2 + $0x8] sm:$0xff] %v2154_v3 }
 0x4e6   : > { %v3816_v26 = vpop.eup %3815 }
 0x4e7   : > { %2369 = vmatmul.mubr.bf16.vlgmr.msra.gmra.mrb[12].mxu1 %v2157_v24  ;;  %3394 = vmatprep.mubr.bf16.mxu0 %v2157_v24  ;;  %v2147_v29 = vmul.f32 %v3816_v26, %v2143_v25 }
 0x4e8   : > { %v3818_v30 = vpop.eup %3817  ;;  %2378 = vmatprep.mubr.bf16.mxu1 %v4223_v9  ;;  %v2191_v9 = vld [vmem:[%s5307_s30] sm:$0x7] }
 0x4e9   : > { %v2148_v1 = vmul.f32 %v3818_v30, %v2144_v28  ;;  %v2155_v33 = vadd.f32 %v2151_v62, %v2147_v29  ;;  %v2196_v48 = vrot.slane %v2191_v9, %v4776_v7  ;;  %v2200_v2 = vrot.slane %v2191_v9, %v4773_v6 }
 0x4ea   : > { %v2204_v7 = vrot.slane %v2191_v9, %v4785_v17 }
 0x4eb   : > { %v2156_v32 = vadd.f32 %v2152_v27, %v2148_v1  ;;  %2452 = vst [vmem:[#allocation2 + $0x10] sm:$0xff] %v2155_v33 }
 0x4ed   : > { %v2158_v59 = vpack.c.bf16 %v2156_v32, %v2155_v33  ;;  %2453 = vst [vmem:[#allocation2 + $0x18] sm:$0xff] %v2156_v32 }
 0x4ef   : > { %2379 = vmatmul.mubr.bf16.gmra.mrb[16].mxu1 %v2158_v59  ;;  %3395 = vmatmul.mubr.bf16.vlgmr.msra.gmra.mrb[8].mxu0 %v2158_v59 }
 0x5ba   : > { %v2370_v60 = vpop.f32.mrb[12].mxu1 }
 0x5bb   : > { %v2371_v35 = vadd.f32 %v2370_v60, %v2196_v48  ;;  %v2372_v14 = vpop.f32.mrb[13].mxu1 }
 0x5bc   : > { %v2373_v15 = vadd.f32 %v2372_v14, %v2200_v2  ;;  %v2374_v22 = vpop.f32.mrb[14].mxu1 }
 0x5bd   : > { %2438 = vst [vmem:[%s4740_s27] sm:$0xff] %v2371_v35  ;;  %v5044_v41 = vadd.f32 %v2374_v22, %v2196_v48  ;;  %v2376_v31 = vpop.f32.mrb[15].mxu1  ;;  %v3823_v22 = vld [vmem:[#allocation13 + $0x40] sm:$0xff] (!%p5034_p2)  }
 0x5be   : > { %2439 = vst [vmem:[%s4740_s27 + $0x8] sm:$0xff] %v2373_v15  ;;  %v5047_v38 = vadd.f32 %v2376_v31, %v2200_v2  ;;  %v2468_v61 = vmax.f32 (!%p5034_p2), %v2371_v35, %v2373_v15  ;;  %v3825_v31 = vld [vmem:[#allocation13 + $0x80] sm:$0xff] (!%p5034_p2)   ;;  %3320 = vmatprep.subr.bf16.mxu0 (!%p5034_p2), %v3823_v22 }
 0x5bf   : > { %2441 = vst [vmem:[%s4740_s27 + $0x18] sm:$0xff] %v5044_v41  ;;  %3398 = vmatprep.subr.bf16.mxu1 (!%p5034_p2), %v3825_v31 }
 0x5c0   : > { %2442 = vst [vmem:[%s4740_s27 + $0x20] sm:$0xff] %v5047_v38  ;;  %v2472_v54 = vmax.f32 (!%p5034_p2), %v5044_v41, %v5047_v38  ;;  %3399 = vmatpush3.bf16.msra.mxu1 (!%p5034_p2), %v3825_v31 }
 0x5c2   : > { %v2380_v6 = vpop.f32.mrb[16].mxu1  ;;  %v3396_v37 = vpop.f32.mrb[8].mxu0  ;;  %2463 = sbr.rel (%p5034_p2) target bundleno = 2159 (0x86f), region = 108 }
 0x5c3   : > { %v2381_v44 = vadd.f32 %v2380_v6, %v2196_v48  ;;  %v2432_v34 = vadd.f32 %v3396_v37, %v2204_v7  ;;  %v2382_v40 = vpop.f32.mrb[17].mxu1  ;;  %v2423_v39 = vpop.f32.mrb[9].mxu0  ;;  %v3827_v6 = vld [vmem:[#allocation13 + $0x8] sm:$0xff] (!%p5034_p2)   ;;  %v3829_v37 = vld [vmem:[#allocation13 + $0x50] sm:$0xff] (!%p5034_p2)  }
 0x5c4   : > { %v2383_v45 = vadd.f32 %v2382_v40, %v2200_v2  ;;  %v2424_v46 = vadd.f32 %v2423_v39, %v2204_v7  ;;  %v2384_v50 = vpop.f32.mrb[18].mxu1  ;;  %v3397_v49 = vpop.f32.mrb[10].mxu0  ;;  %v3832_v40 = vld [vmem:[#allocation13 + $0x58] sm:$0xff] (!%p5034_p2)  }
 0x5c5   : > { %2444 = vst [vmem:[%s4740_s27 + $0x30] sm:$0xff] %v2381_v44  ;;  %2446 = vst [vmem:[%s4740_s27 + $0x40] sm:$0xff] %v2432_v34  ;;  %v2385_v17 = vadd.f32 %v2384_v50, %v2196_v48  ;;  %v2435_v21 = vadd.f32 %v3397_v49, %v2204_v7  ;;  %v2386_v53 = vpop.f32.mrb[19].mxu1  ;;  %v2426_v55 = vpop.f32.mrb[11].mxu0  ;;  %v3834_v39 = vld [vmem:[#allocation13 + $0x98] sm:$0xff] (!%p5034_p2)   ;;  %v3837_v50 = vld [vmem:[#allocation13 + $0xa0] sm:$0xff] (!%p5034_p2)  }
 0x5c6   : > { %2445 = vst [vmem:[%s4740_s27 + $0x38] sm:$0xff] %v2383_v45  ;;  %2440 = vst [vmem:[%s4740_s27 + $0x10] sm:$0xff] %v2424_v46  ;;  %v2387_v52 = vadd.f32 %v2386_v53, %v2200_v2  ;;  %v2427_v58 = vadd.f32 %v2426_v55, %v2204_v7  ;;  %v2476_v36 = vmax.f32 (!%p5034_p2), %v2381_v44, %v2383_v45  ;;  %v3828_v7 = vld [vmem:[#allocation13 + $0x88] sm:$0xff] (!%p5034_p2)   ;;  %v3836_v49 = vld [vmem:[#allocation13 + $0x20] sm:$0xff] (!%p5034_p2)  }
 0x5c7   : > { %2447 = vst [vmem:[%s4740_s27 + $0x48] sm:$0xff] %v2385_v17  ;;  %2449 = vst [vmem:[%s4740_s27 + $0x58] sm:$0xff] %v2435_v21  ;;  %v2469_v5 = vmax.f32 (!%p5034_p2), %v2468_v61, %v2424_v46  ;;  %3400 = vmatprep.subr.bf16.mxu1 (!%p5034_p2), %v3828_v7 }
 0x5c8   : > { %2448 = vst [vmem:[%s4740_s27 + $0x50] sm:$0xff] %v2387_v52  ;;  %2443 = vst [vmem:[%s4740_s27 + $0x28] sm:$0xff] %v2427_v58  ;;  %v2480_v56 = vmax.f32 (!%p5034_p2), %v2385_v17, %v2387_v52  ;;  %v2477_v16 = vmax.f32 (!%p5034_p2), %v2476_v36, %v2432_v34  ;;  %v2473_v10 = vmax.f32 (!%p5034_p2), %v2472_v54, %v2427_v58  ;;  %3401 = vmatpush3.bf16.msra.mxu1 (!%p5034_p2), %v3828_v7 }
 0x5c9   : > { %2470 = vmax.xlane.f32.xlu0 %v2469_v5 }
 0x5ca   : > { %2478 = vmax.xlane.f32.xlu1 %v2477_v16  ;;  %v2481_v11 = vmax.f32 %v2480_v56, %v2435_v21 }
 0x5cd   : > { %2474 = vmax.xlane.f32.xlu0 %v2473_v10 }
 0x5ce   : > { %2482 = vmax.xlane.f32.xlu1 %v2481_v11 }
 0x656   : > { %v2471_v8 = vpop.xlane.xlu0 %2470 }
 0x657   : > { %v2479_v51 = vpop.xlane.xlu1 %2478  ;;  %vm2484_vm9 = vcmp.eq.f32.partialorder %v2371_v35, %v2471_v8  ;;  %vm2485_vm10 = vcmp.eq.f32.partialorder %v2373_v15, %v2471_v8  ;;  %vm2486_vm11 = vcmp.eq.f32.partialorder %v2424_v46, %v2471_v8  ;;  %v3835_v46 = vld [vmem:[#allocation13 + $0x60] sm:$0xff]  }
 0x658   : > { %vm2490_vm12 = vcmp.eq.f32.partialorder %v2381_v44, %v2479_v51  ;;  %v2496_v13 = vsel %vm2484_vm9, %v5067_v4, 384  ;;  %v2497_v18 = vsel %vm2485_vm10, %v5070_v0, 384  ;;  %vm2491_vm13 = vcmp.eq.f32.partialorder %v2383_v45, %v2479_v51  ;;  %v3831_v44 = vld [vmem:[#allocation13 + $0x90] sm:$0xff]   ;;  %v3833_v45 = vld [vmem:[#allocation13 + $0x18] sm:$0xff]  }
 0x659   : > { %vm2508_vm14 = vcmp.lt.s32.totalorder %v2496_v13, %v2497_v18  ;;  %vm2492_vm15 = vcmp.eq.f32.partialorder %v2432_v34, %v2479_v51  ;;  %v2502_v63 = vsel %vm2490_vm12, %v5067_v4, 384  ;;  %v2503_v43 = vsel %vm2491_vm13, %v5070_v0, 384  ;;  %v3830_v34 = vld [vmem:[#allocation13 + $0x10] sm:$0xff]   ;;  %3402 = vmatprep.subr.bf16.mxu1 %v3831_v44 }
 0x65a   : > { %v2498_v19 = vsel %vm2486_vm11, %v5073_v12, 384  ;;  %v2504_v20 = vsel %vm2492_vm15, %v5073_v12, 384  ;;  %vm2544_vm0 = vcmp.lt.s32.totalorder %v2502_v63, %v2503_v43  ;;  %v2475_v57 = vpop.xlane.xlu0 %2474  ;;  %v2509_v47 = vsel %vm2508_vm14, %v2496_v13, %v2497_v18  ;;  %3403 = vmatpush3.bf16.msra.mxu1 %v3831_v44  ;;  %v3839_v18 = vld [vmem:[#allocation13 + $0x28] sm:$0xff]  }
 0x65b   : > { %v2483_v23 = vpop.xlane.xlu1 %2482  ;;  %vm2487_vm1 = vcmp.eq.f32.partialorder %v5044_v41, %v2475_v57  ;;  %vm2488_vm2 = vcmp.eq.f32.partialorder %v5047_v38, %v2475_v57  ;;  %vm2489_vm3 = vcmp.eq.f32.partialorder %v2427_v58, %v2475_v57  ;;  %vm2510_vm9 = vcmp.lt.s32.totalorder %v2509_v47, %v2498_v19  ;;  %v3824_v41 = vld [vmem:[#allocation13] sm:$0xff]   ;;  %v3826_v38 = vld [vmem:[#allocation13 + $0x48] sm:$0xff]   ;;  %3404 = vmatprep.subr.bf16.mxu1 %v3834_v39  ;;  %v3844_v57 = vld [vmem:[#allocation13 + $0x78] sm:$0xff]  }
 0x65c   : > { %vm2493_vm4 = vcmp.eq.f32.partialorder %v2385_v17, %v2483_v23  ;;  %v2499_v3 = vsel %vm2487_vm1, %v5067_v4, 384  ;;  %v2500_v42 = vsel %vm2488_vm2, %v5070_v0, 384  ;;  %v2501_v24 = vsel %vm2489_vm3, %v5073_v12, 384  ;;  %3321 = vmatpush3.bf16.msra.mxu0 %v3824_v41  ;;  %v3838_v17 = vld [vmem:[#allocation13 + $0x68] sm:$0xff]  }
 0x65d   : > { %vm2494_vm5 = vcmp.eq.f32.partialorder %v2387_v52, %v2483_v23  ;;  %vm2526_vm6 = vcmp.lt.s32.totalorder %v2499_v3, %v2500_v42  ;;  %vm2495_vm7 = vcmp.eq.f32.partialorder %v2435_v21, %v2483_v23  ;;  %v2505_v25 = vsel %vm2493_vm4, %v5067_v4, 384  ;;  %3322 = vmatprep.subr.bf16.mxu0 %v3826_v38  ;;  %v3845_v23 = vld [vmem:[#allocation13 + $0x38] sm:$0xff]  }
 0x65e   : > { %v2506_v26 = vsel %vm2494_vm5, %v5070_v0, 384  ;;  %v2507_v28 = vsel %vm2495_vm7, %v5073_v12, 384  ;;  %v2527_v29 = vsel %vm2526_vm6, %v2499_v3, %v2500_v42  ;;  %v2511_v62 = vsel %vm2510_vm9, %v2509_v47, %v2498_v19  ;;  %3405 = vmatpush3.bf16.msra.mxu1 %v3834_v39  ;;  %v3842_v19 = vld [vmem:[#allocation13 + $0x30] sm:$0xff]   ;;  %v3846_v47 = vld [vmem:[#allocation13 + $0xb8] sm:$0xff]  }
 0x65f   : > { %vm2562_vm8 = vcmp.lt.s32.totalorder %v2505_v25, %v2506_v26  ;;  %vm2528_vm10 = vcmp.lt.s32.totalorder %v2527_v29, %v2501_v24  ;;  %v2545_v30 = vsel %vm2544_vm0, %v2502_v63, %v2503_v43  ;;  %v2513_v27 = vshra.s32 %v2511_v62, 16  ;;  %3406 = vmatprep.subr.bf16.mxu1 %v3837_v50  ;;  %v3840_v63 = vld [vmem:[#allocation13 + $0xa8] sm:$0xff]   ;;  %v3841_v43 = vld [vmem:[#allocation13 + $0x70] sm:$0xff]  }
 0x660   : > { %v2563_v1 = vsel %vm2562_vm8, %v2505_v25, %v2506_v26  ;;  %v2529_v33 = vsel %vm2528_vm10, %v2527_v29, %v2501_v24  ;;  %vm2546_vm11 = vcmp.lt.s32.totalorder %v2545_v30, %v2504_v20  ;;  %3323 = vmatpush3.bf16.msra.mxu0 %v3827_v6  ;;  %v2512_v21 = vand.u32 65535, %v2511_v62 }
 0x661   : > { %vm2564_vm12 = vcmp.lt.s32.totalorder %v2563_v1, %v2507_v28  ;;  %v2531_v32 = vshra.s32 %v2529_v33, 16  ;;  %v5090_v59 = vsel %vm2546_vm11, %v2545_v30, %v2504_v20  ;;  %v2515_v48 = vcvt.s32.f32 %v2513_v27  ;;  %3324 = vmatprep.subr.bf16.mxu0 %v3829_v37  ;;  %v3843_v20 = vld [vmem:[#allocation13 + $0xb0] sm:$0xff]  }
 0x662   : > { %v5092_v9 = vsel %vm2564_vm12, %v2563_v1, %v2507_v28  ;;  %v2549_v2 = vshra.s32 %v5090_v59, 16  ;;  %3407 = vmatpush3.bf16.msra.mxu1 %v3837_v50  ;;  %v2530_v53 = vand.u32 65535, %v2529_v33  ;;  %v2514_v52 = vcvt.s32.f32 %v2512_v21 }
 0x663   : > { %v2567_v60 = vshra.s32 %v5092_v9, 16  ;;  %v2533_v35 = vcvt.s32.f32 %v2531_v32  ;;  %2516 = vmin.xlane.f32.xlu0 %v2515_v48  ;;  %v2548_v58 = vand.u32 65535, %v5090_v59  ;;  %v2566_v54 = vand.u32 65535, %v5092_v9  ;;  %3408 = vmatprep.subr.bf16.mxu1 %v3840_v63 }
 0x664   : > { %v2551_v14 = vcvt.s32.f32 %v2549_v2  ;;  %3325 = vmatpush3.bf16.msra.mxu0 %v3830_v34  ;;  %v2532_v36 = vcvt.s32.f32 %v2530_v53 }
 0x665   : > { %2534 = vmin.xlane.f32.xlu1 %v2533_v35  ;;  %v5096_v15 = vcvt.s32.f32 %v2567_v60  ;;  %3326 = vmatprep.subr.bf16.mxu0 %v3832_v40  ;;  %v2550_v10 = vcvt.s32.f32 %v2548_v58  ;;  %v2568_v8 = vcvt.s32.f32 %v2566_v54 }
 0x666   : > { %3409 = vmatpush3.bf16.msra.mxu1 %v3840_v63 }
 0x667   : > { %2552 = vmin.xlane.f32.xlu0 %v2551_v14  ;;  %3410 = vmatprep.subr.bf16.mxu1 %v3843_v20 }
 0x668   : > { %3327 = vmatpush3.bf16.msra.mxu0 %v3833_v45 }
 0x669   : > { %2570 = vmin.xlane.f32.xlu1 %v5096_v15  ;;  %3328 = vmatprep.subr.bf16.mxu0 %v3835_v46 }
 0x66a   : > { %3411 = vmatpush3.bf16.msra.mxu1 %v3843_v20 }
 0x66b   : > { %3412 = vmatprep.subr.bf16.mxu1 %v3846_v47 }
 0x66c   : > { %3329 = vmatpush3.bf16.msra.mxu0 %v3836_v49 }
 0x66d   : > { %3330 = vmatprep.subr.bf16.mxu0 %v3838_v17 }
 0x66e   : > { %3413 = vmatpush3.bf16.msra.mxu1 %v3846_v47 }
 0x670   : > { %3331 = vmatpush3.bf16.msra.mxu0 %v3839_v18 }
 0x671   : > { %3332 = vmatprep.subr.bf16.mxu0 %v3841_v43 }
 0x674   : > { %3333 = vmatpush3.bf16.msra.mxu0 %v3842_v19 }
 0x675   : > { %3334 = vmatprep.subr.bf16.mxu0 %v3844_v57 }
 0x678   : > { %3335 = vmatpush3.bf16.msra.mxu0 %v3845_v23 }
 0x6f0   : > { %v2517_v55 = vpop.xlane.xlu0 %2516 }
 0x6f1   : > { %vm2518_vm13 = vcmp.eq.f32.partialorder %v2515_v48, %v2517_v55  ;;  %v2523_v3 = vcvt.f32.s32 %v2517_v55 }
 0x6f2   : > { %v2535_v61 = vpop.xlane.xlu1 %2534  ;;  %v2519_v56 = vsel %vm2518_vm13, %v2514_v52, inf }
 0x6f3   : > { %vm2536_vm14 = vcmp.eq.f32.partialorder %v2533_v35, %v2535_v61  ;;  %2520 = vmin.xlane.f32.xlu0 %v2519_v56  ;;  %v2541_v42 = vcvt.f32.s32 %v2535_v61  ;;  %v2524_v26 = vshll.u32 %v2523_v3, 16 }
 0x6f4   : > { %v2537_v5 = vsel %vm2536_vm14, %v2532_v36, inf  ;;  %v2553_v16 = vpop.xlane.xlu0 %2552 }
 0x6f5   : > { %2538 = vmin.xlane.f32.xlu1 %v2537_v5  ;;  %vm2554_vm15 = vcmp.eq.f32.partialorder %v2551_v14, %v2553_v16  ;;  %v2559_v24 = vcvt.f32.s32 %v2553_v16  ;;  %v2542_v30 = vshll.u32 %v2541_v42, 16 }
 0x6f6   : > { %v2571_v11 = vpop.xlane.xlu1 %2570  ;;  %v2555_v51 = vsel %vm2554_vm15, %v2550_v10, inf }
 0x6f7   : > { %vm2572_vm0 = vcmp.eq.f32.partialorder %v5096_v15, %v2571_v11  ;;  %2556 = vmin.xlane.f32.xlu0 %v2555_v51  ;;  %v2577_v28 = vcvt.f32.s32 %v2571_v11  ;;  %v2560_v33 = vshll.u32 %v2559_v24, 16  ;;  %v4224_v15 = vmov 1.0|1.0  }
 0x6f8   : > { %v2573_v13 = vsel %vm2572_vm0, %v2568_v8, inf }
 0x6f9   : > { %2574 = vmin.xlane.f32.xlu1 %v2573_v13  ;;  %v2578_v9 = vshll.u32 %v2577_v28, 16 }
 0x780   : > { %v2521_v25 = vpop.xlane.xlu0 %2520 }
 0x781   : > { %v2522_v29 = vcvt.f32.s32 %v2521_v25 }
 0x782   : > { %v2539_v62 = vpop.xlane.xlu1 %2538 }
 0x783   : > { %v2540_v1 = vcvt.f32.s32 %v2539_v62  ;;  %v2525_v27 = vadd.s32 %v2524_v26, %v2522_v29 }
 0x784   : > { %v2557_v59 = vpop.xlane.xlu0 %2556 }
 0x785   : > { %v2543_v32 = vadd.s32 %v2542_v30, %v2540_v1  ;;  %v2558_v48 = vcvt.f32.s32 %v2557_v59  ;;  %vm2581_vm1 = vcmp.eq.s32.totalorder %v5070_v0, %v2525_v27  ;;  %vm2582_vm6 = vcmp.eq.s32.totalorder %v5073_v12, %v2525_v27 }
 0x786   : > { %v2575_v2 = vpop.xlane.xlu1 %2574  ;;  %vm2580_vm8 = vcmp.eq.s32.totalorder %v5067_v4, %v2525_v27 }
 0x787   : > { %v2576_v60 = vcvt.f32.s32 %v2575_v2  ;;  %vm2584_vm2 = vcmp.eq.s32.totalorder %v5070_v0, %v2543_v32  ;;  %vm2585_vm3 = vcmp.eq.s32.totalorder %v5073_v12, %v2543_v32  ;;  %vm2583_vm4 = vcmp.eq.s32.totalorder %v5067_v4, %v2543_v32 }
 0x788   : > { %v2561_v35 = vadd.s32 %v2560_v33, %v2558_v48  ;;  %vm3254_vm5 = vmpackc.low %vm2584_vm2, %vm2581_vm1 }
 0x789   : > { %v2579_v14 = vadd.s32 %v2578_v9, %v2576_v60  ;;  %3255 = vmatprep.mubr.msk.bf16.mxu0 %vm3254_vm5, %v4224_v15  ;;  %vm3262_vm7 = vmpackc.low %vm2585_vm3, %vm2582_vm6 }
 0x78a   : > { %3414 = vmatprep.mubr.msk.bf16.mxu1 %vm3262_vm7, %v4224_v15  ;;  %vm3256_vm9 = vmpackc.low %vm2583_vm4, %vm2580_vm8  ;;  %vm2587_vm10 = vcmp.eq.s32.totalorder %v5070_v0, %v2561_v35  ;;  %vm2588_vm14 = vcmp.eq.s32.totalorder %v5073_v12, %v2561_v35  ;;  %vm2586_vm1 = vcmp.eq.s32.totalorder %v5067_v4, %v2561_v35 }
 0x78b   : > { %3257 = vmatmul.mubr.msk.bf16.vlgmr.msra.gmra.mrb[0].mxu0 %vm3256_vm9, %v4224_v15  ;;  %vm2590_vm11 = vcmp.eq.s32.totalorder %v5070_v0, %v2579_v14  ;;  %vm2591_vm12 = vcmp.eq.s32.totalorder %v5073_v12, %v2579_v14  ;;  %vm2589_vm0 = vcmp.eq.s32.totalorder %v5067_v4, %v2579_v14 }
 0x78c   : > { %vm3258_vm13 = vmpackc.low %vm2590_vm11, %vm2587_vm10 }
 0x78d   : > { %3259 = vmatprep.mubr.msk.bf16.mxu0 %vm3258_vm13, %v4224_v15  ;;  %vm3264_vm15 = vmpackc.low %vm2591_vm12, %vm2588_vm14 }
 0x78e   : > { %3415 = vmatmul.mubr.msk.bf16.vlgmr.msra.gmra.mrb[0].mxu1 %vm3264_vm15, %v4224_v15  ;;  %vm3260_vm2 = vmpackc.low %vm2589_vm0, %vm2586_vm1 }
 0x793   : > { %3261 = vmatmul.mubr.msk.bf16.gmra.mrb[4].mxu0 %vm3260_vm2, %v4224_v15 }
 0x85e   : > { %v3336_v22 = vpop.f32.mrb[0].mxu0 }
 0x85f   : > { %v3337_v41 = vpop.f32.mrb[1].mxu0 }
 0x860   : > { %v3338_v31 = vadd.f32 %v3337_v41, %v3336_v22  ;;  %v3339_v38 = vpop.f32.mrb[2].mxu0 }
 0x861   : > { %v3340_v7 = vpop.f32.mrb[3].mxu0  ;;  %v3416_v0 = vpop.f32.mrb[0].mxu1 }
 0x862   : > { %v3341_v6 = vadd.f32 %v3340_v7, %v3339_v38  ;;  %v2885_v37 = vpop.f32.mrb[1].mxu1 }
 0x863   : > { %v2886_v44 = vadd.f32 %v3338_v31, %v2885_v37  ;;  %v3417_v34 = vpop.f32.mrb[2].mxu1 }
 0x864   : > { %v2888_v12 = vpop.f32.mrb[3].mxu1 }
 0x865   : > { %2900 = vst [vmem:[#allocation3] sm:$0xff] %v2886_v44  ;;  %v2889_v40 = vadd.f32 %v3341_v6, %v2888_v12 }
 0x866   : > { %v3342_v39 = vpop.f32.mrb[4].mxu0 }
 0x867   : > { %2901 = vst [vmem:[#allocation3 + $0x8] sm:$0xff] %v2889_v40  ;;  %v3343_v45 = vpop.f32.mrb[5].mxu0 }
 0x868   : > { %v3344_v46 = vadd.f32 %v3343_v45, %v3342_v39  ;;  %v3345_v4 = vpop.f32.mrb[6].mxu0 }
 0x869   : > { %v3346_v50 = vpop.f32.mrb[7].mxu0 }
 0x86a   : > { %v2894_v49 = vadd.f32 %v3416_v0, %v3344_v46  ;;  %v3347_v17 = vadd.f32 %v3346_v50, %v3345_v4 }
 0x86c   : > { %2902 = vst [vmem:[#allocation3 + $0x10] sm:$0xff] %v2894_v49  ;;  %v2897_v21 = vadd.f32 %v3417_v34, %v3347_v17 }
 0x86e   : > { %2903 = vst [vmem:[#allocation3 + $0x18] sm:$0xff] %v2897_v21 }
 0x86f PF: > { %s5308_s12 = sld [smem:[#allocation32_spill]]  ;;  %s5309_s5 = sld [smem:[#allocation31_spill]] }
 0x870   : > { %s5311_s8 = sld [smem:[#allocation34_spill]]  ;;  %s2921_s22 = sshll.u32 %s4740_s27, 4  ;;  %s5117_s22 = int_to_ptr.vmem [resolvable:$true] %s2921_s22 }
 0x871   : > { %s5312_s15 = sld [smem:[#allocation51_spill]]  ;;  %s5126_s2 = scalar_lea.sflag [#allocation10], %s648_s23 }
 0x872   : > { %s4043_s19 = scalar_lea.vmem %s5117_s22, 1536  ;;  %s4225_s27 = smov [#allocation19]  }
 0x873   : > { %p4044_p0 = scmp.ne.s32.totalorder %s5117_s22, %s4043_s19  ;;  %s4047_s30 = sshll.u32 %s4225_s27, 4  ;;  %s4048_s30 = int_to_ptr.vmem [resolvable:$false] %s4047_s30 }
 0x874   : > { %p4050_p3 = scmp.lt.s32.totalorder %s5117_s22, %s4048_s30 }
 0x875   : > { %s3443_s9 = smul.u32 12, %s5308_s12  ;;  %s4049_s12 = scalar_lea.vmem %s4048_s30, 3072 }
 0x876   : > { %s3444_s3 = smul.u32 24, %s5309_s5  ;;  %p5313_p8 = scmp.ne.s32.totalorder %s5311_s8, 0 }
 0x877   : > { %p4051_p5 = scmp.lt.s32.totalorder %s4049_s12, %s4043_s19 }
 0x878   : > { %s2918_s0 = sadd.s32 %s3444_s3, %s3443_s9  ;;  %p4045_p11 = pnand %p4044_p0, %p5313_p8 }
 0x879   : > { %s3268_s11 = sshll.u32 %s2918_s0, 7  ;;  %p4052_p1 = por %p4051_p5, %p4050_p3 }
 0x87a   : > { %s5122_s29 = scalar_lea.hbm %s5312_s15, %s3268_s11  ;;  %p4046_p13 = pneg %p4045_p11 }
 0x87c   : > { %p4053_p7 = pnand %p4052_p1, %p4046_p13 }
 0x87e   : > { %4056 = shalt.err (!%p4053_p7)
}
 0x87f   : > { %s4057_s23 = scalar_lea.hbm %s5122_s29, 1536  ;;  %s4061_s9 = scalar_lea.hbm %s5312_s15, 21504 }
 0x880   : > { %p4058_p6 = scmp.ne.s32.totalorder %s5122_s29, %s4057_s23  ;;  %p4062_p4 = scmp.lt.u32.totalorder %s5122_s29, %s5312_s15 }
 0x881   : > { %p4063_p10 = scmp.lt.u32.totalorder %s4061_s9, %s4057_s23  ;;  %p4065_p0 = scmp.lt.u32.totalorder %s4057_s23, %s5122_s29 }
 0x882   : > { %p4059_p9 = pnand %p4058_p6, %p5313_p8 }
 0x883   : > { %p4064_p2 = por %p4063_p10, %p4062_p4 }
 0x884   : > { %p4060_p12 = pneg %p4059_p9 }
 0x885   : > { %p4066_p11 = por %p4065_p0, %p4064_p2 }
 0x887   : > { %p4067_p13 = pnand %p4066_p11, %p4060_p12 }
 0x889   : > { %4070 = shalt.err (!%p4067_p13)
}
 0x88a   : > { %s4226_s11 = smov 384   ;;  %s4227_s14 = smov 24  }
 0x88b   : > { %3467 = dma.vmem_to_hbm [thread:$0]  (%p5313_p8), %s5117_s22, 1536, %s5122_s29, %s5126_s2, %s4226_s11, %s4226_s11, %s4227_s14  }
 0x88c PF: > { %s5314_s7 = sld [smem:[#allocation29_spill]]  ;;  %s5315_s19 = sld [smem:[#allocation35_spill]] }
 0x88d   : > { %p3504_p3 = scmp.ge.s32.totalorder %s4207_s26, 2 }
 0x892   : > { %s2936_s27 = sand.u32 1, %s5314_s7   ;;  %p5316_p5 = scmp.ne.s32.totalorder %s5315_s19, 0 }
 0x893   : > { %s2937_s30 = scalar_lea.sflag [#allocation10], %s2936_s27 }
 0x894   : > { %p3492_p1 = pnand %p3504_p3, %p5316_p5 }
 0x896   : > { %4150 = dma.done.wait (!%p3492_p1), %s2937_s30, 1536  }
 0x897   : > { %4152 = vsyncadd (!%p3492_p1), %s2937_s30, 4294965760  ;;  %s49_s26 = sadd.s32 1, %s4207_s26   ;;  %s5318_s9 = sld [smem:[#allocation30_spill]] }
 0x898   : > { %p5155_p7 = scmp.ge.s32.totalorder %s49_s26, 16   ;;  %s5319_s8 = sld [smem:[#allocation37_spill]] }
 0x899   : > { %s5321_s12 = smov %s4163_s13  ;;  %s5322_s13 = smov %s4572_s6 }
 0x89a   : > { %s5323_s0 = smov %s4171_s17  ;;  %s5324_s17 = smov %s4175_s18 }
 0x89b   : > { %s5325_s18 = smov %s4600_s10  ;;  %s5326_s19 = smov %s4183_s20 }
 0x89c   : > { %s5327_s20 = smov %s4187_s21  ;;  %s5328_s21 = smov %s4567_s16 }
 0x89d   : > { %s5329_s22 = smov %s4199_s24  ;;  %s5330_s23 = smov %s4203_s25 }
 0x89e   : > { %s5331_s24 = smov %s5334_s28  ;;  %s5332_s25 = smov %s5319_s8 }
 0x89f   :  { %48 = sbr.rel (!%p5155_p7) target bundleno = 50 (0x32), region = 164 }
 0x8a6   :  { %2942 = vsyncpa [#allocation9], 1 }
 0x8a7   :  { %2944 = vsyncpa [#allocation9 + $0x1], 1 }
 0x8a8   :  { %2945 = vsyncpa [#allocation12], 1 }
 0x8a9   :  { %2947 = vsyncpa [#allocation12 + $0x1], 1 }
 0x8aa   :  { %2948 = vsyncpa [#allocation15], 1 }
 0x8ab   :  { %2949 = vsyncpa [#allocation18], 1 }
 0x8ac   :  { %2950 = vsyncpa [#allocation10], 1 }
 0x8ad   :  { %2952 = vsyncpa [#allocation10 + $0x1], 1 }

// kernel: tpu_custom_call.1
= control target key start
LH: loop header
LB: loop body
LE: loop exit
PB: predicated region body
PF: predicated region fallthrough
CT: control target
= control target key end

     0   :  { %s5202_s0 = inlined_call_operand.vmem [shape: s32[7], index: 0, kind: input, shape index: {}]   ;;  %s5203_s2 = inlined_call_operand.hbm [shape: f32[7,64,128], index: 2, kind: input, shape index: {}]   ;;  %s5204_s3 = inlined_call_operand.vmem [shape: f32[64,128], index: 3, kind: input, shape index: {}]   ;;  %s5205_s4 = inlined_call_operand.hbm [shape: f32[64,8,128], index: 4, kind: input, shape index: {}]   ;;  %s5206_s5 = inlined_call_operand.vmem [shape: f32[64,8], index: 5, kind: input, shape index: {}]   ;;  %s5207_s6 = inlined_call_operand.hbm [shape: bf16[384,128], index: 6, kind: input, shape index: {}]   ;;  %s5208_s7 = inlined_call_operand.vmem [shape: f32[1,128], index: 7, kind: input, shape index: {}]   ;;  %s5209_s8 = inlined_call_operand.vmem [shape: f32[1,128], index: 8, kind: input, shape index: {}]   ;;  %s5210_s10 = inlined_call_operand.hbm [shape: bf16[256,384], index: 10, kind: input, shape index: {}]   ;;  %s5211_s11 = inlined_call_operand.hbm [shape: bf16[128,384], index: 11, kind: input, shape index: {}]   ;;  %s5212_s12 = inlined_call_operand.vmem [shape: f32[1,384], index: 12, kind: input, shape index: {}]   ;;  %s5213_s13 = inlined_call_operand.vmem [shape: f32[1,384], index: 13, kind: input, shape index: {}]   ;;  %s5214_s14 = inlined_call_operand.hbm [shape: bf16[128,384], index: 14, kind: input, shape index: {}]   ;;  %s5215_s15 = inlined_call_operand.vmem [shape: f32[1,384], index: 15, kind: input, shape index: {}]   ;;  %s5216_s16 = inlined_call_operand.hbm [shape: f32[7,64,384], index: 16, kind: output, shape index: {}]   ;;  %s5217_s1 = inlined_call_operand.vmem [shape: s32[7], index: 1, kind: input, shape index: {}]   ;;  %s5218_s9 = inlined_call_operand.<no memory space> [shape: f32[1,1], index: 9, kind: input, shape index: {}]  }
   0x1   :  { %5238 = sst [smem:[#allocation38_spill]] %s5202_s0  ;;  %s25_s26 = sshll.u32 %s5217_s1, 4  ;;  %v29_v0 = vstv %s5218_s9  ;;  %s26_s26 = int_to_ptr.vmem [resolvable:$true] %s25_s26 }
   0x2   :  { %5239 = sst [smem:[#allocation39_spill]] %s5203_s2  ;;  %s5252_s23 = sld [smem:[#allocation38_spill]]  ;;  %30 = vst [vmem:[#allocation7] sm:$0x1] %v29_v0 }
   0x3   :  { %5240 = sst [smem:[#allocation40_spill]] %s5204_s3 }
   0x4   :  { %5241 = sst [smem:[#allocation41_spill]] %s5206_s5 }
   0x5   :  { %5242 = sst [smem:[#allocation42_spill]] %s5207_s6 }
   0x6   :  { %5243 = sst [smem:[#allocation43_spill]] %s5208_s7 }
   0x7   :  { %5244 = sst [smem:[#allocation44_spill]] %s5209_s8 }
   0x8   :  { %5245 = sst [smem:[#allocation45_spill]] %s5210_s10 }
   0x9   :  { %5246 = sst [smem:[#allocation46_spill]] %s5211_s11 }
   0xa   :  { %5247 = sst [smem:[#allocation47_spill]] %s5212_s12  ;;  %s21_s12 = sshll.u32 %s5252_s23, 4  ;;  %s22_s12 = int_to_ptr.vmem [resolvable:$true] %s21_s12 }
   0xb   :  { %5248 = sst [smem:[#allocation48_spill]] %s5213_s13  ;;  %s3847_s28 = scalar_lea.vmem %s22_s12, 16 }
   0xc   :  { %5249 = sst [smem:[#allocation49_spill]] %s5214_s14  ;;  %p3848_p0 = scmp.ne.s32.totalorder %s22_s12, %s3847_s28 }
   0xd   :  { %5250 = sst [smem:[#allocation50_spill]] %s5215_s15  ;;  %p3852_p1 = scmp.lt.s32.totalorder %s22_s12, %s22_s12 }
   0xe   :  { %5251 = sst [smem:[#allocation51_spill]] %s5216_s16  ;;  %p3853_p2 = scmp.lt.s32.totalorder %s3847_s28, %s3847_s28 }
  0x10   :  { %p3854_p3 = por %p3853_p2, %p3852_p1 }
  0x12   :  { %p3855_p4 = pnand %p3854_p3, %p3848_p0 }
  0x14   :  { %3858 = shalt.err (!%p3855_p4)  }
  0x15   :  { %s4209_s29 = smov [#allocation5]   ;;  %s3859_s30 = scalar_lea.vmem %s26_s26, 16 }
  0x16   :  { %24 = dma.vmem_to_smem %s22_s12, 16, %s4209_s29, [#allocation4] }
  0x17   :  { %p3860_p5 = scmp.ne.s32.totalorder %s26_s26, %s3859_s30  ;;  %p3864_p6 = scmp.lt.s32.totalorder %s26_s26, %s26_s26 }
  0x18   :  { %p3865_p7 = scmp.lt.s32.totalorder %s3859_s30, %s3859_s30 }
  0x1a   :  { %p3866_p8 = por %p3865_p7, %p3864_p6 }
  0x1c   :  { %p3867_p9 = pnand %p3866_p8, %p3860_p5 }
  0x1e   :  { %3870 = shalt.err (!%p3867_p9)  }
  0x1f   :  { %s4210_s1 = smov [#allocation6]  }
  0x20   :  { %28 = dma.vmem_to_smem %s26_s26, 16, %s4210_s1, [#allocation4] }
  0x21   :  { %4127 = dma.done.wait [#allocation4], 32 }
  0x22   :  { %4128 = vsyncadd [#allocation4], 4294967264 }
  0x23   :  { %32 = sfence }
  0x24   :  { %33 = vsyncpa [#allocation9], 0 }
  0x25   :  { %35 = vsyncpa [#allocation9 + $0x1], 0 }
  0x26   :  { %36 = vsyncpa [#allocation12], 0 }
  0x27   :  { %38 = vsyncpa [#allocation12 + $0x1], 0 }
  0x28   :  { %39 = vsyncpa [#allocation15], 0 }
  0x29   :  { %40 = vsyncpa [#allocation18], 0 }
  0x2a   :  { %41 = vsyncpa [#allocation10], 0 }
  0x2b   :  { %43 = vsyncpa [#allocation10 + $0x1], 0  ;;  %s4322_s9 = smov 0   ;;  %s4324_s12 = smov 0  }
  0x2c   :  { %s4326_s13 = smov 0   ;;  %s4328_s0 = smov 0  }
  0x2d   :  { %s4330_s17 = smov 0   ;;  %s4332_s18 = smov 0  }
  0x2e   :  { %s4334_s19 = smov 0   ;;  %s4336_s20 = smov 0  }
  0x2f   :  { %s4338_s21 = smov 0   ;;  %s4340_s22 = smov 0  }
  0x30   :  { %s4342_s23 = smov 0   ;;  %s4344_s24 = smov 0  }
  0x31   :  { %s4346_s25 = smov 0   ;;  %s4348_s26 = smov 0  }
  0x32 LB: > { %5253 = sst [smem:[#allocation29_spill]] %s4155_s9  ;;  %s4391_s27 = sadd.s32 4294967295, %s4207_s26   ;;  %s4207_s26 = sphi %s4348_s26, %s49_s26   ;;  %s4203_s25 = sphi %s4346_s25, %s5332_s25   ;;  %s4199_s24 = sphi %s4344_s24, %s5331_s24   ;;  %s4195_s23 = sphi %s4342_s23, %s5330_s23   ;;  %s4191_s22 = sphi %s4340_s22, %s5329_s22   ;;  %s4187_s21 = sphi %s4338_s21, %s5328_s21   ;;  %s4183_s20 = sphi %s4336_s20, %s5327_s20   ;;  %s4179_s19 = sphi %s4334_s19, %s5326_s19   ;;  %s4175_s18 = sphi %s4332_s18, %s5325_s18   ;;  %s4171_s17 = sphi %s4330_s17, %s5324_s17   ;;  %s4167_s0 = sphi %s4328_s0, %s5323_s0   ;;  %s4163_s13 = sphi %s4326_s13, %s5322_s13   ;;  %s4159_s12 = sphi %s4324_s12, %s5321_s12   ;;  %s4155_s9 = sphi %s4322_s9, %s5318_s9  }
  0x33   : > { %5254 = sst [smem:[#allocation30_spill]] %s4159_s12  ;;  %s3097_s28 = sadd.s32 4294967294, %s4207_s26  }
  0x34   : > { %5255 = sst [smem:[#allocation31_spill]] %s4191_s22  ;;  %p5225_p10 = scmp.eq.s32.totalorder %s4391_s27, 0 }
  0x35   : > { %5256 = sst [smem:[#allocation32_spill]] %s4195_s23  ;;  %p137_p11 = scmp.ne.s32.totalorder %s4171_s17, %s4167_s0 }
  0x36   : > { %p398_p12 = scmp.ne.s32.totalorder %s4163_s13, %s4159_s12  ;;  %p399_p0 = scmp.eq.s32.totalorder %s4391_s27, 13 }
  0x37   : > { %p4401_p13 = por %p137_p11, %p5225_p10  ;;  %p404_p1 = scmp.ne.s32.totalorder %s4159_s12, %s4155_s9 }
  0x38   : > { %p405_p2 = scmp.eq.s32.totalorder %s3097_s28, 13  ;;  %p4408_p3 = por %p399_p0, %p398_p12 }
  0x39   : > { %s5257_s30 = scalar_select %p4401_p13, 1, 0 }
  0x3a   : > { %s5259_s1 = scalar_select %p4408_p3, 1, 0 }
  0x3b   : > { %5258 = sst [smem:[#allocation33_spill]] %s5257_s30  ;;  %p3098_p4 = scmp.ge.s32.totalorder %s4207_s26, 1 }
  0x3c   : > { %5260 = sst [smem:[#allocation34_spill]] %s5259_s1  ;;  %p4413_p5 = por %p405_p2, %p404_p1 }
  0x3d   : > { %p412_p6 = scmp.lt.s32.totalorder %s4207_s26, 15  ;;  %s4211_s29 = smov [#allocation13]  }
  0x3e   : > { %s5261_s16 = scalar_select %p4413_p5, 1, 0 }
  0x3f   : > { %p4418_p7 = pnand %p3098_p4, %p412_p6  ;;  %s424_s15 = sshll.u32 %s4211_s29, 4  ;;  %s425_s15 = int_to_ptr.vmem [resolvable:$true] %s424_s15 }
  0x40   : > { %5262 = sst [smem:[#allocation35_spill]] %s5261_s16  ;;  %s4212_s9 = smov [#allocation14]  }
  0x41   : > { %s5263_s0 = scalar_select %p4418_p7, 1, 0 }
  0x42   : > { %p3469_p8 = pneg %p4418_p7  ;;  %s446_s1 = sshll.u32 %s4212_s9, 4  ;;  %s4430_s1 = int_to_ptr.vmem [resolvable:$true] %s446_s1 }
  0x43   : > { %5264 = sst [smem:[#allocation36_spill]] %s5263_s0  ;;  %s5266_s6 = sld [smem:[#allocation42_spill]] }
  0x44   : > { %p4426_p9 = pnand %p3469_p8, %p5225_p10 }
  0x46   : > { %p4440_p12 = pneg %p4426_p9 }
  0x49   : > { %s3871_s7 = scalar_lea.hbm %s5266_s6, 3072 }
  0x4a   : > { %p3872_p11 = scmp.ne.s32.totalorder %s5266_s6, %s3871_s7  ;;  %p3878_p2 = scmp.lt.u32.totalorder %s3871_s7, %s5266_s6 }
  0x4c   : > { %p3874_p0 = pnand %p4440_p12, %p3872_p11 }
  0x4e   : > { %p3875_p1 = pneg %p3874_p0 }
  0x50   : > { %p3880_p4 = pnand %p3878_p2, %p3875_p1 }
  0x52   : > { %3883 = shalt.err (!%p3880_p4)
}
  0x53   : > { %s3884_s8 = scalar_lea.vmem %s425_s15, 3072  ;;  %p3892_p5 = scmp.lt.s32.totalorder %s425_s15, %s425_s15 }
  0x54   : > { %p3885_p6 = scmp.ne.s32.totalorder %s425_s15, %s3884_s8  ;;  %p3893_p3 = scmp.lt.s32.totalorder %s3884_s8, %s3884_s8 }
  0x56   : > { %p3887_p8 = pnand %p3885_p6, %p4440_p12  ;;  %p3894_p13 = por %p3893_p3, %p3892_p5 }
  0x58   : > { %p3888_p10 = pneg %p3887_p8 }
  0x5a   : > { %p3895_p7 = pnand %p3894_p13, %p3888_p10 }
  0x5c   : > { %3898 = shalt.err (!%p3895_p7)
}
  0x5d   : > { %s4213_s5 = smov 64   ;;  %s4214_s16 = smov 4  }
  0x5e   : > { %3472 = dma.hbm_to_vmem [thread:$0]  (!%p4426_p9), %s5266_s6, 3072, %s425_s15, [#allocation12], %s4213_s5, %s4213_s5, %s4214_s16  }
  0x5f   : > { %s5268_s10 = sld [smem:[#allocation45_spill]] }
  0x65   : > { %s3899_s23 = scalar_lea.hbm %s5268_s10, 6144 }
  0x66   : > { %p3900_p11 = scmp.ne.s32.totalorder %s5268_s10, %s3899_s23  ;;  %p3906_p3 = scmp.lt.u32.totalorder %s3899_s23, %s5268_s10 }
  0x68   : > { %p3902_p10 = pnand %p3900_p11, %p4440_p12 }
  0x6a   : > { %p3903_p13 = pneg %p3902_p10 }
  0x6c   : > { %p3908_p5 = pnand %p3906_p3, %p3903_p13 }
  0x6e   : > { %3911 = shalt.err (!%p3908_p5)
}
  0x6f   : > { %s3912_s15 = scalar_lea.vmem %s4430_s1, 6144  ;;  %p3920_p2 = scmp.lt.s32.totalorder %s4430_s1, %s4430_s1 }
  0x70   : > { %p3913_p7 = scmp.ne.s32.totalorder %s4430_s1, %s3912_s15  ;;  %p3921_p4 = scmp.lt.s32.totalorder %s3912_s15, %s3912_s15 }
  0x72   : > { %p3915_p0 = pnand %p3913_p7, %p4440_p12  ;;  %p3922_p6 = por %p3921_p4, %p3920_p2 }
  0x74   : > { %p3916_p1 = pneg %p3915_p0 }
  0x76   : > { %p3923_p8 = pnand %p3922_p6, %p3916_p1 }
  0x78   : > { %3926 = shalt.err (!%p3923_p8)
}
  0x79   : > { %s4215_s12 = smov 192   ;;  %s4216_s23 = smov 12  }
  0x7a   : > { %3475 = dma.hbm_to_vmem [thread:$0]  (!%p4426_p9), %s5268_s10, 6144, %s4430_s1, [#allocation15], %s4215_s12, %s4215_s12, %s4216_s23  }
  0x7b   : > { %s4217_s5 = smov [#allocation16]   ;;  %s4218_s3 = smov [#allocation17]  }
  0x7c   : > { %s459_s16 = sshll.u32 %s4217_s5, 4  ;;  %s478_s7 = sshll.u32 %s4218_s3, 4  ;;  %s460_s16 = int_to_ptr.vmem [resolvable:$true] %s459_s16  ;;  %s4482_s7 = int_to_ptr.vmem [resolvable:$true] %s478_s7 }
  0x7d   : > { %s5269_s11 = sld [smem:[#allocation46_spill]] }
  0x83   : > { %s3927_s8 = scalar_lea.hbm %s5269_s11, 3072 }
  0x84   : > { %p3928_p11 = scmp.ne.s32.totalorder %s5269_s11, %s3927_s8  ;;  %p3934_p3 = scmp.lt.u32.totalorder %s3927_s8, %s5269_s11 }
  0x86   : > { %p3930_p10 = pnand %p3928_p11, %p4440_p12 }
  0x88   : > { %p3931_p13 = pneg %p3930_p10 }
  0x8a   : > { %p3936_p5 = pnand %p3934_p3, %p3931_p13 }
  0x8c   : > { %3939 = shalt.err (!%p3936_p5)
}
  0x8d   : > { %s3940_s0 = scalar_lea.vmem %s460_s16, 3072  ;;  %p3948_p2 = scmp.lt.s32.totalorder %s460_s16, %s460_s16 }
  0x8e   : > { %p3941_p7 = scmp.ne.s32.totalorder %s460_s16, %s3940_s0  ;;  %p3949_p4 = scmp.lt.s32.totalorder %s3940_s0, %s3940_s0 }
  0x90   : > { %p3943_p0 = pnand %p3941_p7, %p4440_p12  ;;  %p3950_p6 = por %p3949_p4, %p3948_p2 }
  0x92   : > { %p3944_p1 = pneg %p3943_p0 }
  0x94   : > { %p3951_p8 = pnand %p3950_p6, %p3944_p1 }
  0x96   : > { %3954 = shalt.err (!%p3951_p8)
}
  0x97   : > { %3478 = dma.hbm_to_vmem [thread:$0]  (!%p4426_p9), %s5269_s11, 3072, %s460_s16, [#allocation15], %s4215_s12, %s4215_s12, %s4216_s23  }
  0x98   : > { %s5270_s14 = sld [smem:[#allocation49_spill]] }
  0x9e   : > { %s3955_s9 = scalar_lea.hbm %s5270_s14, 3072 }
  0x9f   : > { %p3956_p11 = scmp.ne.s32.totalorder %s5270_s14, %s3955_s9  ;;  %p3962_p3 = scmp.lt.u32.totalorder %s3955_s9, %s5270_s14 }
  0xa1   : > { %p3958_p10 = pnand %p3956_p11, %p4440_p12 }
  0xa3   : > { %p3959_p13 = pneg %p3958_p10 }
  0xa5   : > { %p3964_p5 = pnand %p3962_p3, %p3959_p13 }
  0xa7   : > { %3967 = shalt.err (!%p3964_p5)
}
  0xa8   : > { %s3968_s16 = scalar_lea.vmem %s4482_s7, 3072  ;;  %p3976_p2 = scmp.lt.s32.totalorder %s4482_s7, %s4482_s7 }
  0xa9   : > { %p3969_p7 = scmp.ne.s32.totalorder %s4482_s7, %s3968_s16  ;;  %p3977_p4 = scmp.lt.s32.totalorder %s3968_s16, %s3968_s16 }
  0xab   : > { %p3971_p0 = pnand %p3969_p7, %p4440_p12  ;;  %p3978_p6 = por %p3977_p4, %p3976_p2 }
  0xad   : > { %p3972_p1 = pneg %p3971_p0 }
  0xaf   : > { %p3979_p8 = pnand %p3978_p6, %p3972_p1 }
  0xb1   : > { %3982 = shalt.err (!%p3979_p8)
}
  0xb2   : > { %3481 = dma.hbm_to_vmem [thread:$0]  (!%p4426_p9), %s5270_s14, 3072, %s4482_s7, [#allocation18], %s4215_s12, %s4215_s12, %s4216_s23  }
  0xb3   : > { %s58_s28 = sadd.s32 1, %s4199_s24  ;;  %s61_s29 = sadd.s32 1, %s4203_s25 }
  0xb4   : > { %p59_p12 = scmp.ge.s32.totalorder %s58_s28, 7  ;;  %s65_s5 = sld [smem:[#allocation6 + %s4199_s24]] }
  0xb5   : > { %s72_s3 = sadd.s32 1, %s4187_s21  ;;  %p79_p11 = scmp.ne.s32.totalorder %s4187_s21, %s4183_s20 }
  0xb6   : > { %s5334_s28 = smov (%p59_p12, %s58_s28), 0  ;;  %s5336_s29 = smov (!%p59_p12, %s61_s29), %s4203_s25 }
  0xb7   : > { %s66_s22 = sld [smem:[#allocation6 + %s5334_s28]]  ;;  %p80_p10 = scmp.eq.s32.totalorder %s4207_s26, 0 }
  0xb8   : > { %p63_p13 = scmp.ge.s32.totalorder %s5336_s29, 2  ;;  %p85_p9 = scmp.ne.s32.totalorder %s4183_s20, %s4179_s19 }
  0xb9   : > { %p4546_p3 = por %p80_p10, %p79_p11  ;;  %s383_s23 = ssub.s32 %s4199_s24, %s5334_s28 }
  0xba   : > { %s5338_s29 = smov (%p63_p13, %s5336_s29), 0  ;;  %p5273_p5 = scmp.eq.s32.totalorder %s4391_s27, 0 }
  0xbb   : > { %5272 = sst [smem:[#allocation37_spill]] %s5338_s29  ;;  %p5236_p0 = scmp.lt.s32.totalorder %s4207_s26, 14 }
  0xbc   : > { %p4556_p7 = por %p5273_p5, %p85_p9  ;;  %s68_s19 = ssub.s32 %s4203_s25, %s5338_s29 }
  0xbd   : > { %s5234_s9 = sand.u32 1, %s4187_s21   ;;  %s67_s8 = ssub.s32 %s65_s5, %s66_s22 }
  0xbe   : > { %s5274_s7 = scalar_select %p4556_p7, 1, 0 }
  0xbf   : > { %p122_p1 = scmp.eq.s32.totalorder %s68_s19, 0  ;;  %s69_s15 = sor.u32 %s68_s19, %s67_s8 }
  0xc0   : > { %s385_s30 = sor.u32 %s383_s23, %s68_s19  ;;  %p70_p2 = scmp.eq.s32.totalorder %s69_s15, 0 }
  0xc1   : > { %p386_p4 = scmp.eq.s32.totalorder %s385_s30, 0  ;;  %s3104_s1 = sshll.u32 %s5234_s9, 5 }
  0xc2   : > { %s4567_s16 = scalar_select %p70_p2, %s4187_s21, %s72_s3  }
  0xc3   : > { %s5275_s0 = sadd.s32 1, %s4163_s13  ;;  %s3105_s5 = sshll.u32 %s4203_s25, 2 }
  0xc4   : > { %s4572_s6 = scalar_select %p386_p4, %s4163_s13, %s5275_s0  }
  0xc5   : > { %s3453_s22 = scalar_select %p4546_p3, [#allocation6], [#allocation20] }
  0xc6   : > { %s3454_s23 = scalar_select %p4546_p3, %s4199_s24, 0 }
  0xc7   : > { %s5340_s22 = smov (!%p5236_p0, %s3453_s22), [#allocation21]  ;;  %s499_s8 = scalar_lea.vmem [#allocation8], %s3104_s1 }
  0xc8   : > { %s5342_s23 = smov (!%p5236_p0, %s3454_s23), 0  ;;  %s509_s15 = sshll.u32 %s499_s8, 4  ;;  %s4592_s15 = int_to_ptr.vmem [resolvable:$true] %s509_s15 }
  0xc9   : > { %p4588_p6 = pnand %p5236_p0, %p4546_p3  ;;  %s500_s30 = sld [smem:[%s5340_s22 + %s5342_s23]] }
  0xca   : > { %s124_s9 = sadd.s32 1, %s4175_s18  ;;  %p131_p8 = scmp.ne.s32.totalorder %s4175_s18, %s4171_s17 }
  0xcb   : > { %s4600_s10 = scalar_select %p122_p1, %s4175_s18, %s124_s9  }
  0xcc   : > { %p4604_p12 = por %p131_p8, %p80_p10  ;;  %s530_s14 = sand.u32 1, %s4175_s18  }
  0xcd   : > { %s5278_s2 = sld [smem:[#allocation39_spill]]  ;;  %s4614_s19 = sshll.u32 %s530_s14, 8 }
  0xce   : > { %s5279_s9 = sand.u32 1, %s4187_s21   ;;  %p3985_p10 = pneg %p4588_p6 }
  0xcf   : > { %s3106_s1 = sshll.u32 %s500_s30, 3  ;;  %s4618_s30 = scalar_lea.sflag [#allocation9], %s5279_s9 }
  0xd0   : > { %s506_s8 = sadd.s32 %s3106_s1, %s3105_s5 }
  0xd1   : > { %s3107_s11 = sshll.u32 %s506_s8, 7 }
  0xd3   : > { %s4612_s29 = scalar_lea.hbm %s5278_s2, %s3107_s11  ;;  %s3988_s1 = scalar_lea.hbm %s5278_s2, 7168 }
  0xd4   : > { %s3983_s0 = scalar_lea.hbm %s4612_s29, 512  ;;  %p3989_p3 = scmp.lt.u32.totalorder %s4612_s29, %s5278_s2 }
  0xd5   : > { %p3984_p11 = scmp.ne.s32.totalorder %s4612_s29, %s3983_s0  ;;  %p3990_p5 = scmp.lt.u32.totalorder %s3988_s1, %s3983_s0 }
  0xd6   : > { %p3992_p2 = scmp.lt.u32.totalorder %s3983_s0, %s4612_s29 }
  0xd7   : > { %p3986_p13 = pnand %p3985_p10, %p3984_p11  ;;  %p3991_p1 = por %p3990_p5, %p3989_p3 }
  0xd9   : > { %p3987_p9 = pneg %p3986_p13  ;;  %p3993_p4 = por %p3992_p2, %p3991_p1 }
  0xdb   : > { %p3994_p8 = pnand %p3993_p4, %p3987_p9 }
  0xdd   : > { %3997 = shalt.err (!%p3994_p8)
}
  0xde   : > { %s3998_s14 = scalar_lea.vmem %s4592_s15, 512  ;;  %s4219_s23 = smov [#allocation8]  }
  0xdf   : > { %p3999_p11 = scmp.ne.s32.totalorder %s4592_s15, %s3998_s14  ;;  %s4003_s9 = sshll.u32 %s4219_s23, 4  ;;  %s4004_s9 = int_to_ptr.vmem [resolvable:$false] %s4003_s9 }
  0xe0   : > { %s4005_s5 = scalar_lea.vmem %s4004_s9, 1024  ;;  %p4006_p7 = scmp.lt.s32.totalorder %s4592_s15, %s4004_s9 }
  0xe1   : > { %p4001_p13 = pnand %p3999_p11, %p3985_p10  ;;  %p4007_p3 = scmp.lt.s32.totalorder %s4005_s5, %s3998_s14 }
  0xe3   : > { %p4002_p0 = pneg %p4001_p13  ;;  %p4008_p5 = por %p4007_p3, %p4006_p7 }
  0xe5   : > { %p4009_p1 = pnand %p4008_p5, %p4002_p0 }
  0xe7   : > { %4012 = shalt.err (!%p4009_p1)
}
  0xe8   : > { %s4220_s0 = smov 128   ;;  %s4221_s11 = smov 8  }
  0xe9   : > { %3487 = dma.hbm_to_vmem [thread:$0]  (!%p4588_p6), %s4612_s29, 512, %s4592_s15, %s4618_s30, %s4220_s0, %s4220_s0, %s4221_s11  }
  0xea   : > { %s3271_s1 = sshll.u32 %s4203_s25, 12  ;;  %s532_s23 = scalar_lea.vmem [#allocation11], %s4614_s19 }
  0xeb   : > { %s4653_s14 = scalar_lea.hbm %s5205_s4, %s3271_s1  ;;  %s539_s9 = sshll.u32 %s532_s23, 4  ;;  %s4656_s9 = int_to_ptr.vmem [resolvable:$true] %s539_s9 }
  0xec   : > { %p5280_p7 = scmp.lt.s32.totalorder %s4207_s26, 14  ;;  %s5282_s29 = sand.u32 1, %s4207_s26  }
  0xed   : > { %s4668_s15 = scalar_lea.sflag [#allocation12], %s5282_s29  ;;  %s4013_s30 = scalar_lea.hbm %s4653_s14, 4096 }
  0xee   : > { %p4662_p0 = pnand %p5280_p7, %p4604_p12  ;;  %p4014_p6 = scmp.ne.s32.totalorder %s4653_s14, %s4013_s30 }
  0xef   : > { %s4018_s5 = scalar_lea.hbm %s5205_s4, 8192  ;;  %p4019_p12 = scmp.lt.u32.totalorder %s4653_s14, %s5205_s4 }
  0xf0   : > { %p4015_p10 = pneg %p4662_p0  ;;  %p4020_p4 = scmp.lt.u32.totalorder %s4018_s5, %s4013_s30 }
  0xf1   : > { %p4022_p11 = scmp.lt.u32.totalorder %s4013_s30, %s4653_s14 }
  0xf2   : > { %p4016_p9 = pnand %p4015_p10, %p4014_p6  ;;  %p4021_p8 = por %p4020_p4, %p4019_p12 }
  0xf4   : > { %p4017_p2 = pneg %p4016_p9  ;;  %p4023_p13 = por %p4022_p11, %p4021_p8 }
  0xf6   : > { %p4024_p3 = pnand %p4023_p13, %p4017_p2 }
  0xf8   : > { %4027 = shalt.err (!%p4024_p3)
}
  0xf9   : > { %s4028_s22 = scalar_lea.vmem %s4656_s9, 4096  ;;  %s4222_s23 = smov [#allocation11]  }
  0xfa   : > { %p4029_p5 = scmp.ne.s32.totalorder %s4656_s9, %s4028_s22  ;;  %s4033_s29 = sshll.u32 %s4222_s23, 4  ;;  %s4034_s29 = int_to_ptr.vmem [resolvable:$false] %s4033_s29 }
  0xfb   : > { %s4035_s19 = scalar_lea.vmem %s4034_s29, 8192  ;;  %p4036_p6 = scmp.lt.s32.totalorder %s4656_s9, %s4034_s29 }
  0xfc   : > { %p4031_p1 = pnand %p4029_p5, %p4015_p10  ;;  %p4037_p9 = scmp.lt.s32.totalorder %s4035_s19, %s4028_s22 }
  0xfe   : > { %p4032_p7 = pneg %p4031_p1  ;;  %p4038_p12 = por %p4037_p9, %p4036_p6 }
 0x100   : > { %p4039_p4 = pnand %p4038_p12, %p4032_p7 }
 0x102   : > { %4042 = shalt.err (!%p4039_p4)
}
 0x103   : > { %3490 = dma.hbm_to_vmem [thread:$0]  (!%p4662_p0), %s4653_s14, 4096, %s4656_s9, %s4668_s15, %s4220_s0, %s4220_s0, %s4221_s11  }
 0x104   : > { %s5283_s30 = sld [smem:[#allocation36_spill]] }
 0x10a   : > { %p5284_p10 = scmp.ne.s32.totalorder %s5283_s30, 0 }
 0x10b   : > { %s562_s12 = sand.u32 (!%p5284_p10), 1, %s4183_s20   ;;  %p5285_p2 = scmp.ne.s32.totalorder (!%p5284_p10), %s5274_s7, 0 }
 0x10c   : > { %560 = sbr.rel (%p5284_p10) target bundleno = 2188 (0x88c), region = 76  ;;  %s3112_s5 = sshll.u32 (!%p5284_p10), %s562_s12, 5 }
 0x10d   : > { %s563_s1 = scalar_lea.sflag (!%p5284_p10), [#allocation9], %s562_s12  ;;  %s4702_s8 = scalar_lea.vmem (!%p5284_p10), [#allocation8], %s3112_s5 }
 0x113   : > { %4130 = dma.done.wait (%p5285_p2), %s563_s1, 512  }
 0x114   : > { %4132 = vsyncadd (%p5285_p2), %s563_s1, 4294966784  ;;  %s5286_s3 = sld [smem:[#allocation33_spill]]  ;;  %s571_s22 = sand.u32 1, %s4391_s27  }
 0x115   : > { %s573_s0 = sand.u32 1, %s4171_s17   ;;  %s572_s14 = scalar_lea.sflag [#allocation12], %s571_s22 }
 0x116   : > { %s3113_s11 = sshll.u32 %s573_s0, 8 }
 0x117   : > { %s4710_s9 = scalar_lea.vmem [#allocation11], %s3113_s11 }
 0x11a   : > { %p5287_p0 = scmp.ne.s32.totalorder %s5286_s3, 0 }
 0x11c   : > { %4134 = dma.done.wait (%p5287_p0), %s572_s14, 4096  }
 0x11d   : > { %4136 = vsyncadd (%p5287_p0), %s572_s14, 4294963200  ;;  %p5288_p8 = scmp.eq.s32.totalorder %s4391_s27, 0 }
 0x11f   : > { %4138 = dma.done.wait (%p5288_p8), [#allocation12], 3072   ;;  %p5289_p11 = pmov %p5288_p8 }
 0x120   : > { %p5290_p13 = pmov %p5288_p8 }
 0x121   : > { %4140 = vsyncadd (%p5289_p11), [#allocation12], 4294964224 }
 0x122   : > { %4142 = dma.done.wait (%p5290_p13), [#allocation15], 9216   ;;  %p5291_p3 = pmov %p5288_p8 }
 0x124   : > { %4144 = vsyncadd (%p5291_p3), [#allocation15], 4294958080  ;;  %p5292_p5 = pmov %p5291_p3 }
 0x125   : > { %p5293_p1 = pmov %p5291_p3 }
 0x126   : > { %4146 = dma.done.wait (%p5292_p5), [#allocation18], 3072  }
 0x127   : > { %4148 = vsyncadd (%p5293_p1), [#allocation18], 4294964224  ;;  %s5294_s7 = sld [smem:[#allocation30_spill]]  ;;  %s5295_s15 = sld [smem:[#allocation32_spill]] }
 0x128   : > { %s5296_s1 = sld [smem:[#allocation40_spill]]  ;;  %s5297_s11 = sld [smem:[#allocation41_spill]] }
 0x129   : > { %s5298_s2 = sld [smem:[#allocation31_spill]] }
 0x12d   : > { %s648_s23 = sand.u32 1, %s5294_s7   ;;  %s3118_s29 = sshll.u32 %s5295_s15, 2 }
 0x12e   : > { %s3442_s19 = smul.u32 96, %s648_s23  ;;  %p654_p7 = scmp.lt.s32.totalorder %s3118_s29, 7 }
 0x12f   : > { %p3122_p6 = scmp.ne.s32.totalorder %s5298_s2, 0 }
 0x130   : > { %s5344_s29 = smov (!%p654_p7, %s3118_s29), 7  ;;  %s4740_s27 = scalar_lea.vmem [#allocation19], %s3442_s19 }
 0x131   : > { %s3119_s30 = sshll.u32 %s5344_s29, 3  ;;  %671 = sbr.rel (%p3122_p6) target bundleno = 316 (0x13c), region = 104 }
 0x132   : > { %s657_s3 = scalar_lea.vmem %s5296_s1, %s3119_s30  ;;  %s4738_s14 = scalar_lea.vmem %s5297_s11, %s3119_s30 }
 0x133   : > { %v672_v1 = vld [vmem:[%s657_s3] sm:$0xff] (!%p3122_p6)  ;;  %v673_v2 = vld [vmem:[%s657_s3 + $0x8] sm:$0xff] (!%p3122_p6)  ;;  %v674_v3 = vld [vmem:[%s657_s3 + $0x10] sm:$0xff] (!%p3122_p6)  ;;  %s5299_s29 = sld [smem:[#allocation43_spill]] (!%p3122_p6) }
 0x134   : > { %676 = vst [vmem:[#allocation2] sm:$0xff] (!%p3122_p6), %v672_v1  ;;  %677 = vst [vmem:[#allocation2 + $0x8] sm:$0xff] (!%p3122_p6), %v673_v2  ;;  %v675_v4 = vld [vmem:[%s657_s3 + $0x18] sm:$0xff] (!%p3122_p6) }
 0x135   : > { %678 = vst [vmem:[#allocation2 + $0x10] sm:$0xff] (!%p3122_p6), %v674_v3  ;;  %679 = vst [vmem:[#allocation2 + $0x18] sm:$0xff] (!%p3122_p6), %v675_v4 }
 0x139   : > { %v3123_v5 = vld [vmem:[%s5299_s29] ss:$0 sm:$0xff] }
 0x13a   : > { %687 = vst [vmem:[#allocation3] sm:$0xff] %v3123_v5  ;;  %688 = vst [vmem:[#allocation3 + $0x8] sm:$0xff] %v3123_v5 }
 0x13b   : > { %689 = vst [vmem:[#allocation3 + $0x10] sm:$0xff] %v3123_v5  ;;  %690 = vst [vmem:[#allocation3 + $0x18] sm:$0xff] %v3123_v5 }
 0x13c PF: > { %v3125_v6 = vld [vmem:[#allocation7] ss:$0 sm:$0xff]  ;;  %s5300_s30 = sld [smem:[#allocation44_spill]]  ;;  %v4223_v9 = vmov 0   ;;  %v732_v21 = vld [vmem:[%s4738_s14 + $0x8] sm:$0xff]  ;;  %vm753_vm0 = vcmask 64512   ;;  %v798_v63 = vlaneseq }
 0x13d   : > { %3633 = vset.pattern.permute.xlu1 %v4223_v9  ;;  %3634 = vset.pattern.permute.xlu0 %v4223_v9  ;;  %v731_v17 = vld [vmem:[%s4738_s14] sm:$0xff]  ;;  %v734_v28 = vld [vmem:[%s4738_s14 + $0x18] sm:$0xff]  ;;  %v733_v30 = vld [vmem:[%s4738_s14 + $0x10] sm:$0xff]  ;;  %s5301_s12 = sld [smem:[#allocation31_spill]]  ;;  %vm1310_vm1 = vcmask 1041409   ;;  %vm1312_vm2 = vcmask 1042434  }
 0x13e   : > { %746 = vperm.xlu1 %3633, %v3125_v6   ;;  %v3635_v58 = vld [vmem:[#allocation14 + $0x4] ss:$12 sps:$4 sm:$0xff]   ;;  %v3637_v59 = vld [vmem:[#allocation14] ss:$12 sps:$4 sm:$0xff]   ;;  %v3638_v60 = vld [vmem:[#allocation14 + $0x1c] ss:$12 sps:$4 sm:$0xff]  }
 0x13f   : > { %v691_v7 = vld [vmem:[#allocation2] sm:$0xff]  ;;  %v692_v11 = vld [vmem:[#allocation2 + $0x8] sm:$0xff]  ;;  %1690 = vmatprep.subr.bf16.mxu0 %v3635_v58  ;;  %v4770_v3 = vshrl.u32 %v798_v63, 7  ;;  %vm1314_vm4 = vcmask 1043459   ;;  %vm1316_vm5 = vcmask 1044484   ;;  %vm1318_vm6 = vcmask 1045509  }
 0x140   : > { %v694_v12 = vld [vmem:[#allocation2 + $0x18] sm:$0xff]  ;;  %v693_v15 = vld [vmem:[#allocation2 + $0x10] sm:$0xff]  ;;  %1691 = vmatpush1.bf16.msra.mxu0 %v3637_v59  ;;  %vm1320_vm7 = vcmask 1046534   ;;  %vm1322_vm8 = vcmask 1047559   ;;  %s5304_s3 = sld [smem:[#allocation48_spill]]  ;;  %s5305_s11 = sld [smem:[#allocation47_spill]] }
 0x141   : > { %v3640_v61 = vld [vmem:[#allocation14 + $0x18] ss:$12 sps:$4 sm:$0xff]   ;;  %1692 = vmatprep.subr.bf16.mxu0 %v3638_v60  ;;  %v3641_v1 = vld [vmem:[#allocation14 + $0x34] ss:$12 sps:$4 sm:$0xff]   ;;  %v3643_v2 = vld [vmem:[#allocation14 + $0x30] ss:$12 sps:$4 sm:$0xff]  }
 0x142   : > { %v3124_v8 = vld [vmem:[%s5300_s30] ss:$0 sm:$0xff]  ;;  %v3644_v4 = vld [vmem:[#allocation14 + $0x4c] ss:$12 sps:$4 sm:$0xff]   ;;  %v3646_v5 = vld [vmem:[#allocation14 + $0x48] ss:$12 sps:$4 sm:$0xff]  }
 0x143   : > { %v719_v10 = vmul.f32 %v3124_v8, %v691_v7  ;;  %v720_v13 = vmul.f32 %v3124_v8, %v692_v11  ;;  %v722_v14 = vmul.f32 %v3124_v8, %v694_v12  ;;  %v721_v16 = vmul.f32 %v3124_v8, %v693_v15  ;;  %v3647_v11 = vld [vmem:[#allocation14 + $0x64] ss:$12 sps:$4 sm:$0xff]   ;;  %v3649_v12 = vld [vmem:[#allocation14 + $0x60] ss:$12 sps:$4 sm:$0xff]   ;;  %s4868_s5 = sld [smem:[#allocation5 + %s5301_s12]]  ;;  %s2454_s14 = sadd.s32 1, %s5301_s12 }
 0x144   : > { %1693 = vmatpush1.bf16.msra.mxu0 %v3640_v61  ;;  %v4773_v6 = vsub.s32 1, %v4770_v3  ;;  %v4776_v7 = vsub.s32 0, %v4770_v3  ;;  %v3673_v58 = vld [vmem:[#allocation14 + $0x120] ss:$12 sps:$4 sm:$0xff]   ;;  %p2455_p12 = scmp.lt.s32.totalorder %s2454_s14, 6  ;;  %p2457_p4 = scmp.lt.s32.totalorder %s2454_s14, 7 }
 0x145   : > { %723 = vadd.xlane.f32.xlu0 %v719_v10  ;;  %1694 = vmatprep.subr.bf16.mxu0 %v3641_v1  ;;  %v3676_v1 = vld [vmem:[#allocation14 + $0x138] ss:$12 sps:$4 sm:$0xff]   ;;  %s5307_s30 = sld [smem:[#allocation50_spill]] }
 0x146   : > { %s2456_s7 = scalar_select %p2455_p12, %s2454_s14, 6 }
 0x148   : > { %1695 = vmatpush1.bf16.msra.mxu0 %v3643_v2  ;;  %s2458_s15 = sld [smem:[#allocation5 + %s2456_s7]] }
 0x149   : > { %725 = vadd.xlane.f32.xlu0 %v720_v13  ;;  %1696 = vmatprep.subr.bf16.mxu0 %v3644_v4  ;;  %v3678_v4 = vld [vmem:[#allocation14 + $0x8] ss:$12 sps:$4 sm:$0xff]   ;;  %p696_p9 = scmp.ne.s32.totalorder %s4868_s5, 0 }
 0x14b   : > { %s4879_s1 = scalar_select %p696_p9, 1, 0 }
 0x14c   : > { %1697 = vmatpush1.bf16.msra.mxu0 %v3646_v5  ;;  %v3679_v5 = vld [vmem:[#allocation14 + $0x154] ss:$12 sps:$4 sm:$0xff]  }
 0x14d   : > { %729 = vadd.xlane.f32.xlu0 %v722_v14  ;;  %1698 = vmatprep.subr.bf16.mxu0 %v3647_v11  ;;  %v3683_v11 = vld [vmem:[#allocation14 + $0x20] ss:$12 sps:$4 sm:$0xff]  }
 0x14e   : > { %p2459_p10 = scmp.eq.s32.totalorder %s2458_s15, 0 }
 0x150   : > { %1699 = vmatpush1.bf16.msra.mxu0 %v3649_v12  ;;  %p5034_p2 = pnand %p2459_p10, %p2457_p4 }
 0x162   : > { %727 = vadd.xlane.f32.xlu1 %v721_v16 }
 0x1bd   : > { %v747_v20 = vpop.permute.xlu1 %746 }
 0x1d2   : > { %v724_v18 = vpop.xlane.xlu0 %723 }
 0x1d3   : > { %v735_v19 = vadd.f32 %v731_v17, %v724_v18  ;;  %v4785_v17 = vsub.s32 2, %v4770_v3  ;;  %v3650_v18 = vld [vmem:[#allocation14 + $0x7c] ss:$12 sps:$4 sm:$0xff]  }
 0x1d4   : > { %1700 = vmatprep.subr.bf16.mxu0 %v3650_v18  ;;  %v3688_v18 = vld [vmem:[#allocation14 + $0x38] ss:$12 sps:$4 sm:$0xff]  }
 0x1d5   : > { %v749_v22 = vadd.f32 %v747_v20, %v735_v19  ;;  %v3652_v19 = vld [vmem:[#allocation14 + $0x78] ss:$12 sps:$4 sm:$0xff]  }
 0x1d6   : > { %v726_v23 = vpop.xlane.xlu0 %725  ;;  %1701 = vmatpush1.bf16.msra.mxu0 %v3652_v19 }
 0x1d7   : > { %v736_v24 = vadd.f32 %v732_v21, %v726_v23  ;;  %v754_v25 = vsel %vm753_vm0, %v749_v22, -inf  ;;  %v3653_v23 = vld [vmem:[#allocation14 + $0x94] ss:$12 sps:$4 sm:$0xff]  }
 0x1d8   : > { %755 = vmax.xlane.f32.xlu0 %v754_v25  ;;  %1702 = vmatprep.subr.bf16.mxu0 %v3653_v23 }
 0x1d9   : > { %v750_v26 = vadd.f32 %v747_v20, %v736_v24  ;;  %v3655_v24 = vld [vmem:[#allocation14 + $0x90] ss:$12 sps:$4 sm:$0xff]  }
 0x1da   : > { %v730_v29 = vpop.xlane.xlu0 %729  ;;  %1703 = vmatpush1.bf16.msra.mxu0 %v3655_v24  ;;  %v3693_v24 = vld [vmem:[#allocation14 + $0x50] ss:$12 sps:$4 sm:$0xff]  }
 0x1db   : > { %v757_v27 = vsel %vm753_vm0, %v750_v26, -inf  ;;  %v738_v32 = vadd.f32 %v734_v28, %v730_v29  ;;  %v3656_v28 = vld [vmem:[#allocation14 + $0xac] ss:$12 sps:$4 sm:$0xff]   ;;  %v3658_v29 = vld [vmem:[#allocation14 + $0xa8] ss:$12 sps:$4 sm:$0xff]  }
 0x1dc   : > { %758 = vmax.xlane.f32.xlu0 %v757_v27  ;;  %v4795_v27 = vsub.s32 4, %v4770_v3  ;;  %1704 = vmatprep.subr.bf16.mxu0 %v3656_v28  ;;  %v3698_v28 = vld [vmem:[#allocation14 + $0x68] ss:$12 sps:$4 sm:$0xff]  }
 0x1dd   : > { %v752_v36 = vadd.f32 %v747_v20, %v738_v32  ;;  %v4801_v32 = vsub.s32 5, %v4770_v3 }
 0x1de   : > { %1705 = vmatpush1.bf16.msra.mxu0 %v3658_v29 }
 0x1df   : > { %v763_v37 = vsel %vm753_vm0, %v752_v36, -inf }
 0x1ef   : > { %v728_v31 = vpop.xlane.xlu1 %727 }
 0x1f0   : > { %v737_v33 = vadd.f32 %v733_v30, %v728_v31 }
 0x1f2   : > { %v751_v34 = vadd.f32 %v747_v20, %v737_v33 }
 0x1f4   : > { %v760_v35 = vsel %vm753_vm0, %v751_v34, -inf }
 0x1f5   : > { %761 = vmax.xlane.f32.xlu0 %v760_v35  ;;  %v3659_v35 = vld [vmem:[#allocation14 + $0xc4] ss:$12 sps:$4 sm:$0xff]  }
 0x1f6   : > { %1706 = vmatprep.subr.bf16.mxu0 %v3659_v35  ;;  %v3708_v35 = vld [vmem:[#allocation14 + $0x98] ss:$12 sps:$4 sm:$0xff]  }
 0x1f9   : > { %764 = vmax.xlane.f32.xlu0 %v763_v37  ;;  %v4807_v37 = vsub.s32 6, %v4770_v3 }
 0x265   : > { %v756_v38 = vpop.xlane.xlu0 %755 }
 0x266   : > { %v766_v39 = vsub.f32 %v749_v22, %v756_v38  ;;  %v4790_v22 = vsub.s32 3, %v4770_v3 }
 0x268   : > { %v770_v40 = vmul.f32 1.442695, %v766_v39 }
 0x269   : > { %v759_v41 = vpop.xlane.xlu0 %758 }
 0x26a   : > { %3763 = vpow2.f32 %v770_v40  ;;  %v767_v42 = vsub.f32 %v750_v26, %v759_v41  ;;  %v3662_v40 = vld [vmem:[#allocation14 + $0xdc] ss:$12 sps:$4 sm:$0xff]  }
 0x26c   : > { %v772_v43 = vmul.f32 1.442695, %v767_v42  ;;  %v3664_v42 = vld [vmem:[#allocation14 + $0xd8] ss:$12 sps:$4 sm:$0xff]  }
 0x26e   : > { %3765 = vpow2.f32 %v772_v43  ;;  %v4813_v43 = vsub.s32 7, %v4770_v3 }
 0x274   : > { %v3764_v44 = vpop.eup %3763 }
 0x275   : > { %v778_v45 = vsel %vm753_vm0, %v3764_v44, 0.0 }
 0x276   : > { %779 = vadd.xlane.f32.xlu0 %v778_v45 }
 0x278   : > { %v3766_v46 = vpop.eup %3765 }
 0x279   : > { %v781_v47 = vsel %vm753_vm0, %v3766_v46, 0.0 }
 0x27a   : > { %782 = vadd.xlane.f32.xlu0 %v781_v47 }
 0x282   : > { %v762_v48 = vpop.xlane.xlu0 %761 }
 0x283   : > { %v768_v49 = vsub.f32 %v751_v34, %v762_v48  ;;  %v3667_v48 = vld [vmem:[#allocation14 + $0xf0] ss:$12 sps:$4 sm:$0xff]  }
 0x285   : > { %v774_v50 = vmul.f32 1.442695, %v768_v49 }
 0x286   : > { %v765_v51 = vpop.xlane.xlu0 %764 }
 0x287   : > { %3767 = vpow2.f32 %v774_v50  ;;  %v769_v52 = vsub.f32 %v752_v36, %v765_v51  ;;  %v3661_v36 = vld [vmem:[#allocation14 + $0xc0] ss:$12 sps:$4 sm:$0xff]   ;;  %v3670_v51 = vld [vmem:[#allocation14 + $0x108] ss:$12 sps:$4 sm:$0xff]  }
 0x288   : > { %1707 = vmatpush1.bf16.msra.mxu0 %v3661_v36  ;;  %v3668_v50 = vld [vmem:[#allocation14 + $0x10c] ss:$12 sps:$4 sm:$0xff]  }
 0x289   : > { %v776_v53 = vmul.f32 1.442695, %v769_v52  ;;  %1708 = vmatprep.subr.bf16.mxu0 %v3662_v40  ;;  %v1022_v40 = vld [vmem:[%s4710_s9] sm:$0xff] }
 0x28b   : > { %3769 = vpow2.f32 %v776_v53 }
 0x28c   : > { %1709 = vmatpush1.bf16.msra.mxu0 %v3664_v42  ;;  %v1023_v42 = vld [vmem:[%s4710_s9 + $0x8] sm:$0xff] }
 0x291   : > { %v4761_v54 = vpop.eup %3767 }
 0x292   : > { %v784_v55 = vsel %vm753_vm0, %v4761_v54, 0.0 }
 0x293   : > { %785 = vadd.xlane.f32.xlu0 %v784_v55  ;;  %v3671_v55 = vld [vmem:[#allocation14 + $0x124] ss:$12 sps:$4 sm:$0xff]  }
 0x295   : > { %v4765_v56 = vpop.eup %3769 }
 0x296   : > { %v787_v57 = vsel %vm753_vm0, %v4765_v56, 0.0 }
 0x297   : > { %788 = vadd.xlane.f32.xlu0 %v787_v57 }
 0x303   : > { %v780_v62 = vpop.xlane.xlu0 %779 }
 0x304   : > { %3771 = vrcp.f32 %v780_v62  ;;  %v3674_v62 = vld [vmem:[#allocation14 + $0x13c] ss:$12 sps:$4 sm:$0xff]  }
 0x307   : > { %v783_v0 = vpop.xlane.xlu0 %782 }
 0x308   : > { %3773 = vrcp.f32 %v783_v0 }
 0x30e   : > { %v3772_v8 = vpop.eup %3771 }
 0x30f   : > { %v4778_v10 = vmul.f32 %v3772_v8, %v3764_v44  ;;  %v3681_v8 = vld [vmem:[#allocation14 + $0x150] ss:$12 sps:$4 sm:$0xff]  }
 0x311   : > { %v808_v13 = vrot.slane %v4778_v10, %v4773_v6  ;;  %v801_v14 = vrot.slane %v4778_v10, %v4776_v7  ;;  %v815_v31 = vrot.slane %v4778_v10, %v4785_v17  ;;  %v822_v34 = vrot.slane %v4778_v10, %v4790_v22 }
 0x312   : > { %v3774_v15 = vpop.eup %3773  ;;  %v829_v39 = vrot.slane %v4778_v10, %v4795_v27  ;;  %v836_v45 = vrot.slane %v4778_v10, %v4801_v32  ;;  %v843_v49 = vrot.slane %v4778_v10, %v4807_v37  ;;  %v850_v53 = vrot.slane %v4778_v10, %v4813_v43 }
 0x313   : > { %v793_v16 = vmul.f32 %v3774_v15, %v3766_v46  ;;  %810 = vbcast.lane.b32.xlu0 %v808_v13, 256  ;;  %803 = vbcast.lane.b32.xlu1 %v801_v14, 256  ;;  %v3665_v46 = vld [vmem:[#allocation14 + $0xf4] ss:$12 sps:$4 sm:$0xff]   ;;  %v3684_v13 = vld [vmem:[#allocation14 + $0x16c] ss:$12 sps:$4 sm:$0xff]  }
 0x314   : > { %1710 = vmatprep.subr.bf16.mxu0 %v3665_v46  ;;  %v3686_v14 = vld [vmem:[#allocation14 + $0x168] ss:$12 sps:$4 sm:$0xff]   ;;  %v3687_v15 = vld [vmem:[#allocation14 + $0xf8] ss:$12 sps:$4 sm:$0xff]  }
 0x315   : > { %v871_v20 = vrot.slane %v793_v16, %v4785_v17  ;;  %v857_v21 = vrot.slane %v793_v16, %v4776_v7  ;;  %v878_v25 = vrot.slane %v793_v16, %v4790_v22  ;;  %v864_v26 = vrot.slane %v793_v16, %v4773_v6  ;;  %1711 = vmatpush1.bf16.msra.mxu0 %v3667_v48  ;;  %v1032_v46 = vld [vmem:[%s4710_s9 + $0x50] sm:$0xff] }
 0x316   : > { %v885_v30 = vrot.slane %v793_v16, %v4795_v27  ;;  %v892_v33 = vrot.slane %v793_v16, %v4801_v32  ;;  %v899_v38 = vrot.slane %v793_v16, %v4807_v37  ;;  %v906_v44 = vrot.slane %v793_v16, %v4813_v43  ;;  %1712 = vmatprep.subr.bf16.mxu0 %v3668_v50 }
 0x317   : > { %873 = vbcast.lane.b32.xlu0 %v871_v20, 256  ;;  %859 = vbcast.lane.b32.xlu1 %v857_v21, 256  ;;  %v3691_v20 = vld [vmem:[#allocation16 + $0x4] ss:$12 sps:$4 sm:$0xff]  }
 0x318   : > { %v3692_v21 = vld [vmem:[#allocation14 + $0x110] ss:$12 sps:$4 sm:$0xff]  }
 0x319   : > { %1713 = vmatpush1.bf16.msra.mxu0 %v3670_v51 }
 0x31a   : > { %1714 = vmatprep.subr.bf16.mxu0 %v3671_v55 }
 0x31b   : > { %880 = vbcast.lane.b32.xlu0 %v878_v25, 256  ;;  %866 = vbcast.lane.b32.xlu1 %v864_v26, 256 }
 0x31d   : > { %1715 = vmatpush1.bf16.msra.mxu0 %v3673_v58  ;;  %v1031_v58 = vld [vmem:[%s4710_s9 + $0x48] sm:$0xff] }
 0x31e   : > { %1716 = vmatprep.subr.bf16.mxu0 %v3674_v62 }
 0x31f   : > { %887 = vbcast.lane.b32.xlu0 %v885_v30, 256  ;;  %817 = vbcast.lane.b32.xlu1 %v815_v31, 256  ;;  %v3702_v30 = vld [vmem:[#allocation14 + $0x140] ss:$12 sps:$4 sm:$0xff]  }
 0x320   : > { %v786_v41 = vpop.xlane.xlu0 %785  ;;  %v3703_v31 = vld [vmem:[#allocation14 + $0x80] ss:$12 sps:$4 sm:$0xff]  }
 0x321   : > { %3775 = vrcp.f32 %v786_v41  ;;  %1717 = vmatpush1.bf16.msra.mxu0 %v3676_v1 }
 0x322   : > { %1718 = vmatprep.subr.bf16.mxu0 %v3679_v5  ;;  %v1034_v5 = vld [vmem:[%s4710_s9 + $0x60] sm:$0xff] }
 0x323   : > { %894 = vbcast.lane.b32.xlu0 %v892_v33, 256  ;;  %824 = vbcast.lane.b32.xlu1 %v822_v34, 256  ;;  %v3707_v34 = vld [vmem:[#allocation14 + $0x158] ss:$12 sps:$4 sm:$0xff]  }
 0x324   : > { %v789_v47 = vpop.xlane.xlu0 %788 }
 0x325   : > { %3777 = vrcp.f32 %v789_v47  ;;  %1719 = vmatpush1.bf16.msra.mxu0 %v3681_v8 }
 0x326   : > { %1720 = vmatprep.subr.bf16.mxu0 %v3684_v13 }
 0x327   : > { %901 = vbcast.lane.b32.xlu0 %v899_v38, 256  ;;  %831 = vbcast.lane.b32.xlu1 %v829_v39, 256  ;;  %v3712_v38 = vld [vmem:[#allocation14 + $0x170] ss:$12 sps:$4 sm:$0xff]   ;;  %v4860_v39 = vld [vmem:[#allocation16 + $0x8] ss:$12 sps:$4 sm:$0xff]  }
 0x329   : > { %1721 = vmatpush1.bf16.msra.mxu0 %v3686_v14 }
 0x32a   : > { %1971 = vmatprep.subr.bf16.mxu0 %v3691_v20  ;;  %v1035_v20 = vld [vmem:[%s4710_s9 + $0x68] sm:$0xff] }
 0x32b   : > { %908 = vbcast.lane.b32.xlu0 %v906_v44, 256  ;;  %838 = vbcast.lane.b32.xlu1 %v836_v45, 256  ;;  %v3776_v52 = vpop.eup %3775  ;;  %v1030_v45 = vld [vmem:[%s4710_s9 + $0x40] sm:$0xff] }
 0x32c   : > { %v4823_v57 = vmul.f32 %v3776_v52, %v4761_v54  ;;  %v3677_v54 = vld [vmem:[#allocation14 + $0xc8] ss:$12 sps:$4 sm:$0xff]  }
 0x32d   : > { %3272 = vmatprep.subr.bf16.mxu1 %v3677_v54 }
 0x32e   : > { %v920_v59 = vrot.slane %v4823_v57, %v4773_v6  ;;  %v913_v60 = vrot.slane %v4823_v57, %v4776_v7  ;;  %3273 = vmatpush3.bf16.msra.mxu1 %v3678_v4  ;;  %v927_v12 = vrot.slane %v4823_v57, %v4785_v17  ;;  %v934_v19 = vrot.slane %v4823_v57, %v4790_v22  ;;  %v1024_v4 = vld [vmem:[%s4710_s9 + $0x10] sm:$0xff] }
 0x32f   : > { %845 = vbcast.lane.b32.xlu1 %v843_v49, 256  ;;  %v3778_v61 = vpop.eup %3777  ;;  %v941_v25 = vrot.slane %v4823_v57, %v4795_v27  ;;  %v948_v29 = vrot.slane %v4823_v57, %v4801_v32  ;;  %v955_v33 = vrot.slane %v4823_v57, %v4807_v37  ;;  %v962_v36 = vrot.slane %v4823_v57, %v4813_v43 }
 0x330   : > { %v4830_v0 = vmul.f32 %v3778_v61, %v4765_v56  ;;  %922 = vbcast.lane.b32.xlu0 %v920_v59, 256  ;;  %v3682_v56 = vld [vmem:[#allocation14 + $0xe0] ss:$12 sps:$4 sm:$0xff]   ;;  %v1033_v59 = vld [vmem:[%s4710_s9 + $0x58] sm:$0xff] }
 0x331   : > { %3274 = vmatprep.subr.bf16.mxu1 %v3682_v56 }
 0x332   : > { %v976_v2 = vrot.slane %v4830_v0, %v4773_v6  ;;  %v969_v3 = vrot.slane %v4830_v0, %v4776_v7  ;;  %v983_v10 = vrot.slane %v4830_v0, %v4785_v17  ;;  %3275 = vmatpush3.bf16.msra.mxu1 %v3683_v11  ;;  %v990_v16 = vrot.slane %v4830_v0, %v4790_v22  ;;  %v3697_v22 = vld [vmem:[#allocation14 + $0x128] ss:$12 sps:$4 sm:$0xff]  }
 0x333   : > { %852 = vbcast.lane.b32.xlu1 %v850_v53, 256  ;;  %3276 = vmatprep.subr.bf16.mxu1 %v3687_v15  ;;  %v997_v23 = vrot.slane %v4830_v0, %v4795_v27  ;;  %v1004_v26 = vrot.slane %v4830_v0, %v4801_v32  ;;  %v1011_v27 = vrot.slane %v4830_v0, %v4807_v37  ;;  %v3713_v37 = vld [vmem:[#allocation14 + $0xb0] ss:$12 sps:$4 sm:$0xff]  }
 0x334   : > { %978 = vbcast.lane.b32.xlu0 %v976_v2, 256  ;;  %v1018_v32 = vrot.slane %v4830_v0, %v4813_v43 }
 0x336   : > { %3277 = vmatpush3.bf16.msra.mxu1 %v3688_v18 }
 0x337   : > { %915 = vbcast.lane.b32.xlu1 %v913_v60, 256  ;;  %3278 = vmatprep.subr.bf16.mxu1 %v3692_v21 }
 0x338   : > { %985 = vbcast.lane.b32.xlu0 %v983_v10, 256 }
 0x33a   : > { %3279 = vmatpush3.bf16.msra.mxu1 %v3693_v24 }
 0x33b   : > { %971 = vbcast.lane.b32.xlu1 %v969_v3, 256  ;;  %3280 = vmatprep.subr.bf16.mxu1 %v3697_v22 }
 0x33c   : > { %992 = vbcast.lane.b32.xlu0 %v990_v16, 256 }
 0x33e   : > { %3281 = vmatpush3.bf16.msra.mxu1 %v3698_v28 }
 0x33f   : > { %929 = vbcast.lane.b32.xlu1 %v927_v12, 256  ;;  %3282 = vmatprep.subr.bf16.mxu1 %v3702_v30 }
 0x340   : > { %999 = vbcast.lane.b32.xlu0 %v997_v23, 256 }
 0x342   : > { %3283 = vmatpush3.bf16.msra.mxu1 %v3703_v31 }
 0x343   : > { %936 = vbcast.lane.b32.xlu1 %v934_v19, 256  ;;  %3284 = vmatprep.subr.bf16.mxu1 %v3707_v34  ;;  %v1025_v19 = vld [vmem:[%s4710_s9 + $0x18] sm:$0xff] }
 0x344   : > { %1006 = vbcast.lane.b32.xlu0 %v1004_v26, 256 }
 0x346   : > { %3285 = vmatpush3.bf16.msra.mxu1 %v3708_v35  ;;  %v1026_v35 = vld [vmem:[%s4710_s9 + $0x20] sm:$0xff] }
 0x347   : > { %943 = vbcast.lane.b32.xlu1 %v941_v25, 256  ;;  %3286 = vmatprep.subr.bf16.mxu1 %v3712_v38 }
 0x348   : > { %1013 = vbcast.lane.b32.xlu0 %v1011_v27, 256 }
 0x34a   : > { %3287 = vmatpush3.bf16.msra.mxu1 %v3713_v37 }
 0x34b   : > { %950 = vbcast.lane.b32.xlu1 %v948_v29, 256  ;;  %3358 = vmatprep.subr.bf16.mxu1 %v4860_v39 }
 0x34c   : > { %1020 = vbcast.lane.b32.xlu0 %v1018_v32, 256 }
 0x34f   : > { %957 = vbcast.lane.b32.xlu1 %v955_v33, 256 }
 0x353   : > { %964 = vbcast.lane.b32.xlu1 %v962_v36, 256  ;;  %v1036_v36 = vld [vmem:[%s4710_s9 + $0x70] sm:$0xff] }
 0x385   : > { %v804_v41 = vpop.permute.xlu1 %803  ;;  %v811_v43 = vpop.permute.xlu0 %810 }
 0x386   : > { %v1054_v44 = vmul.f32 %v1022_v40, %v804_v41  ;;  %v1055_v47 = vmul.f32 %v1023_v42, %v811_v43  ;;  %v706_v40 = vstv %s4879_s1 }
 0x387   : > { %vm4889_vm3 = vcmp.eq.s32.totalorder %v706_v40, 1 }
 0x388   : > { %v1086_v50 = vrot.slane %v1054_v44, 4  ;;  %v1092_v53 = vrot.slane %v1055_v47, 4 }
 0x389   : > { %v860_v48 = vpop.permute.xlu1 %859  ;;  %v874_v49 = vpop.permute.xlu0 %873 }
 0x38a   : > { %v1062_v51 = vmul.f32 %v1030_v45, %v860_v48  ;;  %v1064_v52 = vmul.f32 %v1032_v46, %v874_v49  ;;  %v1087_v62 = vadd.f32 %v1086_v50, %v1054_v44  ;;  %v1093_v2 = vadd.f32 %v1092_v53, %v1055_v47 }
 0x38c   : > { %v1134_v55 = vrot.slane %v1062_v51, 4  ;;  %v1146_v57 = vrot.slane %v1064_v52, 4  ;;  %v1088_v13 = vrot.slane %v1087_v62, 2  ;;  %v1094_v21 = vrot.slane %v1093_v2, 2 }
 0x38d   : > { %v867_v60 = vpop.permute.xlu1 %866  ;;  %v881_v61 = vpop.permute.xlu0 %880 }
 0x38e   : > { %v1135_v0 = vadd.f32 %v1134_v55, %v1062_v51  ;;  %v1063_v1 = vmul.f32 %v1031_v58, %v867_v60  ;;  %v1065_v54 = vmul.f32 %v1033_v59, %v881_v61  ;;  %v1147_v3 = vadd.f32 %v1146_v57, %v1064_v52  ;;  %v4885_v59 = vld [vmem:[%s4702_s8] sm:$0xff]  ;;  %v3722_v61 = vld [vmem:[#allocation16 + $0xa8] ss:$12 sps:$4 sm:$0xff]  }
 0x38f   : > { %v1089_v31 = vadd.f32 %v1088_v13, %v1087_v62  ;;  %v1095_v38 = vadd.f32 %v1094_v21, %v1093_v2  ;;  %v4887_v60 = vld [vmem:[#allocation3] sm:$0xff] }
 0x390   : > { %v1136_v8 = vrot.slane %v1135_v0, 2  ;;  %v1140_v56 = vrot.slane %v1063_v1, 4  ;;  %v1152_v10 = vrot.slane %v1065_v54, 4  ;;  %v1148_v23 = vrot.slane %v1147_v3, 2 }
 0x391   : > { %v818_v11 = vpop.permute.xlu1 %817  ;;  %v888_v12 = vpop.permute.xlu0 %887  ;;  %v1090_v51 = vrot.slane %v1089_v31, 1  ;;  %v1096_v62 = vrot.slane %v1095_v38, 1 }
 0x392   : > { %v1141_v14 = vadd.f32 %v1140_v56, %v1063_v1  ;;  %v1153_v15 = vadd.f32 %v1152_v10, %v1065_v54  ;;  %v1056_v16 = vmul.f32 %v1024_v4, %v818_v11  ;;  %v1066_v18 = vmul.f32 %v1034_v5, %v888_v12  ;;  %v1027_v54 = vld [vmem:[%s4710_s9 + $0x28] sm:$0xff]  ;;  %v1037_v56 = vld [vmem:[%s4710_s9 + $0x78] sm:$0xff] }
 0x393   : > { %v1137_v24 = vadd.f32 %v1136_v8, %v1135_v0  ;;  %v1149_v42 = vadd.f32 %v1148_v23, %v1147_v3  ;;  %v1091_v11 = vadd.f32 %v1090_v51, %v1089_v31  ;;  %v1028_v23 = vld [vmem:[%s4710_s9 + $0x30] sm:$0xff]  ;;  %v1039_v51 = vld [vmem:[%s4710_s9 + $0x88] sm:$0xff] }
 0x394   : > { %v1142_v25 = vrot.slane %v1141_v14, 2  ;;  %v1098_v22 = vrot.slane %v1056_v16, 4  ;;  %v1158_v26 = vrot.slane %v1066_v18, 4  ;;  %v1154_v34 = vrot.slane %v1153_v15, 2 }
 0x395   : > { %v825_v28 = vpop.permute.xlu1 %824  ;;  %v895_v29 = vpop.permute.xlu0 %894  ;;  %v1138_v41 = vrot.slane %v1137_v24, 1  ;;  %v1150_v0 = vrot.slane %v1149_v42, 1 }
 0x396   : > { %v1057_v30 = vmul.f32 %v1025_v19, %v825_v28  ;;  %v1067_v27 = vmul.f32 %v1035_v20, %v895_v29  ;;  %v1143_v33 = vadd.f32 %v1142_v25, %v1141_v14  ;;  %v1099_v32 = vadd.f32 %v1098_v22, %v1056_v16  ;;  %v4896_v14 = vld [vmem:[%s4702_s8 + $0x8] sm:$0xff] }
 0x397   : > { %v1159_v44 = vadd.f32 %v1158_v26, %v1066_v18  ;;  %v1155_v52 = vadd.f32 %v1154_v34, %v1153_v15  ;;  %v1139_v3 = vadd.f32 %v1138_v41, %v1137_v24  ;;  %v4898_v15 = vld [vmem:[#allocation3 + $0x8] sm:$0xff]  ;;  %v708_v16 = vsel %vm4889_vm3, %v4885_v59, %v4887_v60 }
 0x398   : > { %v1104_v37 = vrot.slane %v1057_v30, 4  ;;  %v1144_v43 = vrot.slane %v1143_v33, 1  ;;  %v1100_v47 = vrot.slane %v1099_v32, 2  ;;  %v1164_v48 = vrot.slane %v1067_v27, 4 }
 0x399   : > { %v832_v45 = vpop.permute.xlu1 %831  ;;  %v902_v46 = vpop.permute.xlu0 %901  ;;  %v1160_v1 = vrot.slane %v1159_v44, 2  ;;  %v1156_v12 = vrot.slane %v1155_v52, 1  ;;  %v1097_v24 = vadd.f32 %v1096_v62, %v1095_v38  ;;  %v1151_v25 = vadd.f32 %v1150_v0, %v1149_v42 }
 0x39a   : > { %v1058_v49 = vmul.f32 %v1026_v35, %v832_v45  ;;  %v1068_v50 = vmul.f32 %v1036_v36, %v902_v46  ;;  %v1105_v53 = vadd.f32 %v1104_v37, %v1057_v30  ;;  %v1145_v55 = vadd.f32 %v1144_v43, %v1143_v33  ;;  %v1029_v36 = vld [vmem:[%s4710_s9 + $0x38] sm:$0xff] }
 0x39b   : > { %v1101_v4 = vadd.f32 %v1100_v47, %v1099_v32  ;;  %v1165_v5 = vadd.f32 %v1164_v48, %v1067_v27  ;;  %v1161_v22 = vadd.f32 %v1160_v1, %v1159_v44  ;;  %v709_v31 = vsel %vm4889_vm3, %v4896_v14, %v4898_v15 }
 0x39c   : > { %v1110_v57 = vrot.slane %v1058_v49, 4  ;;  %v1170_v58 = vrot.slane %v1068_v50, 4  ;;  %v1106_v13 = vrot.slane %v1105_v53, 2  ;;  %v1324_v18 = vsel %vm1310_vm1, %v1145_v55, %v1139_v3 }
 0x39d   : > { %v839_v2 = vpop.permute.xlu1 %838  ;;  %v909_v10 = vpop.permute.xlu0 %908  ;;  %v1102_v29 = vrot.slane %v1101_v4, 1  ;;  %v1166_v30 = vrot.slane %v1165_v5, 2  ;;  %v1325_v33 = vsel %vm1312_vm2, %v1151_v25, %v1324_v18  ;;  %v1157_v38 = vadd.f32 %v1156_v12, %v1155_v52  ;;  %v1047_v18 = vld [vmem:[%s4710_s9 + $0xc8] sm:$0xff] }
 0x39e   : > { %v1111_v8 = vadd.f32 %v1110_v57, %v1058_v49  ;;  %v1171_v20 = vadd.f32 %v1170_v58, %v1068_v50  ;;  %v1059_v21 = vmul.f32 %v1027_v54, %v839_v2  ;;  %v1069_v26 = vmul.f32 %v1037_v56, %v909_v10  ;;  %v1038_v58 = vld [vmem:[%s4710_s9 + $0x80] sm:$0xff] }
 0x39f   : > { %v1107_v34 = vadd.f32 %v1106_v13, %v1105_v53  ;;  %v1311_v42 = vsel %vm1310_vm1, %v1097_v24, %v1091_v11  ;;  %v1162_v43 = vrot.slane %v1161_v22, 1  ;;  %v4914_v47 = vsel %vm1314_vm4, %v1157_v38, %v1325_v33  ;;  %v1046_v24 = vld [vmem:[%s4710_s9 + $0xc0] sm:$0xff] }
 0x3a0   : > { %v1112_v19 = vrot.slane %v1111_v8, 2  ;;  %v1116_v27 = vrot.slane %v1059_v21, 4  ;;  %v1176_v32 = vrot.slane %v1069_v26, 4  ;;  %v1172_v40 = vrot.slane %v1171_v20, 2 }
 0x3a1   : > { %v846_v28 = vpop.permute.xlu1 %845  ;;  %v1167_v48 = vadd.f32 %v1166_v30, %v1165_v5  ;;  %v1103_v53 = vadd.f32 %v1102_v29, %v1101_v4  ;;  %v1108_v55 = vrot.slane %v1107_v34, 1  ;;  %v1163_v3 = vadd.f32 %v1162_v43, %v1161_v22 }
 0x3a2   : > { %v1060_v35 = vmul.f32 %v1028_v23, %v846_v28  ;;  %v1113_v37 = vadd.f32 %v1112_v19, %v1111_v8  ;;  %v1117_v41 = vadd.f32 %v1116_v27, %v1059_v21  ;;  %v1177_v44 = vadd.f32 %v1176_v32, %v1069_v26  ;;  %v923_v2 = vpop.permute.xlu0 %922 }
 0x3a3   : > { %v1173_v0 = vadd.f32 %v1172_v40, %v1171_v20  ;;  %v1071_v5 = vmul.f32 %v1039_v51, %v923_v2  ;;  %v1168_v11 = vrot.slane %v1167_v48, 1  ;;  %v1313_v19 = vsel %vm1312_vm2, %v1103_v53, %v1311_v42  ;;  %v1040_v53 = vld [vmem:[%s4710_s9 + $0x90] sm:$0xff]  ;;  %v1049_v2 = vld [vmem:[%s4710_s9 + $0xd8] sm:$0xff] }
 0x3a4   : > { %v1122_v45 = vrot.slane %v1060_v35, 4  ;;  %v1118_v49 = vrot.slane %v1117_v41, 2  ;;  %v1178_v52 = vrot.slane %v1177_v44, 2  ;;  %v1114_v62 = vrot.slane %v1113_v37, 1 }
 0x3a5   : > { %v853_v46 = vpop.permute.xlu1 %852  ;;  %v1109_v20 = vadd.f32 %v1108_v55, %v1107_v34  ;;  %v1188_v23 = vrot.slane %v1071_v5, 4  ;;  %v1174_v22 = vrot.slane %v1173_v0, 1  ;;  %v1169_v42 = vadd.f32 %v1168_v11, %v1167_v48 }
 0x3a6   : > { %v1061_v50 = vmul.f32 %v1029_v36, %v853_v46  ;;  %v1123_v57 = vadd.f32 %v1122_v45, %v1060_v35  ;;  %v1119_v1 = vadd.f32 %v1118_v49, %v1117_v41  ;;  %v1179_v8 = vadd.f32 %v1178_v52, %v1177_v44  ;;  %v979_v29 = vpop.permute.xlu0 %978  ;;  %v1048_v44 = vld [vmem:[%s4710_s9 + $0xd0] sm:$0xff] }
 0x3a7   : > { %v1115_v25 = vadd.f32 %v1114_v62, %v1113_v37  ;;  %v1189_v33 = vadd.f32 %v1188_v23, %v1071_v5  ;;  %v1079_v32 = vmul.f32 %v1047_v18, %v979_v29  ;;  %v1315_v34 = vsel %vm1314_vm4, %v1109_v20, %v1313_v19 }
 0x3a8   : > { %v1128_v54 = vrot.slane %v1061_v50, 4  ;;  %v1124_v56 = vrot.slane %v1123_v57, 2  ;;  %v1120_v4 = vrot.slane %v1119_v1, 1  ;;  %v1180_v30 = vrot.slane %v1179_v8, 1 }
 0x3a9   : > { %v916_v10 = vpop.permute.xlu1 %915  ;;  %v1236_v37 = vrot.slane %v1079_v32, 4  ;;  %v1190_v46 = vrot.slane %v1189_v33, 2  ;;  %v1175_v55 = vadd.f32 %v1174_v22, %v1173_v0  ;;  %v1317_v62 = vsel %vm1316_vm5, %v1115_v25, %v1315_v34 }
 0x3aa   : > { %v1129_v12 = vadd.f32 %v1128_v54, %v1061_v50  ;;  %v1070_v13 = vmul.f32 %v1038_v58, %v916_v10  ;;  %v1125_v21 = vadd.f32 %v1124_v56, %v1123_v57  ;;  %v1121_v36 = vadd.f32 %v1120_v4, %v1119_v1  ;;  %v986_v51 = vpop.permute.xlu0 %985  ;;  %v1041_v10 = vld [vmem:[%s4710_s9 + $0x98] sm:$0xff] }
 0x3ab   : > { %v1181_v52 = vadd.f32 %v1180_v30, %v1179_v8  ;;  %v1237_v57 = vadd.f32 %v1236_v37, %v1079_v32  ;;  %v1080_v48 = vmul.f32 %v1048_v44, %v986_v51  ;;  %v1327_v4 = vsel %vm1316_vm5, %v1163_v3, %v4914_v47  ;;  %v1050_v30 = vld [vmem:[%s4710_s9 + $0xe0] sm:$0xff]  ;;  %v1043_v37 = vld [vmem:[%s4710_s9 + $0xa8] sm:$0xff] }
 0x3ac   : > { %v1130_v26 = vrot.slane %v1129_v12, 2  ;;  %v1182_v28 = vrot.slane %v1070_v13, 4  ;;  %v1126_v27 = vrot.slane %v1125_v21, 1  ;;  %v1319_v56 = vsel %vm1318_vm6, %v1121_v36, %v1317_v62  ;;  %v3696_v36 = vld [vmem:[#allocation16 + $0x1c] ss:$12 sps:$4 sm:$0xff]  }
 0x3ad   : > { %v972_v35 = vpop.permute.xlu1 %971  ;;  %v1191_v0 = vadd.f32 %v1190_v46, %v1189_v33  ;;  %v1328_v18 = vsel %vm1318_vm6, %v1169_v42, %v1327_v4  ;;  %v1238_v19 = vrot.slane %v1237_v57, 2  ;;  %v1349_v47 = vpack.c.bf16 %v709_v31, %v708_v16  ;;  %v3721_v16 = vld [vmem:[#allocation16 + $0x20] ss:$12 sps:$4 sm:$0xff]   ;;  %v3694_v44 = vld [vmem:[#allocation16 + $0x18] ss:$12 sps:$4 sm:$0xff]  }
 0x3ae   : > { %v1131_v38 = vadd.f32 %v1130_v26, %v1129_v12  ;;  %v1183_v40 = vadd.f32 %v1182_v28, %v1070_v13  ;;  %v1078_v41 = vmul.f32 %v1046_v24, %v972_v35  ;;  %v1127_v43 = vadd.f32 %v1126_v27, %v1125_v21  ;;  %v993_v12 = vpop.permute.xlu0 %992  ;;  %v3689_v27 = vld [vmem:[#allocation16] ss:$12 sps:$4 sm:$0xff]   ;;  %v3725_v62 = vld [vmem:[#allocation16 + $0x38] ss:$12 sps:$4 sm:$0xff]  }
 0x3af   : > { %v1081_v20 = vmul.f32 %v1049_v2, %v993_v12  ;;  %v1329_v23 = vsel %vm1320_vm7, %v1175_v55, %v1328_v18  ;;  %v1242_v24 = vrot.slane %v1080_v48, 4  ;;  %v1192_v33 = vrot.slane %v1191_v0, 1  ;;  %v1042_v35 = vld [vmem:[%s4710_s9 + $0xa0] sm:$0xff] }
 0x3b0   : > { %v1132_v45 = vrot.slane %v1131_v38, 1  ;;  %v1184_v49 = vrot.slane %v1183_v40, 2  ;;  %v1230_v50 = vrot.slane %v1078_v41, 4  ;;  %v1321_v11 = vsel %vm1320_vm7, %v1127_v43, %v1319_v56  ;;  %v1052_v56 = vld [vmem:[%s4710_s9 + $0xf0] sm:$0xff] }
 0x3b1   : > { %v930_v58 = vpop.permute.xlu1 %929  ;;  %v1330_v22 = vsel %vm1322_vm8, %v1181_v52, %v1329_v23  ;;  %v1248_v28 = vrot.slane %v1081_v20, 4  ;;  %v1239_v14 = vadd.f32 %v1238_v19, %v1237_v57 }
 0x3b2   : > { %v1133_v1 = vadd.f32 %v1132_v45, %v1131_v38  ;;  %v1231_v54 = vadd.f32 %v1230_v50, %v1078_v41  ;;  %v1072_v5 = vmul.f32 %v1040_v53, %v930_v58  ;;  %v1185_v8 = vadd.f32 %v1184_v49, %v1183_v40  ;;  %v1000_v60 = vpop.permute.xlu0 %999  ;;  %v1051_v41 = vld [vmem:[%s4710_s9 + $0xe8] sm:$0xff]  ;;  %v3701_v53 = vld [vmem:[#allocation16 + $0x34] ss:$12 sps:$4 sm:$0xff]  }
 0x3b3   : > { %v1243_v38 = vadd.f32 %v1242_v24, %v1080_v48  ;;  %v1082_v40 = vmul.f32 %v1050_v30, %v1000_v60  ;;  %v1249_v42 = vadd.f32 %v1248_v28, %v1081_v20  ;;  %v1193_v45 = vadd.f32 %v1192_v33, %v1191_v0  ;;  %v1044_v0 = vld [vmem:[%s4710_s9 + $0xb0] sm:$0xff]  ;;  %v3706_v20 = vld [vmem:[#allocation16 + $0x4c] ss:$12 sps:$4 sm:$0xff]  }
 0x3b4   : > { %v1323_v13 = vsel %vm1322_vm8, %v1133_v1, %v1321_v11  ;;  %v1232_v3 = vrot.slane %v1231_v54, 2  ;;  %v1194_v26 = vrot.slane %v1072_v5, 4  ;;  %v1186_v32 = vrot.slane %v1185_v8, 1  ;;  %v1053_v30 = vld [vmem:[%s4710_s9 + $0xf8] sm:$0xff] }
 0x3b5   : > { %v937_v21 = vpop.permute.xlu1 %936  ;;  %v1350_v29 = vpack.c.bf16 %v1330_v22, %v1323_v13  ;;  %v1254_v50 = vrot.slane %v1082_v40, 4  ;;  %v1240_v55 = vrot.slane %v1239_v14, 1  ;;  %v1045_v60 = vld [vmem:[%s4710_s9 + $0xb8] sm:$0xff] }
 0x3b6   : > { %v1073_v25 = vmul.f32 %v1041_v10, %v937_v21  ;;  %v1233_v31 = vadd.f32 %v1232_v3, %v1231_v54  ;;  %v1195_v34 = vadd.f32 %v1194_v26, %v1072_v5  ;;  %v1187_v46 = vadd.f32 %v1186_v32, %v1185_v8  ;;  %v1007_v51 = vpop.permute.xlu0 %1006  ;;  %v3699_v8 = vld [vmem:[#allocation16 + $0x30] ss:$12 sps:$4 sm:$0xff]  }
 0x3b7   : > { %1722 = vmatprep.mubr.bf16.mxu0 %v1350_v29  ;;  %1775 = vmatprep.mubr.bf16.mxu1 %v1350_v29  ;;  %v1083_v57 = vmul.f32 %v1051_v41, %v1007_v51  ;;  %v1244_v54 = vrot.slane %v1243_v38, 2  ;;  %v1255_v48 = vadd.f32 %v1254_v50, %v1082_v40  ;;  %v1250_v10 = vrot.slane %v1249_v42, 2  ;;  %v3711_v41 = vld [vmem:[#allocation16 + $0x64] ss:$12 sps:$4 sm:$0xff]  }
 0x3b8   : > { %v1200_v59 = vrot.slane %v1073_v25, 4  ;;  %1723 = vmatmul.mubr.bf16.vlgmr.msra.gmra.mrb[0].mxu0 %v1349_v47  ;;  %1776 = vmatmul.mubr.bf16.vlgmr.msra.gmra.mrb[0].mxu1 %v1349_v47  ;;  %v1234_v1 = vrot.slane %v1233_v31, 1  ;;  %v1196_v5 = vrot.slane %v1195_v34, 2  ;;  %v4955_v21 = vadd.f32 %v1240_v55, %v1239_v14 }
 0x3b9   : > { %v944_v15 = vpop.permute.xlu1 %943  ;;  %1972 = vmatpush1.bf16.msra.mxu0 %v3689_v27  ;;  %3359 = vmatpush3.bf16.msra.mxu1 %v4860_v39  ;;  %v1260_v4 = vrot.slane %v1083_v57, 4  ;;  %v4953_v39 = vsel %vm1310_vm1, %v1193_v45, %v1187_v46  ;;  %v1256_v13 = vrot.slane %v1255_v48, 2  ;;  %v1245_v26 = vadd.f32 %v1244_v54, %v1243_v38  ;;  %v3716_v54 = vld [vmem:[#allocation16 + $0x7c] ss:$12 sps:$4 sm:$0xff]  }
 0x3ba   : > { %v1074_v43 = vmul.f32 %v1042_v35, %v944_v15  ;;  %v1201_v49 = vadd.f32 %v1200_v59, %v1073_v25  ;;  %1973 = vmatprep.subr.bf16.mxu0 %v3696_v36  ;;  %3360 = vmatprep.subr.bf16.mxu1 %v3721_v16  ;;  %v1014_v19 = vpop.permute.xlu0 %1013  ;;  %v3726_v25 = vld [vmem:[#allocation16 + $0x50] ss:$12 sps:$4 sm:$0xff]   ;;  %v4957_v22 = vadd.f32 %v1234_v1, %v1233_v31  ;;  %v3704_v35 = vld [vmem:[#allocation16 + $0x48] ss:$12 sps:$4 sm:$0xff]  }
 0x3bb   : > { %v1261_v47 = vadd.f32 %v1260_v4, %v1083_v57  ;;  %v1084_v3 = vmul.f32 %v1052_v56, %v1014_v19  ;;  %v1197_v27 = vadd.f32 %v1196_v5, %v1195_v34  ;;  %v1251_v33 = vadd.f32 %v1250_v10, %v1249_v42  ;;  %v3727_v34 = vld [vmem:[#allocation16 + $0x68] ss:$12 sps:$4 sm:$0xff]   ;;  %v3728_v10 = vld [vmem:[#allocation16 + $0x80] ss:$12 sps:$4 sm:$0xff]  }
 0x3bc   : > { %v1206_v52 = vrot.slane %v1074_v43, 4  ;;  %v1202_v12 = vrot.slane %v1201_v49, 2  ;;  %v1257_v14 = vadd.f32 %v1256_v13, %v1255_v48  ;;  %v1246_v42 = vrot.slane %v1245_v26, 1 }
 0x3bd   : > { %v951_v58 = vpop.permute.xlu1 %950  ;;  %1974 = vmatpush1.bf16.msra.mxu0 %v3694_v44  ;;  %3361 = vmatpush3.bf16.msra.mxu1 %v3721_v16  ;;  %v1262_v32 = vrot.slane %v1261_v47, 2  ;;  %v1266_v59 = vrot.slane %v1084_v3, 4  ;;  %v1198_v51 = vrot.slane %v1197_v27, 1 }
 0x3be   : > { %v1075_v2 = vmul.f32 %v1043_v37, %v951_v58  ;;  %v1207_v11 = vadd.f32 %v1206_v52, %v1074_v43  ;;  %1975 = vmatprep.subr.bf16.mxu0 %v3701_v53  ;;  %3362 = vmatprep.subr.bf16.mxu1 %v3725_v62  ;;  %v1203_v36 = vadd.f32 %v1202_v12, %v1201_v49  ;;  %v1021_v40 = vpop.permute.xlu0 %1020  ;;  %v1252_v49 = vrot.slane %v1251_v33, 1  ;;  %v3709_v52 = vld [vmem:[#allocation16 + $0x60] ss:$12 sps:$4 sm:$0xff]  }
 0x3bf   : > { %v1263_v38 = vadd.f32 %v1262_v32, %v1261_v47  ;;  %v1267_v43 = vadd.f32 %v1266_v59, %v1084_v3  ;;  %v1085_v37 = vmul.f32 %v1053_v30, %v1021_v40  ;;  %v1258_v58 = vrot.slane %v1257_v14, 1  ;;  %v3729_v32 = vld [vmem:[#allocation16 + $0x98] ss:$12 sps:$4 sm:$0xff]  }
 0x3c0   : > { %v1212_v18 = vrot.slane %v1075_v2, 4  ;;  %v1208_v23 = vrot.slane %v1207_v11, 2  ;;  %v1204_v57 = vrot.slane %v1203_v36, 1  ;;  %v1199_v12 = vadd.f32 %v1198_v51, %v1197_v27  ;;  %v699_v27 = vld [vmem:[%s4702_s8 + $0x10] sm:$0xff] }
 0x3c1   : > { %v958_v24 = vpop.permute.xlu1 %957  ;;  %1976 = vmatpush1.bf16.msra.mxu0 %v3699_v8  ;;  %3363 = vmatpush3.bf16.msra.mxu1 %v3725_v62  ;;  %v1268_v53 = vrot.slane %v1267_v43, 2  ;;  %v1272_v55 = vrot.slane %v1085_v37, 4  ;;  %v1253_v13 = vadd.f32 %v1252_v49, %v1251_v33  ;;  %v1259_v47 = vadd.f32 %v1258_v58, %v1257_v14  ;;  %v703_v33 = vld [vmem:[#allocation3 + $0x10] sm:$0xff]  ;;  %v700_v14 = vld [vmem:[%s4702_s8 + $0x18] sm:$0xff] }
 0x3c2   : > { %v1213_v28 = vadd.f32 %v1212_v18, %v1075_v2  ;;  %v1076_v29 = vmul.f32 %v1044_v0, %v958_v24  ;;  %1977 = vmatprep.subr.bf16.mxu0 %v3706_v20  ;;  %v1209_v31 = vadd.f32 %v1208_v23, %v1207_v11  ;;  %3364 = vmatprep.subr.bf16.mxu1 %v3726_v25  ;;  %v1264_v2 = vrot.slane %v1263_v38, 1  ;;  %v3714_v20 = vld [vmem:[#allocation16 + $0x78] ss:$12 sps:$4 sm:$0xff]  }
 0x3c3   : > { %v1269_v56 = vadd.f32 %v1268_v53, %v1267_v43  ;;  %v1273_v5 = vadd.f32 %v1272_v55, %v1085_v37  ;;  %v1247_v11 = vadd.f32 %v1246_v42, %v1245_v26  ;;  %v1205_v23 = vadd.f32 %v1204_v57, %v1203_v36 }
 0x3c4   : > { %v1214_v15 = vrot.slane %v1213_v28, 2  ;;  %v1218_v16 = vrot.slane %v1076_v29, 4  ;;  %v1210_v48 = vrot.slane %v1209_v31, 1  ;;  %v1338_v26 = vsel %vm1310_vm1, %v4955_v21, %v4957_v22 }
 0x3c5   : > { %v965_v44 = vpop.permute.xlu1 %964  ;;  %1978 = vmatpush1.bf16.msra.mxu0 %v3704_v35  ;;  %3365 = vmatpush3.bf16.msra.mxu1 %v3726_v25  ;;  %v1270_v18 = vrot.slane %v1269_v56, 1  ;;  %v1274_v19 = vrot.slane %v1273_v5, 2  ;;  %v3720_v25 = vld [vmem:[#allocation16 + $0x94] ss:$12 sps:$4 sm:$0xff]   ;;  %v1339_v59 = vsel %vm1312_vm2, %v1247_v11, %v1338_v26  ;;  %v710_v37 = vsel %vm4889_vm3, %v699_v27, %v703_v33  ;;  %v3736_v11 = vld [vmem:[#allocation17 + $0x1c] ss:$12 sps:$4 sm:$0xff]  }
 0x3c6   : > { %v1215_v45 = vadd.f32 %v1214_v15, %v1213_v28  ;;  %v1219_v46 = vadd.f32 %v1218_v16, %v1076_v29  ;;  %v1077_v50 = vmul.f32 %v1045_v60, %v965_v44  ;;  %1979 = vmatprep.subr.bf16.mxu0 %v3711_v41  ;;  %3366 = vmatprep.subr.bf16.mxu1 %v3727_v34  ;;  %v704_v15 = vld [vmem:[#allocation3 + $0x18] sm:$0xff]  ;;  %v3760_v27 = vld [vmem:[#allocation17 + $0x80] ss:$12 sps:$4 sm:$0xff]  }
 0x3c7   : > { %v1211_v28 = vadd.f32 %v1210_v48, %v1209_v31  ;;  %v1265_v29 = vadd.f32 %v1264_v2, %v1263_v38  ;;  %v1275_v30 = vadd.f32 %v1274_v19, %v1273_v5  ;;  %v1271_v35 = vadd.f32 %v1270_v18, %v1269_v56  ;;  %v3718_v41 = vld [vmem:[#allocation16 + $0x90] ss:$12 sps:$4 sm:$0xff]   ;;  %v3724_v44 = vld [vmem:[#allocation16 + $0xac] ss:$12 sps:$4 sm:$0xff]   ;;  %v3741_v19 = vld [vmem:[#allocation17 + $0x48] ss:$12 sps:$4 sm:$0xff]  }
 0x3c8   : > { %v1220_v62 = vrot.slane %v1219_v46, 2  ;;  %v1224_v1 = vrot.slane %v1077_v50, 4  ;;  %v1216_v4 = vrot.slane %v1215_v45, 1  ;;  %v1332_v16 = vsel %vm1312_vm2, %v1199_v12, %v4953_v39  ;;  %v4990_v48 = vld [vmem:[#allocation2 + $0x18] sm:$0xff]  ;;  %v4992_v2 = vld [vmem:[#allocation2 + $0x10] sm:$0xff] }
 0x3c9   : > { %1980 = vmatpush1.bf16.msra.mxu0 %v3709_v52  ;;  %3367 = vmatpush3.bf16.msra.mxu1 %v3727_v34  ;;  %v1340_v40 = vsel %vm1314_vm4, %v1253_v13, %v1339_v59  ;;  %v1276_v22 = vrot.slane %v1275_v30, 1  ;;  %v1333_v31 = vsel %vm1314_vm4, %v1205_v23, %v1332_v16  ;;  %v1793_v56 = vpack.c.bf16 %v4990_v48, %v4992_v2  ;;  %v3733_v5 = vld [vmem:[#allocation17 + $0x4] ss:$12 sps:$4 sm:$0xff]   ;;  %v3743_v13 = vld [vmem:[#allocation17 + $0x4c] ss:$12 sps:$4 sm:$0xff]  }
 0x3ca   : > { %v1221_v0 = vadd.f32 %v1220_v62, %v1219_v46  ;;  %v1225_v8 = vadd.f32 %v1224_v1, %v1077_v50  ;;  %1981 = vmatprep.subr.bf16.mxu0 %v3716_v54  ;;  %3368 = vmatprep.subr.bf16.mxu1 %v3728_v10  ;;  %v1217_v60 = vadd.f32 %v1216_v4, %v1215_v45  ;;  %v3730_v46 = vld [vmem:[#allocation16 + $0xb0] ss:$12 sps:$4 sm:$0xff]   ;;  %v4985_v1 = vld [vmem:[#allocation2 + $0x8] sm:$0xff]  ;;  %v3755_v26 = vld [vmem:[#allocation17 + $0x94] ss:$12 sps:$4 sm:$0xff]  }
 0x3cb   : > { %v1341_v38 = vsel %vm1316_vm5, %v1259_v47, %v1340_v40  ;;  %v1334_v34 = vsel %vm1316_vm5, %v1211_v28, %v1333_v31  ;;  %v1277_v39 = vadd.f32 %v1276_v22, %v1275_v30  ;;  %v711_v45 = vsel %vm4889_vm3, %v700_v14, %v704_v15  ;;  %v4983_v62 = vld [vmem:[#allocation2] sm:$0xff]  ;;  %v3756_v28 = vld [vmem:[#allocation17 + $0x68] ss:$12 sps:$4 sm:$0xff]   ;;  %v3759_v30 = vld [vmem:[#allocation17 + $0xac] ss:$12 sps:$4 sm:$0xff]  }
 0x3cc   : > { %v1222_v3 = vrot.slane %v1221_v0, 1  ;;  %v1226_v24 = vrot.slane %v1225_v8, 2  ;;  %v1342_v42 = vsel %vm1318_vm6, %v1265_v29, %v1341_v38  ;;  %v1335_v51 = vsel %vm1318_vm6, %v1217_v60, %v1334_v34  ;;  %v3734_v4 = vld [vmem:[#allocation17 + $0x18] ss:$12 sps:$4 sm:$0xff]   ;;  %v3737_v12 = vld [vmem:[#allocation17 + $0x30] ss:$12 sps:$4 sm:$0xff]  }
 0x3cd   : > { %1982 = vmatpush1.bf16.msra.mxu0 %v3714_v20  ;;  %3369 = vmatpush3.bf16.msra.mxu1 %v3728_v10  ;;  %v1343_v49 = vsel %vm1320_vm7, %v1271_v35, %v1342_v42  ;;  %v1351_v57 = vpack.c.bf16 %v711_v45, %v710_v37  ;;  %v1792_v54 = vpack.c.bf16 %v4985_v1, %v4983_v62  ;;  %v3731_v10 = vld [vmem:[#allocation17] ss:$12 sps:$4 sm:$0xff]   ;;  %v3747_v20 = vld [vmem:[#allocation17 + $0x64] ss:$12 sps:$4 sm:$0xff]   ;;  %v3757_v33 = vld [vmem:[#allocation17 + $0xa8] ss:$12 sps:$4 sm:$0xff]  }
 0x3ce   : > { %v1227_v36 = vadd.f32 %v1226_v24, %v1225_v8  ;;  %v1223_v21 = vadd.f32 %v1222_v3, %v1221_v0  ;;  %1983 = vmatprep.subr.bf16.mxu0 %v3720_v25  ;;  %3370 = vmatprep.subr.bf16.mxu1 %v3729_v32  ;;  %v1344_v55 = vsel %vm1322_vm8, %v1277_v39, %v1343_v49  ;;  %v3739_v0 = vld [vmem:[#allocation17 + $0x34] ss:$12 sps:$4 sm:$0xff]   ;;  %v3748_v23 = vld [vmem:[#allocation17 + $0x38] ss:$12 sps:$4 sm:$0xff]   ;;  %v3751_v3 = vld [vmem:[#allocation17 + $0x7c] ss:$12 sps:$4 sm:$0xff]  }
 0x3cf   : > { %v3740_v8 = vld [vmem:[#allocation17 + $0x8] ss:$12 sps:$4 sm:$0xff]   ;;  %v3744_v18 = vld [vmem:[#allocation17 + $0x20] ss:$12 sps:$4 sm:$0xff]   ;;  %v3752_v24 = vld [vmem:[#allocation17 + $0x50] ss:$12 sps:$4 sm:$0xff]  }
 0x3d0   : > { %v1228_v43 = vrot.slane %v1227_v36, 1  ;;  %v1336_v53 = vsel %vm1320_vm7, %v1223_v21, %v1335_v51  ;;  %v3745_v47 = vld [vmem:[#allocation17 + $0x60] ss:$12 sps:$4 sm:$0xff]   ;;  %v3749_v25 = vld [vmem:[#allocation17 + $0x78] ss:$12 sps:$4 sm:$0xff]  }
 0x3d1   : > { %1984 = vmatpush1.bf16.msra.mxu0 %v3718_v41  ;;  %3371 = vmatpush3.bf16.msra.mxu1 %v3729_v32  ;;  %v3753_v29 = vld [vmem:[#allocation17 + $0x90] ss:$12 sps:$4 sm:$0xff]   ;;  %v3761_v32 = vld [vmem:[#allocation17 + $0x98] ss:$12 sps:$4 sm:$0xff]  }
 0x3d2   : > { %v1229_v50 = vadd.f32 %v1228_v43, %v1227_v36  ;;  %1985 = vmatprep.subr.bf16.mxu0 %v3724_v44  ;;  %3372 = vmatprep.subr.bf16.mxu1 %v3730_v46  ;;  %v3762_v59 = vld [vmem:[#allocation17 + $0xb0] ss:$12 sps:$4 sm:$0xff]  }
 0x3d3   : > { %v1826_v40 = vld [vmem:[%s5304_s3] sm:$0x7] }
 0x3d4   : > { %v1337_v52 = vsel %vm1322_vm8, %v1229_v50, %v1336_v53  ;;  %v1417_v21 = vld [vmem:[%s5305_s11] sm:$0x7]  ;;  %v1831_v31 = vrot.slane %v1826_v40, %v4776_v7  ;;  %v1835_v39 = vrot.slane %v1826_v40, %v4773_v6 }
 0x3d5   : > { %v1352_v58 = vpack.c.bf16 %v1344_v55, %v1337_v52  ;;  %1986 = vmatpush1.bf16.msra.mxu0 %v3722_v61  ;;  %3373 = vmatpush3.bf16.msra.mxu1 %v3730_v46  ;;  %v1422_v41 = vrot.slane %v1417_v21, %v4776_v7  ;;  %v1426_v34 = vrot.slane %v1417_v21, %v4773_v6 }
 0x3d6   : > { %2336 = vmatprep.subr.bf16.mxu1 %v3733_v5  ;;  %3378 = vmatprep.subr.bf16.mxu0 %v3740_v8 }
 0x3d7   : > { %1732 = vmatprep.mubr.bf16.mxu0 %v1352_v58  ;;  %1783 = vmatprep.mubr.bf16.mxu1 %v1352_v58  ;;  %v3418_v45 = vadd.f32 %v1831_v31, %v1422_v41  ;;  %v3420_v50 = vadd.f32 %v1835_v39, %v1426_v34 }
 0x3d8   : > { %1733 = vmatmul.mubr.bf16.gmra.mrb[4].mxu0 %v1351_v57  ;;  %1784 = vmatmul.mubr.bf16.gmra.mrb[4].mxu1 %v1351_v57 }
 0x3d9   : > { %2003 = vmatprep.mubr.bf16.mxu0 %v4223_v9  ;;  %3374 = vmatprep.mubr.bf16.mxu1 %v1792_v54 }
 0x3e0   : > { %2004 = vmatmul.mubr.bf16.vlgmr.msra.gmra.mrb[0].mxu0 %v1792_v54  ;;  %3375 = vmatmul.mubr.bf16.vlgmr.msra.gmra.mrb[8].mxu1 %v1793_v56 }
 0x3e1   : > { %2013 = vmatprep.mubr.bf16.mxu0 %v4223_v9  ;;  %2368 = vmatprep.mubr.bf16.mxu1 %v4223_v9 }
 0x3e2   : > { %2337 = vmatpush1.bf16.msra.mxu1 %v3731_v10  ;;  %3379 = vmatpush3.bf16.msra.mxu0 %v3740_v8 }
 0x3e3   : > { %2338 = vmatprep.subr.bf16.mxu1 %v3736_v11  ;;  %3380 = vmatprep.subr.bf16.mxu0 %v3744_v18 }
 0x3e6   : > { %2339 = vmatpush1.bf16.msra.mxu1 %v3734_v4  ;;  %3381 = vmatpush3.bf16.msra.mxu0 %v3744_v18 }
 0x3e7   : > { %2340 = vmatprep.subr.bf16.mxu1 %v3739_v0  ;;  %3382 = vmatprep.subr.bf16.mxu0 %v3748_v23 }
 0x3e8   : > { %2014 = vmatmul.mubr.bf16.gmra.mrb[4].mxu0 %v1793_v56 }
 0x3ea   : > { %2341 = vmatpush1.bf16.msra.mxu1 %v3737_v12  ;;  %3383 = vmatpush3.bf16.msra.mxu0 %v3748_v23 }
 0x3eb   : > { %2342 = vmatprep.subr.bf16.mxu1 %v3743_v13  ;;  %3384 = vmatprep.subr.bf16.mxu0 %v3752_v24 }
 0x3ee   : > { %2343 = vmatpush1.bf16.msra.mxu1 %v3741_v19  ;;  %3385 = vmatpush3.bf16.msra.mxu0 %v3752_v24 }
 0x3ef   : > { %2344 = vmatprep.subr.bf16.mxu1 %v3747_v20  ;;  %3386 = vmatprep.subr.bf16.mxu0 %v3756_v28 }
 0x3f2   : > { %2345 = vmatpush1.bf16.msra.mxu1 %v3745_v47  ;;  %3387 = vmatpush3.bf16.msra.mxu0 %v3756_v28 }
 0x3f3   : > { %2346 = vmatprep.subr.bf16.mxu1 %v3751_v3  ;;  %3388 = vmatprep.subr.bf16.mxu0 %v3760_v27 }
 0x3f6   : > { %2347 = vmatpush1.bf16.msra.mxu1 %v3749_v25  ;;  %3389 = vmatpush3.bf16.msra.mxu0 %v3760_v27 }
 0x3f7   : > { %2348 = vmatprep.subr.bf16.mxu1 %v3755_v26  ;;  %3390 = vmatprep.subr.bf16.mxu0 %v3761_v32 }
 0x3fa   : > { %2349 = vmatpush1.bf16.msra.mxu1 %v3753_v29  ;;  %3391 = vmatpush3.bf16.msra.mxu0 %v3761_v32 }
 0x3fb   : > { %2350 = vmatprep.subr.bf16.mxu1 %v3759_v30  ;;  %3392 = vmatprep.subr.bf16.mxu0 %v3762_v59 }
 0x3fe   : > { %2351 = vmatpush1.bf16.msra.mxu1 %v3757_v33  ;;  %3393 = vmatpush3.bf16.msra.mxu0 %v3762_v59  ;;  %v1839_v33 = vrot.slane %v1826_v40, %v4785_v17 }
 0x48b   : > { %v3288_v60 = vpop.f32.mrb[0].mxu1 }
 0x48c   : > { %v3289_v35 = vpop.f32.mrb[1].mxu1 }
 0x48d   : > { %v4998_v36 = vadd.f32 %v3289_v35, %v3288_v60  ;;  %v3291_v14 = vpop.f32.mrb[2].mxu1 }
 0x48e   : > { %v3292_v15 = vpop.f32.mrb[3].mxu1 }
 0x48f   : > { %v5000_v16 = vadd.f32 %v3292_v15, %v3291_v14  ;;  %v1430_v15 = vrot.slane %v1417_v21, %v4785_v17 }
 0x491   : > { %v1778_v34 = vadd.f32 %v4998_v36, %v1430_v15 }
 0x4ab   : > { %v3294_v22 = vpop.f32.mrb[4].mxu1 }
 0x4ac   : > { %v3295_v38 = vpop.f32.mrb[5].mxu1 }
 0x4ad   : > { %v5010_v43 = vadd.f32 %v3295_v38, %v3294_v22  ;;  %v3297_v37 = vpop.f32.mrb[6].mxu1 }
 0x4ae   : > { %v3298_v44 = vpop.f32.mrb[7].mxu1 }
 0x4af   : > { %v5014_v42 = vadd.f32 %v3298_v44, %v3297_v37  ;;  %v1786_v36 = vadd.f32 %v5010_v43, %v1430_v15 }
 0x4b3   : > { %v2005_v46 = vpop.f32.mrb[0].mxu0  ;;  %v5016_v51 = vpop.f32.mrb[8].mxu1 }
 0x4b4   : > { %v3419_v49 = vadd.f32 %v3418_v45, %v2005_v46  ;;  %v2007_v53 = vpop.f32.mrb[1].mxu0  ;;  %v2058_v55 = vpop.f32.mrb[9].mxu1  ;;  %v1781_v46 = vadd.f32 %v5000_v16, %v1430_v15 }
 0x4b5   : > { %v2009_v52 = vpop.f32.mrb[2].mxu0  ;;  %v5018_v57 = vpop.f32.mrb[10].mxu1  ;;  %v3421_v5 = vadd.f32 %v3420_v50, %v2007_v53  ;;  %v2059_v41 = vadd.f32 %v2058_v55, %v1839_v33 }
 0x4b6   : > { %v3198_v58 = vmul.f32 -1.442695, %v3419_v49  ;;  %v3423_v61 = vadd.f32 %v3418_v45, %v2009_v52  ;;  %v2011_v54 = vpop.f32.mrb[3].mxu0  ;;  %v2061_v56 = vpop.f32.mrb[11].mxu1 }
 0x4b7   : > { %v3425_v11 = vadd.f32 %v3420_v50, %v2011_v54  ;;  %v3202_v4 = vmul.f32 -1.442695, %v3421_v5  ;;  %v2062_v39 = vadd.f32 %v2061_v56, %v1839_v33  ;;  %v2070_v56 = vadd.f32 %v5018_v57, %v1839_v33 }
 0x4b8   : > { %3779 = vpow2.f32 %v3198_v58  ;;  %v3199_v10 = vmul.f32 -1.442695, %v3423_v61  ;;  %v2067_v58 = vadd.f32 %v5016_v51, %v1839_v33 }
 0x4b9   : > { %v3203_v13 = vmul.f32 -1.442695, %v3425_v11 }
 0x4ba   : > { %3781 = vpow2.f32 %v3199_v10  ;;  %v1789_v10 = vadd.f32 %v5014_v42, %v1430_v15 }
 0x4bb   : > { %v2015_v0 = vpop.f32.mrb[4].mxu0  ;;  %3783 = vpow2.f32 %v3202_v4 }
 0x4bc   : > { %v3427_v8 = vadd.f32 %v3418_v45, %v2015_v0  ;;  %v2017_v12 = vpop.f32.mrb[5].mxu0 }
 0x4bd   : > { %v2019_v18 = vpop.f32.mrb[6].mxu0  ;;  %v3429_v20 = vadd.f32 %v3420_v50, %v2017_v12 }
 0x4be   : > { %v3200_v19 = vmul.f32 -1.442695, %v3427_v8  ;;  %v3431_v23 = vadd.f32 %v3418_v45, %v2019_v18  ;;  %v2021_v47 = vpop.f32.mrb[7].mxu0 }
 0x4bf   : > { %v3433_v24 = vadd.f32 %v3420_v50, %v2021_v47  ;;  %v3204_v26 = vmul.f32 -1.442695, %v3429_v20 }
 0x4c0   : > { %3785 = vpow2.f32 %v3200_v19  ;;  %v3201_v3 = vmul.f32 -1.442695, %v3431_v23 }
 0x4c1   : > { %3787 = vpow2.f32 %v3203_v13  ;;  %v3205_v27 = vmul.f32 -1.442695, %v3433_v24 }
 0x4c2   : > { %v3780_v25 = vpop.eup %3779  ;;  %3789 = vpow2.f32 %v3201_v3 }
 0x4c3   : > { %v2089_v28 = vadd.f32 1.0, %v3780_v25 }
 0x4c4   : > { %v3782_v29 = vpop.eup %3781 }
 0x4c5   : > { %3791 = vrcp.f32 %v2089_v28  ;;  %v2090_v30 = vadd.f32 1.0, %v3782_v29  ;;  %v3784_v32 = vpop.eup %3783 }
 0x4c6   : > { %3793 = vpow2.f32 %v3204_v26  ;;  %v2117_v22 = vadd.f32 1.0, %v3784_v32 }
 0x4c7   : > { %3795 = vrcp.f32 %v2090_v30 }
 0x4c8   : > { %3797 = vpow2.f32 %v3205_v27 }
 0x4ca   : > { %v3786_v59 = vpop.eup %3785 }
 0x4cb   : > { %v3788_v60 = vpop.eup %3787  ;;  %v2091_v35 = vadd.f32 1.0, %v3786_v59 }
 0x4cc   : > { %v3790_v14 = vpop.eup %3789  ;;  %v2118_v38 = vadd.f32 1.0, %v3788_v60 }
 0x4cd   : > { %3799 = vrcp.f32 %v2091_v35  ;;  %v2092_v31 = vadd.f32 1.0, %v3790_v14 }
 0x4cf   : > { %v3792_v37 = vpop.eup %3791  ;;  %3801 = vrcp.f32 %v2092_v31 }
 0x4d0   : > { %v3794_v44 = vpop.eup %3793  ;;  %3803 = vrcp.f32 %v2117_v22  ;;  %v2129_v40 = vmul.f32 %v3792_v37, %v2059_v41 }
 0x4d1   : > { %v3796_v45 = vpop.eup %3795  ;;  %3805 = vrcp.f32 %v2118_v38  ;;  %v2119_v53 = vadd.f32 1.0, %v3794_v44 }
 0x4d2   : > { %v2133_v50 = vadd.f32 %v2129_v40, %v1778_v34  ;;  %v2130_v49 = vmul.f32 %v3796_v45, %v2062_v39  ;;  %v3798_v21 = vpop.eup %3797 }
 0x4d3   : > { %v2120_v52 = vadd.f32 1.0, %v3798_v21 }
 0x4d4   : > { %3807 = vtanh.f32 %v2133_v50  ;;  %v2134_v55 = vadd.f32 %v2130_v49, %v1781_v46 }
 0x4d6   : > { %3809 = vtanh.f32 %v2134_v55 }
 0x4d7   : > { %v3800_v61 = vpop.eup %3799  ;;  %3811 = vrcp.f32 %v2119_v53 }
 0x4d8   : > { %v2131_v54 = vmul.f32 %v3800_v61, %v2067_v58  ;;  %3813 = vrcp.f32 %v2120_v52 }
 0x4d9   : > { %v3802_v5 = vpop.eup %3801 }
 0x4da   : > { %v3804_v16 = vpop.eup %3803  ;;  %v2135_v11 = vadd.f32 %v2131_v54, %v1786_v36  ;;  %v2132_v4 = vmul.f32 %v3802_v5, %v2070_v56 }
 0x4db   : > { %v3806_v0 = vpop.eup %3805  ;;  %v2141_v12 = vsub.f32 1.0, %v3804_v16  ;;  %v2149_v43 = vmul.f32 %v4983_v62, %v3804_v16 }
 0x4dc   : > { %3815 = vtanh.f32 %v2135_v11  ;;  %v2136_v8 = vadd.f32 %v2132_v4, %v1789_v10  ;;  %v2142_v13 = vsub.f32 1.0, %v3806_v0  ;;  %v2150_v57 = vmul.f32 %v4985_v1, %v3806_v0 }
 0x4dd   : > { %v5067_v4 = vand.u32 (!%p5034_p2), 127, %v798_v63 }
 0x4de   : > { %v3808_v51 = vpop.eup %3807  ;;  %3817 = vtanh.f32 %v2136_v8 }
 0x4df   : > { %v2145_v18 = vmul.f32 %v3808_v51, %v2141_v12  ;;  %v5070_v0 = vadd.s32 (!%p5034_p2), 128, %v5067_v4  ;;  %v5073_v12 = vadd.s32 (!%p5034_p2), 256, %v5067_v4 }
 0x4e0   : > { %v3810_v19 = vpop.eup %3809 }
 0x4e1   : > { %v2146_v20 = vmul.f32 %v3810_v19, %v2142_v13  ;;  %v2153_v23 = vadd.f32 %v2149_v43, %v2145_v18  ;;  %v3812_v47 = vpop.eup %3811 }
 0x4e2   : > { %v3814_v42 = vpop.eup %3813  ;;  %v2143_v25 = vsub.f32 1.0, %v3812_v47  ;;  %v2151_v62 = vmul.f32 %v4992_v2, %v3812_v47 }
 0x4e3   : > { %v2154_v3 = vadd.f32 %v2150_v57, %v2146_v20  ;;  %2450 = vst [vmem:[#allocation2] sm:$0xff] %v2153_v23  ;;  %v2144_v28 = vsub.f32 1.0, %v3814_v42  ;;  %v2152_v27 = vmul.f32 %v4990_v48, %v3814_v42 }
 0x4e5   : > { %v2157_v24 = vpack.c.bf16 %v2154_v3, %v2153_v23  ;;  %2451 = vst [vmem:[#allocation2 + $0x8] sm:$0xff] %v2154_v3 }
 0x4e6   : > { %v3816_v26 = vpop.eup %3815 }
 0x4e7   : > { %2369 = vmatmul.mubr.bf16.vlgmr.msra.gmra.mrb[12].mxu1 %v2157_v24  ;;  %3394 = vmatprep.mubr.bf16.mxu0 %v2157_v24  ;;  %v2147_v29 = vmul.f32 %v3816_v26, %v2143_v25 }
 0x4e8   : > { %v3818_v30 = vpop.eup %3817  ;;  %2378 = vmatprep.mubr.bf16.mxu1 %v4223_v9  ;;  %v2191_v9 = vld [vmem:[%s5307_s30] sm:$0x7] }
 0x4e9   : > { %v2148_v1 = vmul.f32 %v3818_v30, %v2144_v28  ;;  %v2155_v33 = vadd.f32 %v2151_v62, %v2147_v29  ;;  %v2196_v48 = vrot.slane %v2191_v9, %v4776_v7  ;;  %v2200_v2 = vrot.slane %v2191_v9, %v4773_v6 }
 0x4ea   : > { %v2204_v7 = vrot.slane %v2191_v9, %v4785_v17 }
 0x4eb   : > { %v2156_v32 = vadd.f32 %v2152_v27, %v2148_v1  ;;  %2452 = vst [vmem:[#allocation2 + $0x10] sm:$0xff] %v2155_v33 }
 0x4ed   : > { %v2158_v59 = vpack.c.bf16 %v2156_v32, %v2155_v33  ;;  %2453 = vst [vmem:[#allocation2 + $0x18] sm:$0xff] %v2156_v32 }
 0x4ef   : > { %2379 = vmatmul.mubr.bf16.gmra.mrb[16].mxu1 %v2158_v59  ;;  %3395 = vmatmul.mubr.bf16.vlgmr.msra.gmra.mrb[8].mxu0 %v2158_v59 }
 0x5ba   : > { %v2370_v60 = vpop.f32.mrb[12].mxu1 }
 0x5bb   : > { %v2371_v35 = vadd.f32 %v2370_v60, %v2196_v48  ;;  %v2372_v14 = vpop.f32.mrb[13].mxu1 }
 0x5bc   : > { %v2373_v15 = vadd.f32 %v2372_v14, %v2200_v2  ;;  %v2374_v22 = vpop.f32.mrb[14].mxu1 }
 0x5bd   : > { %2438 = vst [vmem:[%s4740_s27] sm:$0xff] %v2371_v35  ;;  %v5044_v41 = vadd.f32 %v2374_v22, %v2196_v48  ;;  %v2376_v31 = vpop.f32.mrb[15].mxu1  ;;  %v3823_v22 = vld [vmem:[#allocation13 + $0x40] sm:$0xff] (!%p5034_p2)  }
 0x5be   : > { %2439 = vst [vmem:[%s4740_s27 + $0x8] sm:$0xff] %v2373_v15  ;;  %v5047_v38 = vadd.f32 %v2376_v31, %v2200_v2  ;;  %v2468_v61 = vmax.f32 (!%p5034_p2), %v2371_v35, %v2373_v15  ;;  %v3825_v31 = vld [vmem:[#allocation13 + $0x80] sm:$0xff] (!%p5034_p2)   ;;  %3320 = vmatprep.subr.bf16.mxu0 (!%p5034_p2), %v3823_v22 }
 0x5bf   : > { %2441 = vst [vmem:[%s4740_s27 + $0x18] sm:$0xff] %v5044_v41  ;;  %3398 = vmatprep.subr.bf16.mxu1 (!%p5034_p2), %v3825_v31 }
 0x5c0   : > { %2442 = vst [vmem:[%s4740_s27 + $0x20] sm:$0xff] %v5047_v38  ;;  %v2472_v54 = vmax.f32 (!%p5034_p2), %v5044_v41, %v5047_v38  ;;  %3399 = vmatpush3.bf16.msra.mxu1 (!%p5034_p2), %v3825_v31 }
 0x5c2   : > { %v2380_v6 = vpop.f32.mrb[16].mxu1  ;;  %v3396_v37 = vpop.f32.mrb[8].mxu0  ;;  %2463 = sbr.rel (%p5034_p2) target bundleno = 2159 (0x86f), region = 108 }
 0x5c3   : > { %v2381_v44 = vadd.f32 %v2380_v6, %v2196_v48  ;;  %v2432_v34 = vadd.f32 %v3396_v37, %v2204_v7  ;;  %v2382_v40 = vpop.f32.mrb[17].mxu1  ;;  %v2423_v39 = vpop.f32.mrb[9].mxu0  ;;  %v3827_v6 = vld [vmem:[#allocation13 + $0x8] sm:$0xff] (!%p5034_p2)   ;;  %v3829_v37 = vld [vmem:[#allocation13 + $0x50] sm:$0xff] (!%p5034_p2)  }
 0x5c4   : > { %v2383_v45 = vadd.f32 %v2382_v40, %v2200_v2  ;;  %v2424_v46 = vadd.f32 %v2423_v39, %v2204_v7  ;;  %v2384_v50 = vpop.f32.mrb[18].mxu1  ;;  %v3397_v49 = vpop.f32.mrb[10].mxu0  ;;  %v3832_v40 = vld [vmem:[#allocation13 + $0x58] sm:$0xff] (!%p5034_p2)  }
 0x5c5   : > { %2444 = vst [vmem:[%s4740_s27 + $0x30] sm:$0xff] %v2381_v44  ;;  %2446 = vst [vmem:[%s4740_s27 + $0x40] sm:$0xff] %v2432_v34  ;;  %v2385_v17 = vadd.f32 %v2384_v50, %v2196_v48  ;;  %v2435_v21 = vadd.f32 %v3397_v49, %v2204_v7  ;;  %v2386_v53 = vpop.f32.mrb[19].mxu1  ;;  %v2426_v55 = vpop.f32.mrb[11].mxu0  ;;  %v3834_v39 = vld [vmem:[#allocation13 + $0x98] sm:$0xff] (!%p5034_p2)   ;;  %v3837_v50 = vld [vmem:[#allocation13 + $0xa0] sm:$0xff] (!%p5034_p2)  }
 0x5c6   : > { %2445 = vst [vmem:[%s4740_s27 + $0x38] sm:$0xff] %v2383_v45  ;;  %2440 = vst [vmem:[%s4740_s27 + $0x10] sm:$0xff] %v2424_v46  ;;  %v2387_v52 = vadd.f32 %v2386_v53, %v2200_v2  ;;  %v2427_v58 = vadd.f32 %v2426_v55, %v2204_v7  ;;  %v2476_v36 = vmax.f32 (!%p5034_p2), %v2381_v44, %v2383_v45  ;;  %v3828_v7 = vld [vmem:[#allocation13 + $0x88] sm:$0xff] (!%p5034_p2)   ;;  %v3836_v49 = vld [vmem:[#allocation13 + $0x20] sm:$0xff] (!%p5034_p2)  }
 0x5c7   : > { %2447 = vst [vmem:[%s4740_s27 + $0x48] sm:$0xff] %v2385_v17  ;;  %2449 = vst [vmem:[%s4740_s27 + $0x58] sm:$0xff] %v2435_v21  ;;  %v2469_v5 = vmax.f32 (!%p5034_p2), %v2468_v61, %v2424_v46  ;;  %3400 = vmatprep.subr.bf16.mxu1 (!%p5034_p2), %v3828_v7 }
 0x5c8   : > { %2448 = vst [vmem:[%s4740_s27 + $0x50] sm:$0xff] %v2387_v52  ;;  %2443 = vst [vmem:[%s4740_s27 + $0x28] sm:$0xff] %v2427_v58  ;;  %v2480_v56 = vmax.f32 (!%p5034_p2), %v2385_v17, %v2387_v52  ;;  %v2477_v16 = vmax.f32 (!%p5034_p2), %v2476_v36, %v2432_v34  ;;  %v2473_v10 = vmax.f32 (!%p5034_p2), %v2472_v54, %v2427_v58  ;;  %3401 = vmatpush3.bf16.msra.mxu1 (!%p5034_p2), %v3828_v7 }
 0x5c9   : > { %2470 = vmax.xlane.f32.xlu0 %v2469_v5 }
 0x5ca   : > { %2478 = vmax.xlane.f32.xlu1 %v2477_v16  ;;  %v2481_v11 = vmax.f32 %v2480_v56, %v2435_v21 }
 0x5cd   : > { %2474 = vmax.xlane.f32.xlu0 %v2473_v10 }
 0x5ce   : > { %2482 = vmax.xlane.f32.xlu1 %v2481_v11 }
 0x656   : > { %v2471_v8 = vpop.xlane.xlu0 %2470 }
 0x657   : > { %v2479_v51 = vpop.xlane.xlu1 %2478  ;;  %vm2484_vm9 = vcmp.eq.f32.partialorder %v2371_v35, %v2471_v8  ;;  %vm2485_vm10 = vcmp.eq.f32.partialorder %v2373_v15, %v2471_v8  ;;  %vm2486_vm11 = vcmp.eq.f32.partialorder %v2424_v46, %v2471_v8  ;;  %v3835_v46 = vld [vmem:[#allocation13 + $0x60] sm:$0xff]  }
 0x658   : > { %vm2490_vm12 = vcmp.eq.f32.partialorder %v2381_v44, %v2479_v51  ;;  %v2496_v13 = vsel %vm2484_vm9, %v5067_v4, 384  ;;  %v2497_v18 = vsel %vm2485_vm10, %v5070_v0, 384  ;;  %vm2491_vm13 = vcmp.eq.f32.partialorder %v2383_v45, %v2479_v51  ;;  %v3831_v44 = vld [vmem:[#allocation13 + $0x90] sm:$0xff]   ;;  %v3833_v45 = vld [vmem:[#allocation13 + $0x18] sm:$0xff]  }
 0x659   : > { %vm2508_vm14 = vcmp.lt.s32.totalorder %v2496_v13, %v2497_v18  ;;  %vm2492_vm15 = vcmp.eq.f32.partialorder %v2432_v34, %v2479_v51  ;;  %v2502_v63 = vsel %vm2490_vm12, %v5067_v4, 384  ;;  %v2503_v43 = vsel %vm2491_vm13, %v5070_v0, 384  ;;  %v3830_v34 = vld [vmem:[#allocation13 + $0x10] sm:$0xff]   ;;  %3402 = vmatprep.subr.bf16.mxu1 %v3831_v44 }
 0x65a   : > { %v2498_v19 = vsel %vm2486_vm11, %v5073_v12, 384  ;;  %v2504_v20 = vsel %vm2492_vm15, %v5073_v12, 384  ;;  %vm2544_vm0 = vcmp.lt.s32.totalorder %v2502_v63, %v2503_v43  ;;  %v2475_v57 = vpop.xlane.xlu0 %2474  ;;  %v2509_v47 = vsel %vm2508_vm14, %v2496_v13, %v2497_v18  ;;  %3403 = vmatpush3.bf16.msra.mxu1 %v3831_v44  ;;  %v3839_v18 = vld [vmem:[#allocation13 + $0x28] sm:$0xff]  }
 0x65b   : > { %v2483_v23 = vpop.xlane.xlu1 %2482  ;;  %vm2487_vm1 = vcmp.eq.f32.partialorder %v5044_v41, %v2475_v57  ;;  %vm2488_vm2 = vcmp.eq.f32.partialorder %v5047_v38, %v2475_v57  ;;  %vm2489_vm3 = vcmp.eq.f32.partialorder %v2427_v58, %v2475_v57  ;;  %vm2510_vm9 = vcmp.lt.s32.totalorder %v2509_v47, %v2498_v19  ;;  %v3824_v41 = vld [vmem:[#allocation13] sm:$0xff]   ;;  %v3826_v38 = vld [vmem:[#allocation13 + $0x48] sm:$0xff]   ;;  %3404 = vmatprep.subr.bf16.mxu1 %v3834_v39  ;;  %v3844_v57 = vld [vmem:[#allocation13 + $0x78] sm:$0xff]  }
 0x65c   : > { %vm2493_vm4 = vcmp.eq.f32.partialorder %v2385_v17, %v2483_v23  ;;  %v2499_v3 = vsel %vm2487_vm1, %v5067_v4, 384  ;;  %v2500_v42 = vsel %vm2488_vm2, %v5070_v0, 384  ;;  %v2501_v24 = vsel %vm2489_vm3, %v5073_v12, 384  ;;  %3321 = vmatpush3.bf16.msra.mxu0 %v3824_v41  ;;  %v3838_v17 = vld [vmem:[#allocation13 + $0x68] sm:$0xff]  }
 0x65d   : > { %vm2494_vm5 = vcmp.eq.f32.partialorder %v2387_v52, %v2483_v23  ;;  %vm2526_vm6 = vcmp.lt.s32.totalorder %v2499_v3, %v2500_v42  ;;  %vm2495_vm7 = vcmp.eq.f32.partialorder %v2435_v21, %v2483_v23  ;;  %v2505_v25 = vsel %vm2493_vm4, %v5067_v4, 384  ;;  %3322 = vmatprep.subr.bf16.mxu0 %v3826_v38  ;;  %v3845_v23 = vld [vmem:[#allocation13 + $0x38] sm:$0xff]  }
 0x65e   : > { %v2506_v26 = vsel %vm2494_vm5, %v5070_v0, 384  ;;  %v2507_v28 = vsel %vm2495_vm7, %v5073_v12, 384  ;;  %v2527_v29 = vsel %vm2526_vm6, %v2499_v3, %v2500_v42  ;;  %v2511_v62 = vsel %vm2510_vm9, %v2509_v47, %v2498_v19  ;;  %3405 = vmatpush3.bf16.msra.mxu1 %v3834_v39  ;;  %v3842_v19 = vld [vmem:[#allocation13 + $0x30] sm:$0xff]   ;;  %v3846_v47 = vld [vmem:[#allocation13 + $0xb8] sm:$0xff]  }
 0x65f   : > { %vm2562_vm8 = vcmp.lt.s32.totalorder %v2505_v25, %v2506_v26  ;;  %vm2528_vm10 = vcmp.lt.s32.totalorder %v2527_v29, %v2501_v24  ;;  %v2545_v30 = vsel %vm2544_vm0, %v2502_v63, %v2503_v43  ;;  %v2513_v27 = vshra.s32 %v2511_v62, 16  ;;  %3406 = vmatprep.subr.bf16.mxu1 %v3837_v50  ;;  %v3840_v63 = vld [vmem:[#allocation13 + $0xa8] sm:$0xff]   ;;  %v3841_v43 = vld [vmem:[#allocation13 + $0x70] sm:$0xff]  }
 0x660   : > { %v2563_v1 = vsel %vm2562_vm8, %v2505_v25, %v2506_v26  ;;  %v2529_v33 = vsel %vm2528_vm10, %v2527_v29, %v2501_v24  ;;  %vm2546_vm11 = vcmp.lt.s32.totalorder %v2545_v30, %v2504_v20  ;;  %3323 = vmatpush3.bf16.msra.mxu0 %v3827_v6  ;;  %v2512_v21 = vand.u32 65535, %v2511_v62 }
 0x661   : > { %vm2564_vm12 = vcmp.lt.s32.totalorder %v2563_v1, %v2507_v28  ;;  %v2531_v32 = vshra.s32 %v2529_v33, 16  ;;  %v5090_v59 = vsel %vm2546_vm11, %v2545_v30, %v2504_v20  ;;  %v2515_v48 = vcvt.s32.f32 %v2513_v27  ;;  %3324 = vmatprep.subr.bf16.mxu0 %v3829_v37  ;;  %v3843_v20 = vld [vmem:[#allocation13 + $0xb0] sm:$0xff]  }
 0x662   : > { %v5092_v9 = vsel %vm2564_vm12, %v2563_v1, %v2507_v28  ;;  %v2549_v2 = vshra.s32 %v5090_v59, 16  ;;  %3407 = vmatpush3.bf16.msra.mxu1 %v3837_v50  ;;  %v2530_v53 = vand.u32 65535, %v2529_v33  ;;  %v2514_v52 = vcvt.s32.f32 %v2512_v21 }
 0x663   : > { %v2567_v60 = vshra.s32 %v5092_v9, 16  ;;  %v2533_v35 = vcvt.s32.f32 %v2531_v32  ;;  %2516 = vmin.xlane.f32.xlu0 %v2515_v48  ;;  %v2548_v58 = vand.u32 65535, %v5090_v59  ;;  %v2566_v54 = vand.u32 65535, %v5092_v9  ;;  %3408 = vmatprep.subr.bf16.mxu1 %v3840_v63 }
 0x664   : > { %v2551_v14 = vcvt.s32.f32 %v2549_v2  ;;  %3325 = vmatpush3.bf16.msra.mxu0 %v3830_v34  ;;  %v2532_v36 = vcvt.s32.f32 %v2530_v53 }
 0x665   : > { %2534 = vmin.xlane.f32.xlu1 %v2533_v35  ;;  %v5096_v15 = vcvt.s32.f32 %v2567_v60  ;;  %3326 = vmatprep.subr.bf16.mxu0 %v3832_v40  ;;  %v2550_v10 = vcvt.s32.f32 %v2548_v58  ;;  %v2568_v8 = vcvt.s32.f32 %v2566_v54 }
 0x666   : > { %3409 = vmatpush3.bf16.msra.mxu1 %v3840_v63 }
 0x667   : > { %2552 = vmin.xlane.f32.xlu0 %v2551_v14  ;;  %3410 = vmatprep.subr.bf16.mxu1 %v3843_v20 }
 0x668   : > { %3327 = vmatpush3.bf16.msra.mxu0 %v3833_v45 }
 0x669   : > { %2570 = vmin.xlane.f32.xlu1 %v5096_v15  ;;  %3328 = vmatprep.subr.bf16.mxu0 %v3835_v46 }
 0x66a   : > { %3411 = vmatpush3.bf16.msra.mxu1 %v3843_v20 }
 0x66b   : > { %3412 = vmatprep.subr.bf16.mxu1 %v3846_v47 }
 0x66c   : > { %3329 = vmatpush3.bf16.msra.mxu0 %v3836_v49 }
 0x66d   : > { %3330 = vmatprep.subr.bf16.mxu0 %v3838_v17 }
 0x66e   : > { %3413 = vmatpush3.bf16.msra.mxu1 %v3846_v47 }
 0x670   : > { %3331 = vmatpush3.bf16.msra.mxu0 %v3839_v18 }
 0x671   : > { %3332 = vmatprep.subr.bf16.mxu0 %v3841_v43 }
 0x674   : > { %3333 = vmatpush3.bf16.msra.mxu0 %v3842_v19 }
 0x675   : > { %3334 = vmatprep.subr.bf16.mxu0 %v3844_v57 }
 0x678   : > { %3335 = vmatpush3.bf16.msra.mxu0 %v3845_v23 }
 0x6f0   : > { %v2517_v55 = vpop.xlane.xlu0 %2516 }
 0x6f1   : > { %vm2518_vm13 = vcmp.eq.f32.partialorder %v2515_v48, %v2517_v55  ;;  %v2523_v3 = vcvt.f32.s32 %v2517_v55 }
 0x6f2   : > { %v2535_v61 = vpop.xlane.xlu1 %2534  ;;  %v2519_v56 = vsel %vm2518_vm13, %v2514_v52, inf }
 0x6f3   : > { %vm2536_vm14 = vcmp.eq.f32.partialorder %v2533_v35, %v2535_v61  ;;  %2520 = vmin.xlane.f32.xlu0 %v2519_v56  ;;  %v2541_v42 = vcvt.f32.s32 %v2535_v61  ;;  %v2524_v26 = vshll.u32 %v2523_v3, 16 }
 0x6f4   : > { %v2537_v5 = vsel %vm2536_vm14, %v2532_v36, inf  ;;  %v2553_v16 = vpop.xlane.xlu0 %2552 }
 0x6f5   : > { %2538 = vmin.xlane.f32.xlu1 %v2537_v5  ;;  %vm2554_vm15 = vcmp.eq.f32.partialorder %v2551_v14, %v2553_v16  ;;  %v2559_v24 = vcvt.f32.s32 %v2553_v16  ;;  %v2542_v30 = vshll.u32 %v2541_v42, 16 }
 0x6f6   : > { %v2571_v11 = vpop.xlane.xlu1 %2570  ;;  %v2555_v51 = vsel %vm2554_vm15, %v2550_v10, inf }
 0x6f7   : > { %vm2572_vm0 = vcmp.eq.f32.partialorder %v5096_v15, %v2571_v11  ;;  %2556 = vmin.xlane.f32.xlu0 %v2555_v51  ;;  %v2577_v28 = vcvt.f32.s32 %v2571_v11  ;;  %v2560_v33 = vshll.u32 %v2559_v24, 16  ;;  %v4224_v15 = vmov 1.0|1.0  }
 0x6f8   : > { %v2573_v13 = vsel %vm2572_vm0, %v2568_v8, inf }
 0x6f9   : > { %2574 = vmin.xlane.f32.xlu1 %v2573_v13  ;;  %v2578_v9 = vshll.u32 %v2577_v28, 16 }
 0x780   : > { %v2521_v25 = vpop.xlane.xlu0 %2520 }
 0x781   : > { %v2522_v29 = vcvt.f32.s32 %v2521_v25 }
 0x782   : > { %v2539_v62 = vpop.xlane.xlu1 %2538 }
 0x783   : > { %v2540_v1 = vcvt.f32.s32 %v2539_v62  ;;  %v2525_v27 = vadd.s32 %v2524_v26, %v2522_v29 }
 0x784   : > { %v2557_v59 = vpop.xlane.xlu0 %2556 }
 0x785   : > { %v2543_v32 = vadd.s32 %v2542_v30, %v2540_v1  ;;  %v2558_v48 = vcvt.f32.s32 %v2557_v59  ;;  %vm2581_vm1 = vcmp.eq.s32.totalorder %v5070_v0, %v2525_v27  ;;  %vm2582_vm6 = vcmp.eq.s32.totalorder %v5073_v12, %v2525_v27 }
 0x786   : > { %v2575_v2 = vpop.xlane.xlu1 %2574  ;;  %vm2580_vm8 = vcmp.eq.s32.totalorder %v5067_v4, %v2525_v27 }
 0x787   : > { %v2576_v60 = vcvt.f32.s32 %v2575_v2  ;;  %vm2584_vm2 = vcmp.eq.s32.totalorder %v5070_v0, %v2543_v32  ;;  %vm2585_vm3 = vcmp.eq.s32.totalorder %v5073_v12, %v2543_v32  ;;  %vm2583_vm4 = vcmp.eq.s32.totalorder %v5067_v4, %v2543_v32 }
 0x788   : > { %v2561_v35 = vadd.s32 %v2560_v33, %v2558_v48  ;;  %vm3254_vm5 = vmpackc.low %vm2584_vm2, %vm2581_vm1 }
 0x789   : > { %v2579_v14 = vadd.s32 %v2578_v9, %v2576_v60  ;;  %3255 = vmatprep.mubr.msk.bf16.mxu0 %vm3254_vm5, %v4224_v15  ;;  %vm3262_vm7 = vmpackc.low %vm2585_vm3, %vm2582_vm6 }
 0x78a   : > { %3414 = vmatprep.mubr.msk.bf16.mxu1 %vm3262_vm7, %v4224_v15  ;;  %vm3256_vm9 = vmpackc.low %vm2583_vm4, %vm2580_vm8  ;;  %vm2587_vm10 = vcmp.eq.s32.totalorder %v5070_v0, %v2561_v35  ;;  %vm2588_vm14 = vcmp.eq.s32.totalorder %v5073_v12, %v2561_v35  ;;  %vm2586_vm1 = vcmp.eq.s32.totalorder %v5067_v4, %v2561_v35 }
 0x78b   : > { %3257 = vmatmul.mubr.msk.bf16.vlgmr.msra.gmra.mrb[0].mxu0 %vm3256_vm9, %v4224_v15  ;;  %vm2590_vm11 = vcmp.eq.s32.totalorder %v5070_v0, %v2579_v14  ;;  %vm2591_vm12 = vcmp.eq.s32.totalorder %v5073_v12, %v2579_v14  ;;  %vm2589_vm0 = vcmp.eq.s32.totalorder %v5067_v4, %v2579_v14 }
 0x78c   : > { %vm3258_vm13 = vmpackc.low %vm2590_vm11, %vm2587_vm10 }
 0x78d   : > { %3259 = vmatprep.mubr.msk.bf16.mxu0 %vm3258_vm13, %v4224_v15  ;;  %vm3264_vm15 = vmpackc.low %vm2591_vm12, %vm2588_vm14 }
 0x78e   : > { %3415 = vmatmul.mubr.msk.bf16.vlgmr.msra.gmra.mrb[0].mxu1 %vm3264_vm15, %v4224_v15  ;;  %vm3260_vm2 = vmpackc.low %vm2589_vm0, %vm2586_vm1 }
 0x793   : > { %3261 = vmatmul.mubr.msk.bf16.gmra.mrb[4].mxu0 %vm3260_vm2, %v4224_v15 }
 0x85e   : > { %v3336_v22 = vpop.f32.mrb[0].mxu0 }
 0x85f   : > { %v3337_v41 = vpop.f32.mrb[1].mxu0 }
 0x860   : > { %v3338_v31 = vadd.f32 %v3337_v41, %v3336_v22  ;;  %v3339_v38 = vpop.f32.mrb[2].mxu0 }
 0x861   : > { %v3340_v7 = vpop.f32.mrb[3].mxu0  ;;  %v3416_v0 = vpop.f32.mrb[0].mxu1 }
 0x862   : > { %v3341_v6 = vadd.f32 %v3340_v7, %v3339_v38  ;;  %v2885_v37 = vpop.f32.mrb[1].mxu1 }
 0x863   : > { %v2886_v44 = vadd.f32 %v3338_v31, %v2885_v37  ;;  %v3417_v34 = vpop.f32.mrb[2].mxu1 }
 0x864   : > { %v2888_v12 = vpop.f32.mrb[3].mxu1 }
 0x865   : > { %2900 = vst [vmem:[#allocation3] sm:$0xff] %v2886_v44  ;;  %v2889_v40 = vadd.f32 %v3341_v6, %v2888_v12 }
 0x866   : > { %v3342_v39 = vpop.f32.mrb[4].mxu0 }
 0x867   : > { %2901 = vst [vmem:[#allocation3 + $0x8] sm:$0xff] %v2889_v40  ;;  %v3343_v45 = vpop.f32.mrb[5].mxu0 }
 0x868   : > { %v3344_v46 = vadd.f32 %v3343_v45, %v3342_v39  ;;  %v3345_v4 = vpop.f32.mrb[6].mxu0 }
 0x869   : > { %v3346_v50 = vpop.f32.mrb[7].mxu0 }
 0x86a   : > { %v2894_v49 = vadd.f32 %v3416_v0, %v3344_v46  ;;  %v3347_v17 = vadd.f32 %v3346_v50, %v3345_v4 }
 0x86c   : > { %2902 = vst [vmem:[#allocation3 + $0x10] sm:$0xff] %v2894_v49  ;;  %v2897_v21 = vadd.f32 %v3417_v34, %v3347_v17 }
 0x86e   : > { %2903 = vst [vmem:[#allocation3 + $0x18] sm:$0xff] %v2897_v21 }
 0x86f PF: > { %s5308_s12 = sld [smem:[#allocation32_spill]]  ;;  %s5309_s5 = sld [smem:[#allocation31_spill]] }
 0x870   : > { %s5311_s8 = sld [smem:[#allocation34_spill]]  ;;  %s2921_s22 = sshll.u32 %s4740_s27, 4  ;;  %s5117_s22 = int_to_ptr.vmem [resolvable:$true] %s2921_s22 }
 0x871   : > { %s5312_s15 = sld [smem:[#allocation51_spill]]  ;;  %s5126_s2 = scalar_lea.sflag [#allocation10], %s648_s23 }
 0x872   : > { %s4043_s19 = scalar_lea.vmem %s5117_s22, 1536  ;;  %s4225_s27 = smov [#allocation19]  }
 0x873   : > { %p4044_p0 = scmp.ne.s32.totalorder %s5117_s22, %s4043_s19  ;;  %s4047_s30 = sshll.u32 %s4225_s27, 4  ;;  %s4048_s30 = int_to_ptr.vmem [resolvable:$false] %s4047_s30 }
 0x874   : > { %p4050_p3 = scmp.lt.s32.totalorder %s5117_s22, %s4048_s30 }
 0x875   : > { %s3443_s9 = smul.u32 12, %s5308_s12  ;;  %s4049_s12 = scalar_lea.vmem %s4048_s30, 3072 }
 0x876   : > { %s3444_s3 = smul.u32 24, %s5309_s5  ;;  %p5313_p8 = scmp.ne.s32.totalorder %s5311_s8, 0 }
 0x877   : > { %p4051_p5 = scmp.lt.s32.totalorder %s4049_s12, %s4043_s19 }
 0x878   : > { %s2918_s0 = sadd.s32 %s3444_s3, %s3443_s9  ;;  %p4045_p11 = pnand %p4044_p0, %p5313_p8 }
 0x879   : > { %s3268_s11 = sshll.u32 %s2918_s0, 7  ;;  %p4052_p1 = por %p4051_p5, %p4050_p3 }
 0x87a   : > { %s5122_s29 = scalar_lea.hbm %s5312_s15, %s3268_s11  ;;  %p4046_p13 = pneg %p4045_p11 }
 0x87c   : > { %p4053_p7 = pnand %p4052_p1, %p4046_p13 }
 0x87e   : > { %4056 = shalt.err (!%p4053_p7)
}
 0x87f   : > { %s4057_s23 = scalar_lea.hbm %s5122_s29, 1536  ;;  %s4061_s9 = scalar_lea.hbm %s5312_s15, 21504 }
 0x880   : > { %p4058_p6 = scmp.ne.s32.totalorder %s5122_s29, %s4057_s23  ;;  %p4062_p4 = scmp.lt.u32.totalorder %s5122_s29, %s5312_s15 }
 0x881   : > { %p4063_p10 = scmp.lt.u32.totalorder %s4061_s9, %s4057_s23  ;;  %p4065_p0 = scmp.lt.u32.totalorder %s4057_s23, %s5122_s29 }
 0x882   : > { %p4059_p9 = pnand %p4058_p6, %p5313_p8 }
 0x883   : > { %p4064_p2 = por %p4063_p10, %p4062_p4 }
 0x884   : > { %p4060_p12 = pneg %p4059_p9 }
 0x885   : > { %p4066_p11 = por %p4065_p0, %p4064_p2 }
 0x887   : > { %p4067_p13 = pnand %p4066_p11, %p4060_p12 }
 0x889   : > { %4070 = shalt.err (!%p4067_p13)
}
 0x88a   : > { %s4226_s11 = smov 384   ;;  %s4227_s14 = smov 24  }
 0x88b   : > { %3467 = dma.vmem_to_hbm [thread:$0]  (%p5313_p8), %s5117_s22, 1536, %s5122_s29, %s5126_s2, %s4226_s11, %s4226_s11, %s4227_s14  }
 0x88c PF: > { %s5314_s7 = sld [smem:[#allocation29_spill]]  ;;  %s5315_s19 = sld [smem:[#allocation35_spill]] }
 0x88d   : > { %p3504_p3 = scmp.ge.s32.totalorder %s4207_s26, 2 }
 0x892   : > { %s2936_s27 = sand.u32 1, %s5314_s7   ;;  %p5316_p5 = scmp.ne.s32.totalorder %s5315_s19, 0 }
 0x893   : > { %s2937_s30 = scalar_lea.sflag [#allocation10], %s2936_s27 }
 0x894   : > { %p3492_p1 = pnand %p3504_p3, %p5316_p5 }
 0x896   : > { %4150 = dma.done.wait (!%p3492_p1), %s2937_s30, 1536  }
 0x897   : > { %4152 = vsyncadd (!%p3492_p1), %s2937_s30, 4294965760  ;;  %s49_s26 = sadd.s32 1, %s4207_s26   ;;  %s5318_s9 = sld [smem:[#allocation30_spill]] }
 0x898   : > { %p5155_p7 = scmp.ge.s32.totalorder %s49_s26, 16   ;;  %s5319_s8 = sld [smem:[#allocation37_spill]] }
 0x899   : > { %s5321_s12 = smov %s4163_s13  ;;  %s5322_s13 = smov %s4572_s6 }
 0x89a   : > { %s5323_s0 = smov %s4171_s17  ;;  %s5324_s17 = smov %s4175_s18 }
 0x89b   : > { %s5325_s18 = smov %s4600_s10  ;;  %s5326_s19 = smov %s4183_s20 }
 0x89c   : > { %s5327_s20 = smov %s4187_s21  ;;  %s5328_s21 = smov %s4567_s16 }
 0x89d   : > { %s5329_s22 = smov %s4199_s24  ;;  %s5330_s23 = smov %s4203_s25 }
 0x89e   : > { %s5331_s24 = smov %s5334_s28  ;;  %s5332_s25 = smov %s5319_s8 }
 0x89f   :  { %48 = sbr.rel (!%p5155_p7) target bundleno = 50 (0x32), region = 164 }
 0x8a6   :  { %2942 = vsyncpa [#allocation9], 1 }
 0x8a7   :  { %2944 = vsyncpa [#allocation9 + $0x1], 1 }
 0x8a8   :  { %2945 = vsyncpa [#allocation12], 1 }
 0x8a9   :  { %2947 = vsyncpa [#allocation12 + $0x1], 1 }
 0x8aa   :  { %2948 = vsyncpa [#allocation15], 1 }
 0x8ab   :  { %2949 = vsyncpa [#allocation18], 1 }
 0x8ac   :  { %2950 = vsyncpa [#allocation10], 1 }
 0x8ad   :  { %2952 = vsyncpa [#allocation10 + $0x1], 1 }

</bundles_post_ra>
